<compile_context>
chip_gen: v7x
topology: tpu7x:2x2x1
jax: 0.10.0
libtpu: 0.0.40
codegen_flags: <defaults>
</compile_context>

<pallas_src>
import functools

import jax
import jax.numpy as jnp
from jax.experimental import pallas as pl
from jax.experimental.pallas import tpu as pltpu

# ----------------------------- synthetic config ------------------------------
HIDDEN = 128          # "hidden_size" (small synthetic BERT)
NUM_HEADS = 2
HEAD_DIM = HIDDEN // NUM_HEADS
INTERMEDIATE = 256
NUM_LAYERS = 3
VOCAB = 100
VOCAB_PAD = 128       # word table padded to a full lane tile
MAX_POS = 32
TYPE_VOCAB = 2
NUM_LABELS = 2
LN_EPS = 1e-12
NEG_INF = -1e9
CLS_PAD = 128         # lane-dense width of the packed classifier output

# row offsets inside the packed f32 "global params" array (GP_ROWS, HIDDEN)
GP_EMB_LN_G = 0
GP_EMB_LN_B = 1
GP_BCLS = 2
GP_WORD = 8                       # f32 word-embedding table rows [8, 8+VOCAB_PAD)
GP_POS = GP_WORD + VOCAB_PAD      # f32 position(+type0) table rows
GP_ROWS = GP_POS + MAX_POS        # = 168

# row layout inside the packed per-layer f32 params (NUM_LAYERS, 8, 3*HIDDEN)
LP_BQKV, LP_BO, LP_LN1G, LP_LN1B, LP_BI, LP_BO2, LP_LN2G, LP_LN2B = range(8)


# ------------------------------- kernel helpers ------------------------------
def _layer_norm(x, gamma, beta):
    mean = jnp.mean(x, axis=-1, keepdims=True)
    var = jnp.mean(jnp.square(x - mean), axis=-1, keepdims=True)
    return (x - mean) * jax.lax.rsqrt(var + LN_EPS) * gamma + beta


def fused_bert_kernel(ids_ref, mask_ref, gp_ref, lp_ref, wbig_ref, wo2_ref,
                      wcls_ref, logits_ref, *, batch, seq,
                      teacher_layer, student_layer):
    """Embeddings + all layers + mean-pool + both classifier heads in VMEM."""
    BS = batch * seq
    H = HIDDEN
    bf16 = jnp.bfloat16
    f32 = jnp.float32

    # ------------- embeddings: exact f32 one-hot gather + pos/type -----------
    ids = ids_ref[...]                                          # (BS, 1) int32
    lane = jax.lax.broadcasted_iota(jnp.int32, (BS, VOCAB_PAD), 1)
    one_hot = (lane == ids).astype(f32)                         # (BS, VOCAB_PAD)
    word_tab = gp_ref[GP_WORD:GP_WORD + VOCAB_PAD, :]           # (VOCAB_PAD, H) f32
    emb = jnp.dot(one_hot, word_tab, preferred_element_type=f32)   # exact gather
    pos_tab = gp_ref[GP_POS:GP_POS + seq, :]                    # (S, H); type[0] folded
    emb = emb + jnp.concatenate([pos_tab] * batch, axis=0)      # (BS, H)
    x = _layer_norm(emb, gp_ref[GP_EMB_LN_G:GP_EMB_LN_G + 1, :],
                    gp_ref[GP_EMB_LN_B:GP_EMB_LN_B + 1, :])     # hidden_states[0]

    # -------- block-diagonal additive attention mask (built once) ------------
    maskf = mask_ref[...]                                       # (1, BS) f32
    ri = jax.lax.broadcasted_iota(jnp.int32, (BS, BS), 0)
    ci = jax.lax.broadcasted_iota(jnp.int32, (BS, BS), 1)
    same = ri < 0                                               # all-False
    for b in range(batch):                                      # static, tiny
        same = same | ((ri >= b * seq) & (ri < (b + 1) * seq)
                       & (ci >= b * seq) & (ci < (b + 1) * seq))
    key_valid = jnp.broadcast_to(maskf, (BS, BS)) > 0.5
    big_mask = jnp.where(same & key_valid, 0.0, NEG_INF).astype(f32)   # (BS, BS)

    # distillation taps (static indices) — keep only what is read later.
    t_idx = teacher_layer - 1
    s_idx = student_layer - 1
    taps = {}
    if t_idx == 0 or s_idx == 0:
        taps[0] = x

    for l in range(NUM_LAYERS):                                 # static unroll
        w = wbig_ref[l]                                         # (H, 6H) bf16: [Wqkv|Wo|Wi]
        p = lp_ref[l]                                           # (8, 3H) f32
        bqkv = p[LP_BQKV:LP_BQKV + 1, :]
        bo = p[LP_BO:LP_BO + 1, :H]
        ln1g = p[LP_LN1G:LP_LN1G + 1, :H]
        ln1b = p[LP_LN1B:LP_LN1B + 1, :H]
        bi = p[LP_BI:LP_BI + 1, :INTERMEDIATE]
        bo2 = p[LP_BO2:LP_BO2 + 1, :H]
        ln2g = p[LP_LN2G:LP_LN2G + 1, :H]
        ln2b = p[LP_LN2B:LP_LN2B + 1, :H]

        # fused QKV projection: one (BS,H)x(H,3H) matmul, bf16 in / f32 acc.
        qkv = jnp.dot(x.astype(bf16), w[:, :3 * H],
                      preferred_element_type=f32) + bqkv        # (BS, 3H)

        ctx_heads = []
        for h in range(NUM_HEADS):                              # static 2-iter
            lo = h * HEAD_DIM
            qh = qkv[:, lo:lo + HEAD_DIM].astype(bf16)
            kh = qkv[:, H + lo:H + lo + HEAD_DIM].astype(bf16)
            vh = qkv[:, 2 * H + lo:2 * H + lo + HEAD_DIM].astype(bf16)
            # flat (BS, BS) scores; 1/sqrt(head_dim) pre-folded into Wq / bq;
            # block-diagonal mask restores per-sequence softmax exactly.
            scores = jax.lax.dot_general(
                qh, kh, (((1,), (1,)), ((), ())),
                preferred_element_type=f32) + big_mask
            scores = scores - jnp.max(scores, axis=-1, keepdims=True)
            pr = jnp.exp(scores)
            pr = pr * pl.reciprocal(jnp.sum(pr, axis=-1, keepdims=True),
                                    approx=True)
            ctx_heads.append(jnp.dot(pr.astype(bf16), vh,
                                     preferred_element_type=f32))    # (BS, hd)
        ctx = jnp.concatenate(ctx_heads, axis=-1)               # (BS, H)

        # single K=H output projection
        attn = jnp.dot(ctx.astype(bf16), w[:, 3 * H:4 * H],
                       preferred_element_type=f32) + bo
        h1 = _layer_norm(x + attn, ln1g, ln1b)

        ff = jnp.dot(h1.astype(bf16), w[:, 4 * H:],
                     preferred_element_type=f32) + bi
        # TODO(synk): HF BERT uses exact erf-GELU; tanh approximation used for TPU lowering.
        ff = jax.nn.gelu(ff, approximate=True)
        ff = jnp.dot(ff.astype(bf16), wo2_ref[l],
                     preferred_element_type=f32) + bo2
        x = _layer_norm(h1 + ff, ln2g, ln2b)

        if t_idx == l + 1 or s_idx == l + 1:
            taps[l + 1] = x

    # -------- mean pooling over ALL positions (matches torch.mean(dim=1)) ----
    inv_s = 1.0 / seq

    def pool(t):                                                # (BS,H) -> (B,H)
        rows = [jnp.sum(t[b * seq:(b + 1) * seq, :], axis=0, keepdims=True) * inv_s
                for b in range(batch)]
        return jnp.concatenate(rows, axis=0)

    pooled = jnp.concatenate([pool(taps[t_idx]), pool(taps[s_idx])], axis=0)
    pad_rows = logits_ref.shape[0] - 2 * batch                  # sublane-dense store
    if pad_rows:
        pooled = jnp.concatenate(
            [pooled, jnp.zeros((pad_rows, H), f32)], axis=0)

    # single lane-dense + sublane-dense classifier matmul (unmasked vst).
    logits_ref[...] = (jnp.dot(pooled.astype(bf16), wcls_ref[...],
                               preferred_element_type=f32)
                       + gp_ref[GP_BCLS:GP_BCLS + 1, :])


# ------------------------------ parameter init --------------------------------
def init_params(key):
    keys = iter(jax.random.split(key, 64))

    def dense(shape):
        return 0.02 * jax.random.normal(next(keys), shape, jnp.float32)

    def zeros(shape):
        return jnp.zeros(shape, jnp.float32)

    def ones(shape):
        return jnp.ones(shape, jnp.float32)

    params = {
        'word_emb': dense((VOCAB, HIDDEN)),
        'pos_emb': dense((MAX_POS, HIDDEN)),
        'type_emb': dense((TYPE_VOCAB, HIDDEN)),
        'emb_ln_g': ones((1, HIDDEN)),
        'emb_ln_b': zeros((1, HIDDEN)),
        'layers': [],
        'cls_t_w': dense((HIDDEN, NUM_LABELS)),
        'cls_t_b': zeros((1, NUM_LABELS)),
        'cls_s_w': dense((HIDDEN, NUM_LABELS)),
        'cls_s_b': zeros((1, NUM_LABELS)),
    }
    for _ in range(NUM_LAYERS):
        params['layers'].append({
            'wq': dense((HIDDEN, HIDDEN)), 'bq': zeros((1, HIDDEN)),
            'wk': dense((HIDDEN, HIDDEN)), 'bk': zeros((1, HIDDEN)),
            'wv': dense((HIDDEN, HIDDEN)), 'bv': zeros((1, HIDDEN)),
            'wo': dense((HIDDEN, HIDDEN)), 'bo': zeros((1, HIDDEN)),
            'ln1_g': ones((1, HIDDEN)), 'ln1_b': zeros((1, HIDDEN)),
            'wi': dense((HIDDEN, INTERMEDIATE)), 'bi': zeros((1, INTERMEDIATE)),
            'wo2': dense((INTERMEDIATE, HIDDEN)), 'bo2': zeros((1, HIDDEN)),
            'ln2_g': ones((1, HIDDEN)), 'ln2_b': zeros((1, HIDDEN)),
        })
    return params


def prepare_fused_params(params):
    """Fuse QKV, fold 1/sqrt(hd), pack small f32 params, pack classifiers, cast bf16."""
    scale = 1.0 / (HEAD_DIM ** 0.5)
    H = HIDDEN

    w_big, wo2, lparams = [], [], []
    for lp in params['layers']:
        wqkv = jnp.concatenate([lp['wq'] * scale, lp['wk'], lp['wv']], axis=1)
        w_big.append(jnp.concatenate([wqkv, lp['wo'], lp['wi']], axis=1))   # (H, 6H)
        wo2.append(lp['wo2'])

        rows = jnp.zeros((8, 3 * H), jnp.float32)
        rows = rows.at[LP_BQKV].set(
            jnp.concatenate([lp['bq'][0] * scale, lp['bk'][0], lp['bv'][0]]))
        rows = rows.at[LP_BO, :H].set(lp['bo'][0])
        rows = rows.at[LP_LN1G, :H].set(lp['ln1_g'][0])
        rows = rows.at[LP_LN1B, :H].set(lp['ln1_b'][0])
        rows = rows.at[LP_BI, :INTERMEDIATE].set(lp['bi'][0])
        rows = rows.at[LP_BO2, :H].set(lp['bo2'][0])
        rows = rows.at[LP_LN2G, :H].set(lp['ln2_g'][0])
        rows = rows.at[LP_LN2B, :H].set(lp['ln2_b'][0])
        lparams.append(rows)

    # packed classifier: teacher lanes [0,2), student lanes [2,4), rest zero.
    wcls = jnp.zeros((H, CLS_PAD), jnp.float32)
    wcls = wcls.at[:, :NUM_LABELS].set(params['cls_t_w'])
    wcls = wcls.at[:, NUM_LABELS:2 * NUM_LABELS].set(params['cls_s_w'])
    bcls = jnp.zeros((CLS_PAD,), jnp.float32)
    bcls = bcls.at[:NUM_LABELS].set(params['cls_t_b'][0])
    bcls = bcls.at[NUM_LABELS:2 * NUM_LABELS].set(params['cls_s_b'][0])

    # global f32 pack: emb-LN + classifier bias + f32 word table + pos(+type0).
    gparams = jnp.zeros((GP_ROWS, H), jnp.float32)
    gparams = gparams.at[GP_EMB_LN_G].set(params['emb_ln_g'][0])
    gparams = gparams.at[GP_EMB_LN_B].set(params['emb_ln_b'][0])
    gparams = gparams.at[GP_BCLS].set(bcls)
    gparams = gparams.at[GP_WORD:GP_WORD + VOCAB].set(params['word_emb'])
    # token_type_ids are all zero in this forward -> fold type_emb[0] into pos.
    gparams = gparams.at[GP_POS:GP_POS + MAX_POS].set(
        params['pos_emb'] + params['type_emb'][0:1])

    return {
        'gparams': gparams,                                        # (168, H) f32
        'lparams': jnp.stack(lparams, axis=0),                     # (L, 8, 3H) f32
        'w_big': jnp.stack(w_big, axis=0).astype(jnp.bfloat16),    # (L, H, 6H) bf16
        'wo2': jnp.stack(wo2, axis=0).astype(jnp.bfloat16),        # (L, I, H) bf16
        'wcls': wcls.astype(jnp.bfloat16),                         # (H, 128) bf16
    }


# --------------------------------- forward ------------------------------------
@functools.partial(jax.jit, static_argnums=(3, 4))
def bert_for_sequence_classification(fp, input_ids, attention_mask,
                                     teacher_layer, student_layer):
    B, S = input_ids.shape
    BS = B * S
    out_rows = max(8, ((2 * B + 7) // 8) * 8)      # full-sublane classifier store

    ids_col = input_ids.reshape(BS, 1).astype(jnp.int32)
    maskf = attention_mask.reshape(1, BS).astype(jnp.float32)

    kernel = functools.partial(fused_bert_kernel, batch=B, seq=S,
                               teacher_layer=teacher_layer,
                               student_layer=student_layer)
    vmem = pl.BlockSpec(memory_space=pltpu.MemorySpace.VMEM)
    inputs = [ids_col, maskf, fp['gparams'], fp['lparams'],
              fp['w_big'], fp['wo2'], fp['wcls']]

    logits = pl.pallas_call(
        kernel,
        out_shape=jax.ShapeDtypeStruct((out_rows, CLS_PAD), jnp.float32),
        in_specs=[vmem] * len(inputs),
        out_specs=vmem,
    )(*inputs)

    teacher_logits = logits[:B, :NUM_LABELS]
    student_logits = logits[B:2 * B, NUM_LABELS:2 * NUM_LABELS]
    return teacher_logits, student_logits


# ----------------------------------- main --------------------------------------
if __name__ == "__main__":
    key = jax.random.PRNGKey(0)
    k_param, k_ids = jax.random.split(key)

    params = init_params(k_param)
    fused_params = prepare_fused_params(params)

    B, S = 2, 8
    input_ids = jax.random.randint(k_ids, (B, S), 0, VOCAB, dtype=jnp.int32)
    attention_mask = jnp.array([[1, 1, 1, 1, 1, 1, 1, 1],
                                [1, 1, 1, 1, 1, 1, 0, 0]], dtype=jnp.int32)

    teacher_layer = NUM_LAYERS + 1   # uses hidden_states[-1] (last hidden state)
    student_layer = 2                # uses hidden_states[1]

    t_logits, s_logits = bert_for_sequence_classification(
        fused_params, input_ids, attention_mask, teacher_layer, student_layer)

    jax.block_until_ready((t_logits, s_logits))
    assert t_logits.shape == (B, NUM_LABELS) and s_logits.shape == (B, NUM_LABELS)
    assert bool(jnp.all(jnp.isfinite(t_logits))) and bool(jnp.all(jnp.isfinite(s_logits)))
    print("KERNEL_OK")
</pallas_src>

<mosaic_0001>
module attributes {stable_mosaic.version = 11 : i64} {
  func.func @fused_bert_kernel(%arg0: memref<16x1xi32, #tpu.memory_space<vmem>>, %arg1: memref<1x16xf32, #tpu.memory_space<vmem>>, %arg2: memref<168x128xf32, #tpu.memory_space<vmem>>, %arg3: memref<3x8x384xf32, #tpu.memory_space<vmem>>, %arg4: memref<3x128x768xbf16, #tpu.memory_space<vmem>>, %arg5: memref<3x256x128xbf16, #tpu.memory_space<vmem>>, %arg6: memref<128x128xbf16, #tpu.memory_space<vmem>>, %arg7: memref<8x128xf32, #tpu.memory_space<vmem>>) attributes {dimension_semantics = [], scalar_prefetch = 0 : i64, scratch_operands = 0 : i64, tpu.core_type = #tpu.core_type<tc>} {
    %c0 = arith.constant 0 : index
    %c0_0 = arith.constant 0 : index
    %0 = vector.load %arg0[%c0, %c0_0] : memref<16x1xi32, #tpu.memory_space<vmem>>, vector<16x1xi32>
    %1 = tpu.iota {dimensions = array<i32: 1>} : vector<16x128xi32>
    %2 = vector.broadcast %0 : vector<16x1xi32> to vector<16x128xi32>
    %3 = arith.cmpi eq, %1, %2 : vector<16x128xi32>
    %4 = arith.extui %3 : vector<16x128xi1> to vector<16x128xi32>
    %5 = arith.sitofp %4 : vector<16x128xi32> to vector<16x128xf32>
    %c8 = arith.constant 8 : index
    %c0_1 = arith.constant 0 : index
    %6 = vector.load %arg2[%c8, %c0_1] : memref<168x128xf32, #tpu.memory_space<vmem>>, vector<128x128xf32>
    %cst = arith.constant dense<0.000000e+00> : vector<16x128xf32>
    %7 = tpu.matmul %5, %6, %cst {dimension_numbers = #tpu.dot_dimension_numbers<[1], [0], [0], [1], [0, 0, 1, 1], [], []>} : vector<16x128xf32>, vector<128x128xf32>, vector<16x128xf32> -> vector<16x128xf32>
    %c136 = arith.constant 136 : index
    %c0_2 = arith.constant 0 : index
    %8 = vector.load %arg2[%c136, %c0_2] : memref<168x128xf32, #tpu.memory_space<vmem>>, vector<8x128xf32>
    %9 = tpu.concatenate %8, %8 in 0 : vector<8x128xf32>, vector<8x128xf32> -> vector<16x128xf32>
    %10 = arith.addf %7, %9 : vector<16x128xf32>
    %c0_3 = arith.constant 0 : index
    %c0_4 = arith.constant 0 : index
    %11 = vector.load %arg2[%c0_3, %c0_4] : memref<168x128xf32, #tpu.memory_space<vmem>>, vector<1x128xf32>
    %c1 = arith.constant 1 : index
    %c0_5 = arith.constant 0 : index
    %12 = vector.load %arg2[%c1, %c0_5] : memref<168x128xf32, #tpu.memory_space<vmem>>, vector<1x128xf32>
    %cst_6 = arith.constant dense<0.000000e+00> : vector<16xf32>
    %13 = vector.multi_reduction <add>, %10, %cst_6 [1] : vector<16x128xf32> to vector<16xf32>
    %14 = vector.shape_cast %13 : vector<16xf32> to vector<16x1xf32>
    %cst_7 = arith.constant 1.280000e+02 : f32
    %15 = vector.broadcast %cst_7 : f32 to vector<16x1xf32>
    %16 = arith.divf %14, %15 : vector<16x1xf32>
    %17 = vector.broadcast %16 : vector<16x1xf32> to vector<16x128xf32>
    %18 = arith.subf %10, %17 : vector<16x128xf32>
    %19 = arith.mulf %18, %18 : vector<16x128xf32>
    %cst_8 = arith.constant dense<0.000000e+00> : vector<16xf32>
    %20 = vector.multi_reduction <add>, %19, %cst_8 [1] : vector<16x128xf32> to vector<16xf32>
    %21 = vector.shape_cast %20 : vector<16xf32> to vector<16x1xf32>
    %cst_9 = arith.constant 1.280000e+02 : f32
    %22 = vector.broadcast %cst_9 : f32 to vector<16x1xf32>
    %23 = arith.divf %21, %22 : vector<16x1xf32>
    %24 = vector.broadcast %16 : vector<16x1xf32> to vector<16x128xf32>
    %25 = arith.subf %10, %24 : vector<16x128xf32>
    %cst_10 = arith.constant 9.99999996E-13 : f32
    %26 = vector.broadcast %cst_10 : f32 to vector<16x1xf32>
    %27 = arith.addf %23, %26 : vector<16x1xf32>
    %28 = math.rsqrt %27 : vector<16x1xf32>
    %29 = vector.broadcast %28 : vector<16x1xf32> to vector<16x128xf32>
    %30 = arith.mulf %25, %29 : vector<16x128xf32>
    %31 = vector.broadcast %11 : vector<1x128xf32> to vector<16x128xf32>
    %32 = arith.mulf %30, %31 : vector<16x128xf32>
    %33 = vector.broadcast %12 : vector<1x128xf32> to vector<16x128xf32>
    %34 = arith.addf %32, %33 : vector<16x128xf32>
    %c0_11 = arith.constant 0 : index
    %c0_12 = arith.constant 0 : index
    %35 = vector.load %arg1[%c0_11, %c0_12] : memref<1x16xf32, #tpu.memory_space<vmem>>, vector<1x16xf32>
    %36 = tpu.iota {dimensions = array<i32: 0>} : vector<16x16xi32>
    %37 = tpu.iota {dimensions = array<i32: 1>} : vector<16x16xi32>
    %c0_i32 = arith.constant 0 : i32
    %38 = vector.broadcast %c0_i32 : i32 to vector<16x16xi32>
    %39 = arith.cmpi slt, %36, %38 : vector<16x16xi32>
    %c0_i32_13 = arith.constant 0 : i32
    %40 = vector.broadcast %c0_i32_13 : i32 to vector<16x16xi32>
    %41 = arith.cmpi sge, %36, %40 : vector<16x16xi32>
    %c8_i32 = arith.constant 8 : i32
    %42 = vector.broadcast %c8_i32 : i32 to vector<16x16xi32>
    %43 = arith.cmpi slt, %36, %42 : vector<16x16xi32>
    %44 = arith.andi %41, %43 : vector<16x16xi1>
    %c0_i32_14 = arith.constant 0 : i32
    %45 = vector.broadcast %c0_i32_14 : i32 to vector<16x16xi32>
    %46 = arith.cmpi sge, %37, %45 : vector<16x16xi32>
    %47 = arith.andi %44, %46 : vector<16x16xi1>
    %c8_i32_15 = arith.constant 8 : i32
    %48 = vector.broadcast %c8_i32_15 : i32 to vector<16x16xi32>
    %49 = arith.cmpi slt, %37, %48 : vector<16x16xi32>
    %50 = arith.andi %47, %49 : vector<16x16xi1>
    %51 = arith.ori %39, %50 : vector<16x16xi1>
    %c8_i32_16 = arith.constant 8 : i32
    %52 = vector.broadcast %c8_i32_16 : i32 to vector<16x16xi32>
    %53 = arith.cmpi sge, %36, %52 : vector<16x16xi32>
    %c16_i32 = arith.constant 16 : i32
    %54 = vector.broadcast %c16_i32 : i32 to vector<16x16xi32>
    %55 = arith.cmpi slt, %36, %54 : vector<16x16xi32>
    %56 = arith.andi %53, %55 : vector<16x16xi1>
    %c8_i32_17 = arith.constant 8 : i32
    %57 = vector.broadcast %c8_i32_17 : i32 to vector<16x16xi32>
    %58 = arith.cmpi sge, %37, %57 : vector<16x16xi32>
    %59 = arith.andi %56, %58 : vector<16x16xi1>
    %c16_i32_18 = arith.constant 16 : i32
    %60 = vector.broadcast %c16_i32_18 : i32 to vector<16x16xi32>
    %61 = arith.cmpi slt, %37, %60 : vector<16x16xi32>
    %62 = arith.andi %59, %61 : vector<16x16xi1>
    %63 = arith.ori %51, %62 : vector<16x16xi1>
    %64 = vector.shape_cast %35 : vector<1x16xf32> to vector<1x16xf32>
    %65 = vector.broadcast %64 : vector<1x16xf32> to vector<16x16xf32>
    %cst_19 = arith.constant 5.000000e-01 : f32
    %66 = vector.broadcast %cst_19 : f32 to vector<16x16xf32>
    %67 = arith.cmpf ogt, %65, %66 : vector<16x16xf32>
    %68 = arith.andi %63, %67 : vector<16x16xi1>
    %cst_20 = arith.constant 0.000000e+00 : f32
    %cst_21 = arith.constant -1.000000e+09 : f32
    %69 = vector.broadcast %cst_20 : f32 to vector<16x16xf32>
    %70 = vector.broadcast %cst_21 : f32 to vector<16x16xf32>
    %71 = arith.select %68, %69, %70 : vector<16x16xi1>, vector<16x16xf32>
    %c0_22 = arith.constant 0 : index
    %c0_23 = arith.constant 0 : index
    %c0_24 = arith.constant 0 : index
    %72 = vector.load %arg4[%c0_22, %c0_23, %c0_24] : memref<3x128x768xbf16, #tpu.memory_space<vmem>>, vector<1x128x768xbf16>
    %73 = vector.shape_cast %72 : vector<1x128x768xbf16> to vector<128x768xbf16>
    %c0_25 = arith.constant 0 : index
    %c0_26 = arith.constant 0 : index
    %c0_27 = arith.constant 0 : index
    %74 = vector.load %arg3[%c0_25, %c0_26, %c0_27] : memref<3x8x384xf32, #tpu.memory_space<vmem>>, vector<1x8x384xf32>
    %75 = vector.shape_cast %74 : vector<1x8x384xf32> to vector<8x384xf32>
    %76 = vector.extract_strided_slice %75 {offsets = [0, 0], sizes = [1, 384], strides = [1, 1]} : vector<8x384xf32> to vector<1x384xf32>
    %77 = vector.extract_strided_slice %75 {offsets = [1, 0], sizes = [1, 128], strides = [1, 1]} : vector<8x384xf32> to vector<1x128xf32>
    %78 = vector.extract_strided_slice %75 {offsets = [2, 0], sizes = [1, 128], strides = [1, 1]} : vector<8x384xf32> to vector<1x128xf32>
    %79 = vector.extract_strided_slice %75 {offsets = [3, 0], sizes = [1, 128], strides = [1, 1]} : vector<8x384xf32> to vector<1x128xf32>
    %80 = vector.extract_strided_slice %75 {offsets = [4, 0], sizes = [1, 256], strides = [1, 1]} : vector<8x384xf32> to vector<1x256xf32>
    %81 = vector.extract_strided_slice %75 {offsets = [5, 0], sizes = [1, 128], strides = [1, 1]} : vector<8x384xf32> to vector<1x128xf32>
    %82 = vector.extract_strided_slice %75 {offsets = [6, 0], sizes = [1, 128], strides = [1, 1]} : vector<8x384xf32> to vector<1x128xf32>
    %83 = vector.extract_strided_slice %75 {offsets = [7, 0], sizes = [1, 128], strides = [1, 1]} : vector<8x384xf32> to vector<1x128xf32>
    %84 = arith.truncf %34 : vector<16x128xf32> to vector<16x128xbf16>
    %85 = vector.extract_strided_slice %73 {offsets = [0, 0], sizes = [128, 384], strides = [1, 1]} : vector<128x768xbf16> to vector<128x384xbf16>
    %cst_28 = arith.constant dense<0.000000e+00> : vector<16x384xf32>
    %86 = tpu.matmul %84, %85, %cst_28 {dimension_numbers = #tpu.dot_dimension_numbers<[1], [0], [0], [1], [0, 0, 1, 1], [], []>} : vector<16x128xbf16>, vector<128x384xbf16>, vector<16x384xf32> -> vector<16x384xf32>
    %87 = vector.broadcast %76 : vector<1x384xf32> to vector<16x384xf32>
    %88 = arith.addf %86, %87 : vector<16x384xf32>
    %89 = vector.extract_strided_slice %88 {offsets = [0, 0], sizes = [16, 64], strides = [1, 1]} : vector<16x384xf32> to vector<16x64xf32>
    %90 = arith.truncf %89 : vector<16x64xf32> to vector<16x64xbf16>
    %91 = vector.extract_strided_slice %88 {offsets = [0, 128], sizes = [16, 64], strides = [1, 1]} : vector<16x384xf32> to vector<16x64xf32>
    %92 = arith.truncf %91 : vector<16x64xf32> to vector<16x64xbf16>
    %93 = vector.extract_strided_slice %88 {offsets = [0, 256], sizes = [16, 64], strides = [1, 1]} : vector<16x384xf32> to vector<16x64xf32>
    %94 = arith.truncf %93 : vector<16x64xf32> to vector<16x64xbf16>
    %cst_29 = arith.constant dense<0.000000e+00> : vector<16x16xf32>
    %95 = tpu.matmul %90, %92, %cst_29 {dimension_numbers = #tpu.dot_dimension_numbers<[1], [1], [0], [0], [0, 0, 1, 0], [], []>} : vector<16x64xbf16>, vector<16x64xbf16>, vector<16x16xf32> -> vector<16x16xf32>
    %96 = arith.addf %95, %71 : vector<16x16xf32>
    %cst_30 = arith.constant dense<0xFF800000> : vector<16xf32>
    %97 = vector.multi_reduction <maximumf>, %96, %cst_30 [1] : vector<16x16xf32> to vector<16xf32>
    %98 = vector.shape_cast %97 : vector<16xf32> to vector<16x1xf32>
    %99 = vector.broadcast %98 : vector<16x1xf32> to vector<16x16xf32>
    %100 = arith.subf %96, %99 : vector<16x16xf32>
    %101 = math.exp %100 : vector<16x16xf32>
    %cst_31 = arith.constant dense<0.000000e+00> : vector<16xf32>
    %102 = vector.multi_reduction <add>, %101, %cst_31 [1] : vector<16x16xf32> to vector<16xf32>
    %103 = vector.shape_cast %102 : vector<16xf32> to vector<16x1xf32>
    %104 = tpu.reciprocal %103 {approx = true} : vector<16x1xf32> -> vector<16x1xf32>
    %105 = vector.broadcast %104 : vector<16x1xf32> to vector<16x16xf32>
    %106 = arith.mulf %101, %105 : vector<16x16xf32>
    %107 = arith.truncf %106 : vector<16x16xf32> to vector<16x16xbf16>
    %cst_32 = arith.constant dense<0.000000e+00> : vector<16x64xf32>
    %108 = tpu.matmul %107, %94, %cst_32 {dimension_numbers = #tpu.dot_dimension_numbers<[1], [0], [0], [1], [0, 0, 1, 1], [], []>} : vector<16x16xbf16>, vector<16x64xbf16>, vector<16x64xf32> -> vector<16x64xf32>
    %109 = vector.extract_strided_slice %88 {offsets = [0, 64], sizes = [16, 64], strides = [1, 1]} : vector<16x384xf32> to vector<16x64xf32>
    %110 = arith.truncf %109 : vector<16x64xf32> to vector<16x64xbf16>
    %111 = vector.extract_strided_slice %88 {offsets = [0, 192], sizes = [16, 64], strides = [1, 1]} : vector<16x384xf32> to vector<16x64xf32>
    %112 = arith.truncf %111 : vector<16x64xf32> to vector<16x64xbf16>
    %113 = vector.extract_strided_slice %88 {offsets = [0, 320], sizes = [16, 64], strides = [1, 1]} : vector<16x384xf32> to vector<16x64xf32>
    %114 = arith.truncf %113 : vector<16x64xf32> to vector<16x64xbf16>
    %cst_33 = arith.constant dense<0.000000e+00> : vector<16x16xf32>
    %115 = tpu.matmul %110, %112, %cst_33 {dimension_numbers = #tpu.dot_dimension_numbers<[1], [1], [0], [0], [0, 0, 1, 0], [], []>} : vector<16x64xbf16>, vector<16x64xbf16>, vector<16x16xf32> -> vector<16x16xf32>
    %116 = arith.addf %115, %71 : vector<16x16xf32>
    %cst_34 = arith.constant dense<0xFF800000> : vector<16xf32>
    %117 = vector.multi_reduction <maximumf>, %116, %cst_34 [1] : vector<16x16xf32> to vector<16xf32>
    %118 = vector.shape_cast %117 : vector<16xf32> to vector<16x1xf32>
    %119 = vector.broadcast %118 : vector<16x1xf32> to vector<16x16xf32>
    %120 = arith.subf %116, %119 : vector<16x16xf32>
    %121 = math.exp %120 : vector<16x16xf32>
    %cst_35 = arith.constant dense<0.000000e+00> : vector<16xf32>
    %122 = vector.multi_reduction <add>, %121, %cst_35 [1] : vector<16x16xf32> to vector<16xf32>
    %123 = vector.shape_cast %122 : vector<16xf32> to vector<16x1xf32>
    %124 = tpu.reciprocal %123 {approx = true} : vector<16x1xf32> -> vector<16x1xf32>
    %125 = vector.broadcast %124 : vector<16x1xf32> to vector<16x16xf32>
    %126 = arith.mulf %121, %125 : vector<16x16xf32>
    %127 = arith.truncf %126 : vector<16x16xf32> to vector<16x16xbf16>
    %cst_36 = arith.constant dense<0.000000e+00> : vector<16x64xf32>
    %128 = tpu.matmul %127, %114, %cst_36 {dimension_numbers = #tpu.dot_dimension_numbers<[1], [0], [0], [1], [0, 0, 1, 1], [], []>} : vector<16x16xbf16>, vector<16x64xbf16>, vector<16x64xf32> -> vector<16x64xf32>
    %129 = tpu.concatenate %108, %128 in 1 : vector<16x64xf32>, vector<16x64xf32> -> vector<16x128xf32>
    %130 = arith.truncf %129 : vector<16x128xf32> to vector<16x128xbf16>
    %131 = vector.extract_strided_slice %73 {offsets = [0, 384], sizes = [128, 128], strides = [1, 1]} : vector<128x768xbf16> to vector<128x128xbf16>
    %cst_37 = arith.constant dense<0.000000e+00> : vector<16x128xf32>
    %132 = tpu.matmul %130, %131, %cst_37 {dimension_numbers = #tpu.dot_dimension_numbers<[1], [0], [0], [1], [0, 0, 1, 1], [], []>} : vector<16x128xbf16>, vector<128x128xbf16>, vector<16x128xf32> -> vector<16x128xf32>
    %133 = vector.broadcast %77 : vector<1x128xf32> to vector<16x128xf32>
    %134 = arith.addf %132, %133 : vector<16x128xf32>
    %135 = arith.addf %34, %134 : vector<16x128xf32>
    %cst_38 = arith.constant dense<0.000000e+00> : vector<16xf32>
    %136 = vector.multi_reduction <add>, %135, %cst_38 [1] : vector<16x128xf32> to vector<16xf32>
    %137 = vector.shape_cast %136 : vector<16xf32> to vector<16x1xf32>
    %cst_39 = arith.constant 1.280000e+02 : f32
    %138 = vector.broadcast %cst_39 : f32 to vector<16x1xf32>
    %139 = arith.divf %137, %138 : vector<16x1xf32>
    %140 = vector.broadcast %139 : vector<16x1xf32> to vector<16x128xf32>
    %141 = arith.subf %135, %140 : vector<16x128xf32>
    %142 = arith.mulf %141, %141 : vector<16x128xf32>
    %cst_40 = arith.constant dense<0.000000e+00> : vector<16xf32>
    %143 = vector.multi_reduction <add>, %142, %cst_40 [1] : vector<16x128xf32> to vector<16xf32>
    %144 = vector.shape_cast %143 : vector<16xf32> to vector<16x1xf32>
    %cst_41 = arith.constant 1.280000e+02 : f32
    %145 = vector.broadcast %cst_41 : f32 to vector<16x1xf32>
    %146 = arith.divf %144, %145 : vector<16x1xf32>
    %147 = vector.broadcast %139 : vector<16x1xf32> to vector<16x128xf32>
    %148 = arith.subf %135, %147 : vector<16x128xf32>
    %cst_42 = arith.constant 9.99999996E-13 : f32
    %149 = vector.broadcast %cst_42 : f32 to vector<16x1xf32>
    %150 = arith.addf %146, %149 : vector<16x1xf32>
    %151 = math.rsqrt %150 : vector<16x1xf32>
    %152 = vector.broadcast %151 : vector<16x1xf32> to vector<16x128xf32>
    %153 = arith.mulf %148, %152 : vector<16x128xf32>
    %154 = vector.broadcast %78 : vector<1x128xf32> to vector<16x128xf32>
    %155 = arith.mulf %153, %154 : vector<16x128xf32>
    %156 = vector.broadcast %79 : vector<1x128xf32> to vector<16x128xf32>
    %157 = arith.addf %155, %156 : vector<16x128xf32>
    %158 = arith.truncf %157 : vector<16x128xf32> to vector<16x128xbf16>
    %159 = vector.extract_strided_slice %73 {offsets = [0, 512], sizes = [128, 256], strides = [1, 1]} : vector<128x768xbf16> to vector<128x256xbf16>
    %cst_43 = arith.constant dense<0.000000e+00> : vector<16x256xf32>
    %160 = tpu.matmul %158, %159, %cst_43 {dimension_numbers = #tpu.dot_dimension_numbers<[1], [0], [0], [1], [0, 0, 1, 1], [], []>} : vector<16x128xbf16>, vector<128x256xbf16>, vector<16x256xf32> -> vector<16x256xf32>
    %161 = vector.broadcast %80 : vector<1x256xf32> to vector<16x256xf32>
    %162 = arith.addf %160, %161 : vector<16x256xf32>
    %163 = arith.mulf %162, %162 : vector<16x256xf32>
    %164 = arith.mulf %162, %163 : vector<16x256xf32>
    %cst_44 = arith.constant 4.471500e-02 : f32
    %165 = vector.broadcast %cst_44 : f32 to vector<16x256xf32>
    %166 = arith.mulf %165, %164 : vector<16x256xf32>
    %167 = arith.addf %162, %166 : vector<16x256xf32>
    %cst_45 = arith.constant 0.797884583 : f32
    %168 = vector.broadcast %cst_45 : f32 to vector<16x256xf32>
    %169 = arith.mulf %168, %167 : vector<16x256xf32>
    %170 = math.tanh %169 : vector<16x256xf32>
    %cst_46 = arith.constant 1.000000e+00 : f32
    %171 = vector.broadcast %cst_46 : f32 to vector<16x256xf32>
    %172 = arith.addf %171, %170 : vector<16x256xf32>
    %cst_47 = arith.constant 5.000000e-01 : f32
    %173 = vector.broadcast %cst_47 : f32 to vector<16x256xf32>
    %174 = arith.mulf %173, %172 : vector<16x256xf32>
    %175 = arith.mulf %162, %174 : vector<16x256xf32>
    %176 = arith.truncf %175 : vector<16x256xf32> to vector<16x256xbf16>
    %c0_48 = arith.constant 0 : index
    %c0_49 = arith.constant 0 : index
    %c0_50 = arith.constant 0 : index
    %177 = vector.load %arg5[%c0_48, %c0_49, %c0_50] : memref<3x256x128xbf16, #tpu.memory_space<vmem>>, vector<1x256x128xbf16>
    %178 = vector.shape_cast %177 : vector<1x256x128xbf16> to vector<256x128xbf16>
    %cst_51 = arith.constant dense<0.000000e+00> : vector<16x128xf32>
    %179 = tpu.matmul %176, %178, %cst_51 {dimension_numbers = #tpu.dot_dimension_numbers<[1], [0], [0], [1], [0, 0, 1, 1], [], []>} : vector<16x256xbf16>, vector<256x128xbf16>, vector<16x128xf32> -> vector<16x128xf32>
    %180 = vector.broadcast %81 : vector<1x128xf32> to vector<16x128xf32>
    %181 = arith.addf %179, %180 : vector<16x128xf32>
    %182 = arith.addf %157, %181 : vector<16x128xf32>
    %cst_52 = arith.constant dense<0.000000e+00> : vector<16xf32>
    %183 = vector.multi_reduction <add>, %182, %cst_52 [1] : vector<16x128xf32> to vector<16xf32>
    %184 = vector.shape_cast %183 : vector<16xf32> to vector<16x1xf32>
    %cst_53 = arith.constant 1.280000e+02 : f32
    %185 = vector.broadcast %cst_53 : f32 to vector<16x1xf32>
    %186 = arith.divf %184, %185 : vector<16x1xf32>
    %187 = vector.broadcast %186 : vector<16x1xf32> to vector<16x128xf32>
    %188 = arith.subf %182, %187 : vector<16x128xf32>
    %189 = arith.mulf %188, %188 : vector<16x128xf32>
    %cst_54 = arith.constant dense<0.000000e+00> : vector<16xf32>
    %190 = vector.multi_reduction <add>, %189, %cst_54 [1] : vector<16x128xf32> to vector<16xf32>
    %191 = vector.shape_cast %190 : vector<16xf32> to vector<16x1xf32>
    %cst_55 = arith.constant 1.280000e+02 : f32
    %192 = vector.broadcast %cst_55 : f32 to vector<16x1xf32>
    %193 = arith.divf %191, %192 : vector<16x1xf32>
    %194 = vector.broadcast %186 : vector<16x1xf32> to vector<16x128xf32>
    %195 = arith.subf %182, %194 : vector<16x128xf32>
    %cst_56 = arith.constant 9.99999996E-13 : f32
    %196 = vector.broadcast %cst_56 : f32 to vector<16x1xf32>
    %197 = arith.addf %193, %196 : vector<16x1xf32>
    %198 = math.rsqrt %197 : vector<16x1xf32>
    %199 = vector.broadcast %198 : vector<16x1xf32> to vector<16x128xf32>
    %200 = arith.mulf %195, %199 : vector<16x128xf32>
    %201 = vector.broadcast %82 : vector<1x128xf32> to vector<16x128xf32>
    %202 = arith.mulf %200, %201 : vector<16x128xf32>
    %203 = vector.broadcast %83 : vector<1x128xf32> to vector<16x128xf32>
    %204 = arith.addf %202, %203 : vector<16x128xf32>
    %c1_57 = arith.constant 1 : index
    %c0_58 = arith.constant 0 : index
    %c0_59 = arith.constant 0 : index
    %205 = vector.load %arg4[%c1_57, %c0_58, %c0_59] : memref<3x128x768xbf16, #tpu.memory_space<vmem>>, vector<1x128x768xbf16>
    %206 = vector.shape_cast %205 : vector<1x128x768xbf16> to vector<128x768xbf16>
    %c1_60 = arith.constant 1 : index
    %c0_61 = arith.constant 0 : index
    %c0_62 = arith.constant 0 : index
    %207 = vector.load %arg3[%c1_60, %c0_61, %c0_62] : memref<3x8x384xf32, #tpu.memory_space<vmem>>, vector<1x8x384xf32>
    %208 = vector.shape_cast %207 : vector<1x8x384xf32> to vector<8x384xf32>
    %209 = vector.extract_strided_slice %208 {offsets = [0, 0], sizes = [1, 384], strides = [1, 1]} : vector<8x384xf32> to vector<1x384xf32>
    %210 = vector.extract_strided_slice %208 {offsets = [1, 0], sizes = [1, 128], strides = [1, 1]} : vector<8x384xf32> to vector<1x128xf32>
    %211 = vector.extract_strided_slice %208 {offsets = [2, 0], sizes = [1, 128], strides = [1, 1]} : vector<8x384xf32> to vector<1x128xf32>
    %212 = vector.extract_strided_slice %208 {offsets = [3, 0], sizes = [1, 128], strides = [1, 1]} : vector<8x384xf32> to vector<1x128xf32>
    %213 = vector.extract_strided_slice %208 {offsets = [4, 0], sizes = [1, 256], strides = [1, 1]} : vector<8x384xf32> to vector<1x256xf32>
    %214 = vector.extract_strided_slice %208 {offsets = [5, 0], sizes = [1, 128], strides = [1, 1]} : vector<8x384xf32> to vector<1x128xf32>
    %215 = vector.extract_strided_slice %208 {offsets = [6, 0], sizes = [1, 128], strides = [1, 1]} : vector<8x384xf32> to vector<1x128xf32>
    %216 = vector.extract_strided_slice %208 {offsets = [7, 0], sizes = [1, 128], strides = [1, 1]} : vector<8x384xf32> to vector<1x128xf32>
    %217 = arith.truncf %204 : vector<16x128xf32> to vector<16x128xbf16>
    %218 = vector.extract_strided_slice %206 {offsets = [0, 0], sizes = [128, 384], strides = [1, 1]} : vector<128x768xbf16> to vector<128x384xbf16>
    %cst_63 = arith.constant dense<0.000000e+00> : vector<16x384xf32>
    %219 = tpu.matmul %217, %218, %cst_63 {dimension_numbers = #tpu.dot_dimension_numbers<[1], [0], [0], [1], [0, 0, 1, 1], [], []>} : vector<16x128xbf16>, vector<128x384xbf16>, vector<16x384xf32> -> vector<16x384xf32>
    %220 = vector.broadcast %209 : vector<1x384xf32> to vector<16x384xf32>
    %221 = arith.addf %219, %220 : vector<16x384xf32>
    %222 = vector.extract_strided_slice %221 {offsets = [0, 0], sizes = [16, 64], strides = [1, 1]} : vector<16x384xf32> to vector<16x64xf32>
    %223 = arith.truncf %222 : vector<16x64xf32> to vector<16x64xbf16>
    %224 = vector.extract_strided_slice %221 {offsets = [0, 128], sizes = [16, 64], strides = [1, 1]} : vector<16x384xf32> to vector<16x64xf32>
    %225 = arith.truncf %224 : vector<16x64xf32> to vector<16x64xbf16>
    %226 = vector.extract_strided_slice %221 {offsets = [0, 256], sizes = [16, 64], strides = [1, 1]} : vector<16x384xf32> to vector<16x64xf32>
    %227 = arith.truncf %226 : vector<16x64xf32> to vector<16x64xbf16>
    %cst_64 = arith.constant dense<0.000000e+00> : vector<16x16xf32>
    %228 = tpu.matmul %223, %225, %cst_64 {dimension_numbers = #tpu.dot_dimension_numbers<[1], [1], [0], [0], [0, 0, 1, 0], [], []>} : vector<16x64xbf16>, vector<16x64xbf16>, vector<16x16xf32> -> vector<16x16xf32>
    %229 = arith.addf %228, %71 : vector<16x16xf32>
    %cst_65 = arith.constant dense<0xFF800000> : vector<16xf32>
    %230 = vector.multi_reduction <maximumf>, %229, %cst_65 [1] : vector<16x16xf32> to vector<16xf32>
    %231 = vector.shape_cast %230 : vector<16xf32> to vector<16x1xf32>
    %232 = vector.broadcast %231 : vector<16x1xf32> to vector<16x16xf32>
    %233 = arith.subf %229, %232 : vector<16x16xf32>
    %234 = math.exp %233 : vector<16x16xf32>
    %cst_66 = arith.constant dense<0.000000e+00> : vector<16xf32>
    %235 = vector.multi_reduction <add>, %234, %cst_66 [1] : vector<16x16xf32> to vector<16xf32>
    %236 = vector.shape_cast %235 : vector<16xf32> to vector<16x1xf32>
    %237 = tpu.reciprocal %236 {approx = true} : vector<16x1xf32> -> vector<16x1xf32>
    %238 = vector.broadcast %237 : vector<16x1xf32> to vector<16x16xf32>
    %239 = arith.mulf %234, %238 : vector<16x16xf32>
    %240 = arith.truncf %239 : vector<16x16xf32> to vector<16x16xbf16>
    %cst_67 = arith.constant dense<0.000000e+00> : vector<16x64xf32>
    %241 = tpu.matmul %240, %227, %cst_67 {dimension_numbers = #tpu.dot_dimension_numbers<[1], [0], [0], [1], [0, 0, 1, 1], [], []>} : vector<16x16xbf16>, vector<16x64xbf16>, vector<16x64xf32> -> vector<16x64xf32>
    %242 = vector.extract_strided_slice %221 {offsets = [0, 64], sizes = [16, 64], strides = [1, 1]} : vector<16x384xf32> to vector<16x64xf32>
    %243 = arith.truncf %242 : vector<16x64xf32> to vector<16x64xbf16>
    %244 = vector.extract_strided_slice %221 {offsets = [0, 192], sizes = [16, 64], strides = [1, 1]} : vector<16x384xf32> to vector<16x64xf32>
    %245 = arith.truncf %244 : vector<16x64xf32> to vector<16x64xbf16>
    %246 = vector.extract_strided_slice %221 {offsets = [0, 320], sizes = [16, 64], strides = [1, 1]} : vector<16x384xf32> to vector<16x64xf32>
    %247 = arith.truncf %246 : vector<16x64xf32> to vector<16x64xbf16>
    %cst_68 = arith.constant dense<0.000000e+00> : vector<16x16xf32>
    %248 = tpu.matmul %243, %245, %cst_68 {dimension_numbers = #tpu.dot_dimension_numbers<[1], [1], [0], [0], [0, 0, 1, 0], [], []>} : vector<16x64xbf16>, vector<16x64xbf16>, vector<16x16xf32> -> vector<16x16xf32>
    %249 = arith.addf %248, %71 : vector<16x16xf32>
    %cst_69 = arith.constant dense<0xFF800000> : vector<16xf32>
    %250 = vector.multi_reduction <maximumf>, %249, %cst_69 [1] : vector<16x16xf32> to vector<16xf32>
    %251 = vector.shape_cast %250 : vector<16xf32> to vector<16x1xf32>
    %252 = vector.broadcast %251 : vector<16x1xf32> to vector<16x16xf32>
    %253 = arith.subf %249, %252 : vector<16x16xf32>
    %254 = math.exp %253 : vector<16x16xf32>
    %cst_70 = arith.constant dense<0.000000e+00> : vector<16xf32>
    %255 = vector.multi_reduction <add>, %254, %cst_70 [1] : vector<16x16xf32> to vector<16xf32>
    %256 = vector.shape_cast %255 : vector<16xf32> to vector<16x1xf32>
    %257 = tpu.reciprocal %256 {approx = true} : vector<16x1xf32> -> vector<16x1xf32>
    %258 = vector.broadcast %257 : vector<16x1xf32> to vector<16x16xf32>
    %259 = arith.mulf %254, %258 : vector<16x16xf32>
    %260 = arith.truncf %259 : vector<16x16xf32> to vector<16x16xbf16>
    %cst_71 = arith.constant dense<0.000000e+00> : vector<16x64xf32>
    %261 = tpu.matmul %260, %247, %cst_71 {dimension_numbers = #tpu.dot_dimension_numbers<[1], [0], [0], [1], [0, 0, 1, 1], [], []>} : vector<16x16xbf16>, vector<16x64xbf16>, vector<16x64xf32> -> vector<16x64xf32>
    %262 = tpu.concatenate %241, %261 in 1 : vector<16x64xf32>, vector<16x64xf32> -> vector<16x128xf32>
    %263 = arith.truncf %262 : vector<16x128xf32> to vector<16x128xbf16>
    %264 = vector.extract_strided_slice %206 {offsets = [0, 384], sizes = [128, 128], strides = [1, 1]} : vector<128x768xbf16> to vector<128x128xbf16>
    %cst_72 = arith.constant dense<0.000000e+00> : vector<16x128xf32>
    %265 = tpu.matmul %263, %264, %cst_72 {dimension_numbers = #tpu.dot_dimension_numbers<[1], [0], [0], [1], [0, 0, 1, 1], [], []>} : vector<16x128xbf16>, vector<128x128xbf16>, vector<16x128xf32> -> vector<16x128xf32>
    %266 = vector.broadcast %210 : vector<1x128xf32> to vector<16x128xf32>
    %267 = arith.addf %265, %266 : vector<16x128xf32>
    %268 = arith.addf %204, %267 : vector<16x128xf32>
    %cst_73 = arith.constant dense<0.000000e+00> : vector<16xf32>
    %269 = vector.multi_reduction <add>, %268, %cst_73 [1] : vector<16x128xf32> to vector<16xf32>
    %270 = vector.shape_cast %269 : vector<16xf32> to vector<16x1xf32>
    %cst_74 = arith.constant 1.280000e+02 : f32
    %271 = vector.broadcast %cst_74 : f32 to vector<16x1xf32>
    %272 = arith.divf %270, %271 : vector<16x1xf32>
    %273 = vector.broadcast %272 : vector<16x1xf32> to vector<16x128xf32>
    %274 = arith.subf %268, %273 : vector<16x128xf32>
    %275 = arith.mulf %274, %274 : vector<16x128xf32>
    %cst_75 = arith.constant dense<0.000000e+00> : vector<16xf32>
    %276 = vector.multi_reduction <add>, %275, %cst_75 [1] : vector<16x128xf32> to vector<16xf32>
    %277 = vector.shape_cast %276 : vector<16xf32> to vector<16x1xf32>
    %cst_76 = arith.constant 1.280000e+02 : f32
    %278 = vector.broadcast %cst_76 : f32 to vector<16x1xf32>
    %279 = arith.divf %277, %278 : vector<16x1xf32>
    %280 = vector.broadcast %272 : vector<16x1xf32> to vector<16x128xf32>
    %281 = arith.subf %268, %280 : vector<16x128xf32>
    %cst_77 = arith.constant 9.99999996E-13 : f32
    %282 = vector.broadcast %cst_77 : f32 to vector<16x1xf32>
    %283 = arith.addf %279, %282 : vector<16x1xf32>
    %284 = math.rsqrt %283 : vector<16x1xf32>
    %285 = vector.broadcast %284 : vector<16x1xf32> to vector<16x128xf32>
    %286 = arith.mulf %281, %285 : vector<16x128xf32>
    %287 = vector.broadcast %211 : vector<1x128xf32> to vector<16x128xf32>
    %288 = arith.mulf %286, %287 : vector<16x128xf32>
    %289 = vector.broadcast %212 : vector<1x128xf32> to vector<16x128xf32>
    %290 = arith.addf %288, %289 : vector<16x128xf32>
    %291 = arith.truncf %290 : vector<16x128xf32> to vector<16x128xbf16>
    %292 = vector.extract_strided_slice %206 {offsets = [0, 512], sizes = [128, 256], strides = [1, 1]} : vector<128x768xbf16> to vector<128x256xbf16>
    %cst_78 = arith.constant dense<0.000000e+00> : vector<16x256xf32>
    %293 = tpu.matmul %291, %292, %cst_78 {dimension_numbers = #tpu.dot_dimension_numbers<[1], [0], [0], [1], [0, 0, 1, 1], [], []>} : vector<16x128xbf16>, vector<128x256xbf16>, vector<16x256xf32> -> vector<16x256xf32>
    %294 = vector.broadcast %213 : vector<1x256xf32> to vector<16x256xf32>
    %295 = arith.addf %293, %294 : vector<16x256xf32>
    %296 = arith.mulf %295, %295 : vector<16x256xf32>
    %297 = arith.mulf %295, %296 : vector<16x256xf32>
    %cst_79 = arith.constant 4.471500e-02 : f32
    %298 = vector.broadcast %cst_79 : f32 to vector<16x256xf32>
    %299 = arith.mulf %298, %297 : vector<16x256xf32>
    %300 = arith.addf %295, %299 : vector<16x256xf32>
    %cst_80 = arith.constant 0.797884583 : f32
    %301 = vector.broadcast %cst_80 : f32 to vector<16x256xf32>
    %302 = arith.mulf %301, %300 : vector<16x256xf32>
    %303 = math.tanh %302 : vector<16x256xf32>
    %cst_81 = arith.constant 1.000000e+00 : f32
    %304 = vector.broadcast %cst_81 : f32 to vector<16x256xf32>
    %305 = arith.addf %304, %303 : vector<16x256xf32>
    %cst_82 = arith.constant 5.000000e-01 : f32
    %306 = vector.broadcast %cst_82 : f32 to vector<16x256xf32>
    %307 = arith.mulf %306, %305 : vector<16x256xf32>
    %308 = arith.mulf %295, %307 : vector<16x256xf32>
    %309 = arith.truncf %308 : vector<16x256xf32> to vector<16x256xbf16>
    %c1_83 = arith.constant 1 : index
    %c0_84 = arith.constant 0 : index
    %c0_85 = arith.constant 0 : index
    %310 = vector.load %arg5[%c1_83, %c0_84, %c0_85] : memref<3x256x128xbf16, #tpu.memory_space<vmem>>, vector<1x256x128xbf16>
    %311 = vector.shape_cast %310 : vector<1x256x128xbf16> to vector<256x128xbf16>
    %cst_86 = arith.constant dense<0.000000e+00> : vector<16x128xf32>
    %312 = tpu.matmul %309, %311, %cst_86 {dimension_numbers = #tpu.dot_dimension_numbers<[1], [0], [0], [1], [0, 0, 1, 1], [], []>} : vector<16x256xbf16>, vector<256x128xbf16>, vector<16x128xf32> -> vector<16x128xf32>
    %313 = vector.broadcast %214 : vector<1x128xf32> to vector<16x128xf32>
    %314 = arith.addf %312, %313 : vector<16x128xf32>
    %315 = arith.addf %290, %314 : vector<16x128xf32>
    %cst_87 = arith.constant dense<0.000000e+00> : vector<16xf32>
    %316 = vector.multi_reduction <add>, %315, %cst_87 [1] : vector<16x128xf32> to vector<16xf32>
    %317 = vector.shape_cast %316 : vector<16xf32> to vector<16x1xf32>
    %cst_88 = arith.constant 1.280000e+02 : f32
    %318 = vector.broadcast %cst_88 : f32 to vector<16x1xf32>
    %319 = arith.divf %317, %318 : vector<16x1xf32>
    %320 = vector.broadcast %319 : vector<16x1xf32> to vector<16x128xf32>
    %321 = arith.subf %315, %320 : vector<16x128xf32>
    %322 = arith.mulf %321, %321 : vector<16x128xf32>
    %cst_89 = arith.constant dense<0.000000e+00> : vector<16xf32>
    %323 = vector.multi_reduction <add>, %322, %cst_89 [1] : vector<16x128xf32> to vector<16xf32>
    %324 = vector.shape_cast %323 : vector<16xf32> to vector<16x1xf32>
    %cst_90 = arith.constant 1.280000e+02 : f32
    %325 = vector.broadcast %cst_90 : f32 to vector<16x1xf32>
    %326 = arith.divf %324, %325 : vector<16x1xf32>
    %327 = vector.broadcast %319 : vector<16x1xf32> to vector<16x128xf32>
    %328 = arith.subf %315, %327 : vector<16x128xf32>
    %cst_91 = arith.constant 9.99999996E-13 : f32
    %329 = vector.broadcast %cst_91 : f32 to vector<16x1xf32>
    %330 = arith.addf %326, %329 : vector<16x1xf32>
    %331 = math.rsqrt %330 : vector<16x1xf32>
    %332 = vector.broadcast %331 : vector<16x1xf32> to vector<16x128xf32>
    %333 = arith.mulf %328, %332 : vector<16x128xf32>
    %334 = vector.broadcast %215 : vector<1x128xf32> to vector<16x128xf32>
    %335 = arith.mulf %333, %334 : vector<16x128xf32>
    %336 = vector.broadcast %216 : vector<1x128xf32> to vector<16x128xf32>
    %337 = arith.addf %335, %336 : vector<16x128xf32>
    %c2 = arith.constant 2 : index
    %c0_92 = arith.constant 0 : index
    %c0_93 = arith.constant 0 : index
    %338 = vector.load %arg4[%c2, %c0_92, %c0_93] : memref<3x128x768xbf16, #tpu.memory_space<vmem>>, vector<1x128x768xbf16>
    %339 = vector.shape_cast %338 : vector<1x128x768xbf16> to vector<128x768xbf16>
    %c2_94 = arith.constant 2 : index
    %c0_95 = arith.constant 0 : index
    %c0_96 = arith.constant 0 : index
    %340 = vector.load %arg3[%c2_94, %c0_95, %c0_96] : memref<3x8x384xf32, #tpu.memory_space<vmem>>, vector<1x8x384xf32>
    %341 = vector.shape_cast %340 : vector<1x8x384xf32> to vector<8x384xf32>
    %342 = vector.extract_strided_slice %341 {offsets = [0, 0], sizes = [1, 384], strides = [1, 1]} : vector<8x384xf32> to vector<1x384xf32>
    %343 = vector.extract_strided_slice %341 {offsets = [1, 0], sizes = [1, 128], strides = [1, 1]} : vector<8x384xf32> to vector<1x128xf32>
    %344 = vector.extract_strided_slice %341 {offsets = [2, 0], sizes = [1, 128], strides = [1, 1]} : vector<8x384xf32> to vector<1x128xf32>
    %345 = vector.extract_strided_slice %341 {offsets = [3, 0], sizes = [1, 128], strides = [1, 1]} : vector<8x384xf32> to vector<1x128xf32>
    %346 = vector.extract_strided_slice %341 {offsets = [4, 0], sizes = [1, 256], strides = [1, 1]} : vector<8x384xf32> to vector<1x256xf32>
    %347 = vector.extract_strided_slice %341 {offsets = [5, 0], sizes = [1, 128], strides = [1, 1]} : vector<8x384xf32> to vector<1x128xf32>
    %348 = vector.extract_strided_slice %341 {offsets = [6, 0], sizes = [1, 128], strides = [1, 1]} : vector<8x384xf32> to vector<1x128xf32>
    %349 = vector.extract_strided_slice %341 {offsets = [7, 0], sizes = [1, 128], strides = [1, 1]} : vector<8x384xf32> to vector<1x128xf32>
    %350 = arith.truncf %337 : vector<16x128xf32> to vector<16x128xbf16>
    %351 = vector.extract_strided_slice %339 {offsets = [0, 0], sizes = [128, 384], strides = [1, 1]} : vector<128x768xbf16> to vector<128x384xbf16>
    %cst_97 = arith.constant dense<0.000000e+00> : vector<16x384xf32>
    %352 = tpu.matmul %350, %351, %cst_97 {dimension_numbers = #tpu.dot_dimension_numbers<[1], [0], [0], [1], [0, 0, 1, 1], [], []>} : vector<16x128xbf16>, vector<128x384xbf16>, vector<16x384xf32> -> vector<16x384xf32>
    %353 = vector.broadcast %342 : vector<1x384xf32> to vector<16x384xf32>
    %354 = arith.addf %352, %353 : vector<16x384xf32>
    %355 = vector.extract_strided_slice %354 {offsets = [0, 0], sizes = [16, 64], strides = [1, 1]} : vector<16x384xf32> to vector<16x64xf32>
    %356 = arith.truncf %355 : vector<16x64xf32> to vector<16x64xbf16>
    %357 = vector.extract_strided_slice %354 {offsets = [0, 128], sizes = [16, 64], strides = [1, 1]} : vector<16x384xf32> to vector<16x64xf32>
    %358 = arith.truncf %357 : vector<16x64xf32> to vector<16x64xbf16>
    %359 = vector.extract_strided_slice %354 {offsets = [0, 256], sizes = [16, 64], strides = [1, 1]} : vector<16x384xf32> to vector<16x64xf32>
    %360 = arith.truncf %359 : vector<16x64xf32> to vector<16x64xbf16>
    %cst_98 = arith.constant dense<0.000000e+00> : vector<16x16xf32>
    %361 = tpu.matmul %356, %358, %cst_98 {dimension_numbers = #tpu.dot_dimension_numbers<[1], [1], [0], [0], [0, 0, 1, 0], [], []>} : vector<16x64xbf16>, vector<16x64xbf16>, vector<16x16xf32> -> vector<16x16xf32>
    %362 = arith.addf %361, %71 : vector<16x16xf32>
    %cst_99 = arith.constant dense<0xFF800000> : vector<16xf32>
    %363 = vector.multi_reduction <maximumf>, %362, %cst_99 [1] : vector<16x16xf32> to vector<16xf32>
    %364 = vector.shape_cast %363 : vector<16xf32> to vector<16x1xf32>
    %365 = vector.broadcast %364 : vector<16x1xf32> to vector<16x16xf32>
    %366 = arith.subf %362, %365 : vector<16x16xf32>
    %367 = math.exp %366 : vector<16x16xf32>
    %cst_100 = arith.constant dense<0.000000e+00> : vector<16xf32>
    %368 = vector.multi_reduction <add>, %367, %cst_100 [1] : vector<16x16xf32> to vector<16xf32>
    %369 = vector.shape_cast %368 : vector<16xf32> to vector<16x1xf32>
    %370 = tpu.reciprocal %369 {approx = true} : vector<16x1xf32> -> vector<16x1xf32>
    %371 = vector.broadcast %370 : vector<16x1xf32> to vector<16x16xf32>
    %372 = arith.mulf %367, %371 : vector<16x16xf32>
    %373 = arith.truncf %372 : vector<16x16xf32> to vector<16x16xbf16>
    %cst_101 = arith.constant dense<0.000000e+00> : vector<16x64xf32>
    %374 = tpu.matmul %373, %360, %cst_101 {dimension_numbers = #tpu.dot_dimension_numbers<[1], [0], [0], [1], [0, 0, 1, 1], [], []>} : vector<16x16xbf16>, vector<16x64xbf16>, vector<16x64xf32> -> vector<16x64xf32>
    %375 = vector.extract_strided_slice %354 {offsets = [0, 64], sizes = [16, 64], strides = [1, 1]} : vector<16x384xf32> to vector<16x64xf32>
    %376 = arith.truncf %375 : vector<16x64xf32> to vector<16x64xbf16>
    %377 = vector.extract_strided_slice %354 {offsets = [0, 192], sizes = [16, 64], strides = [1, 1]} : vector<16x384xf32> to vector<16x64xf32>
    %378 = arith.truncf %377 : vector<16x64xf32> to vector<16x64xbf16>
    %379 = vector.extract_strided_slice %354 {offsets = [0, 320], sizes = [16, 64], strides = [1, 1]} : vector<16x384xf32> to vector<16x64xf32>
    %380 = arith.truncf %379 : vector<16x64xf32> to vector<16x64xbf16>
    %cst_102 = arith.constant dense<0.000000e+00> : vector<16x16xf32>
    %381 = tpu.matmul %376, %378, %cst_102 {dimension_numbers = #tpu.dot_dimension_numbers<[1], [1], [0], [0], [0, 0, 1, 0], [], []>} : vector<16x64xbf16>, vector<16x64xbf16>, vector<16x16xf32> -> vector<16x16xf32>
    %382 = arith.addf %381, %71 : vector<16x16xf32>
    %cst_103 = arith.constant dense<0xFF800000> : vector<16xf32>
    %383 = vector.multi_reduction <maximumf>, %382, %cst_103 [1] : vector<16x16xf32> to vector<16xf32>
    %384 = vector.shape_cast %383 : vector<16xf32> to vector<16x1xf32>
    %385 = vector.broadcast %384 : vector<16x1xf32> to vector<16x16xf32>
    %386 = arith.subf %382, %385 : vector<16x16xf32>
    %387 = math.exp %386 : vector<16x16xf32>
    %cst_104 = arith.constant dense<0.000000e+00> : vector<16xf32>
    %388 = vector.multi_reduction <add>, %387, %cst_104 [1] : vector<16x16xf32> to vector<16xf32>
    %389 = vector.shape_cast %388 : vector<16xf32> to vector<16x1xf32>
    %390 = tpu.reciprocal %389 {approx = true} : vector<16x1xf32> -> vector<16x1xf32>
    %391 = vector.broadcast %390 : vector<16x1xf32> to vector<16x16xf32>
    %392 = arith.mulf %387, %391 : vector<16x16xf32>
    %393 = arith.truncf %392 : vector<16x16xf32> to vector<16x16xbf16>
    %cst_105 = arith.constant dense<0.000000e+00> : vector<16x64xf32>
    %394 = tpu.matmul %393, %380, %cst_105 {dimension_numbers = #tpu.dot_dimension_numbers<[1], [0], [0], [1], [0, 0, 1, 1], [], []>} : vector<16x16xbf16>, vector<16x64xbf16>, vector<16x64xf32> -> vector<16x64xf32>
    %395 = tpu.concatenate %374, %394 in 1 : vector<16x64xf32>, vector<16x64xf32> -> vector<16x128xf32>
    %396 = arith.truncf %395 : vector<16x128xf32> to vector<16x128xbf16>
    %397 = vector.extract_strided_slice %339 {offsets = [0, 384], sizes = [128, 128], strides = [1, 1]} : vector<128x768xbf16> to vector<128x128xbf16>
    %cst_106 = arith.constant dense<0.000000e+00> : vector<16x128xf32>
    %398 = tpu.matmul %396, %397, %cst_106 {dimension_numbers = #tpu.dot_dimension_numbers<[1], [0], [0], [1], [0, 0, 1, 1], [], []>} : vector<16x128xbf16>, vector<128x128xbf16>, vector<16x128xf32> -> vector<16x128xf32>
    %399 = vector.broadcast %343 : vector<1x128xf32> to vector<16x128xf32>
    %400 = arith.addf %398, %399 : vector<16x128xf32>
    %401 = arith.addf %337, %400 : vector<16x128xf32>
    %cst_107 = arith.constant dense<0.000000e+00> : vector<16xf32>
    %402 = vector.multi_reduction <add>, %401, %cst_107 [1] : vector<16x128xf32> to vector<16xf32>
    %403 = vector.shape_cast %402 : vector<16xf32> to vector<16x1xf32>
    %cst_108 = arith.constant 1.280000e+02 : f32
    %404 = vector.broadcast %cst_108 : f32 to vector<16x1xf32>
    %405 = arith.divf %403, %404 : vector<16x1xf32>
    %406 = vector.broadcast %405 : vector<16x1xf32> to vector<16x128xf32>
    %407 = arith.subf %401, %406 : vector<16x128xf32>
    %408 = arith.mulf %407, %407 : vector<16x128xf32>
    %cst_109 = arith.constant dense<0.000000e+00> : vector<16xf32>
    %409 = vector.multi_reduction <add>, %408, %cst_109 [1] : vector<16x128xf32> to vector<16xf32>
    %410 = vector.shape_cast %409 : vector<16xf32> to vector<16x1xf32>
    %cst_110 = arith.constant 1.280000e+02 : f32
    %411 = vector.broadcast %cst_110 : f32 to vector<16x1xf32>
    %412 = arith.divf %410, %411 : vector<16x1xf32>
    %413 = vector.broadcast %405 : vector<16x1xf32> to vector<16x128xf32>
    %414 = arith.subf %401, %413 : vector<16x128xf32>
    %cst_111 = arith.constant 9.99999996E-13 : f32
    %415 = vector.broadcast %cst_111 : f32 to vector<16x1xf32>
    %416 = arith.addf %412, %415 : vector<16x1xf32>
    %417 = math.rsqrt %416 : vector<16x1xf32>
    %418 = vector.broadcast %417 : vector<16x1xf32> to vector<16x128xf32>
    %419 = arith.mulf %414, %418 : vector<16x128xf32>
    %420 = vector.broadcast %344 : vector<1x128xf32> to vector<16x128xf32>
    %421 = arith.mulf %419, %420 : vector<16x128xf32>
    %422 = vector.broadcast %345 : vector<1x128xf32> to vector<16x128xf32>
    %423 = arith.addf %421, %422 : vector<16x128xf32>
    %424 = arith.truncf %423 : vector<16x128xf32> to vector<16x128xbf16>
    %425 = vector.extract_strided_slice %339 {offsets = [0, 512], sizes = [128, 256], strides = [1, 1]} : vector<128x768xbf16> to vector<128x256xbf16>
    %cst_112 = arith.constant dense<0.000000e+00> : vector<16x256xf32>
    %426 = tpu.matmul %424, %425, %cst_112 {dimension_numbers = #tpu.dot_dimension_numbers<[1], [0], [0], [1], [0, 0, 1, 1], [], []>} : vector<16x128xbf16>, vector<128x256xbf16>, vector<16x256xf32> -> vector<16x256xf32>
    %427 = vector.broadcast %346 : vector<1x256xf32> to vector<16x256xf32>
    %428 = arith.addf %426, %427 : vector<16x256xf32>
    %429 = arith.mulf %428, %428 : vector<16x256xf32>
    %430 = arith.mulf %428, %429 : vector<16x256xf32>
    %cst_113 = arith.constant 4.471500e-02 : f32
    %431 = vector.broadcast %cst_113 : f32 to vector<16x256xf32>
    %432 = arith.mulf %431, %430 : vector<16x256xf32>
    %433 = arith.addf %428, %432 : vector<16x256xf32>
    %cst_114 = arith.constant 0.797884583 : f32
    %434 = vector.broadcast %cst_114 : f32 to vector<16x256xf32>
    %435 = arith.mulf %434, %433 : vector<16x256xf32>
    %436 = math.tanh %435 : vector<16x256xf32>
    %cst_115 = arith.constant 1.000000e+00 : f32
    %437 = vector.broadcast %cst_115 : f32 to vector<16x256xf32>
    %438 = arith.addf %437, %436 : vector<16x256xf32>
    %cst_116 = arith.constant 5.000000e-01 : f32
    %439 = vector.broadcast %cst_116 : f32 to vector<16x256xf32>
    %440 = arith.mulf %439, %438 : vector<16x256xf32>
    %441 = arith.mulf %428, %440 : vector<16x256xf32>
    %442 = arith.truncf %441 : vector<16x256xf32> to vector<16x256xbf16>
    %c2_117 = arith.constant 2 : index
    %c0_118 = arith.constant 0 : index
    %c0_119 = arith.constant 0 : index
    %443 = vector.load %arg5[%c2_117, %c0_118, %c0_119] : memref<3x256x128xbf16, #tpu.memory_space<vmem>>, vector<1x256x128xbf16>
    %444 = vector.shape_cast %443 : vector<1x256x128xbf16> to vector<256x128xbf16>
    %cst_120 = arith.constant dense<0.000000e+00> : vector<16x128xf32>
    %445 = tpu.matmul %442, %444, %cst_120 {dimension_numbers = #tpu.dot_dimension_numbers<[1], [0], [0], [1], [0, 0, 1, 1], [], []>} : vector<16x256xbf16>, vector<256x128xbf16>, vector<16x128xf32> -> vector<16x128xf32>
    %446 = vector.broadcast %347 : vector<1x128xf32> to vector<16x128xf32>
    %447 = arith.addf %445, %446 : vector<16x128xf32>
    %448 = arith.addf %423, %447 : vector<16x128xf32>
    %cst_121 = arith.constant dense<0.000000e+00> : vector<16xf32>
    %449 = vector.multi_reduction <add>, %448, %cst_121 [1] : vector<16x128xf32> to vector<16xf32>
    %450 = vector.shape_cast %449 : vector<16xf32> to vector<16x1xf32>
    %cst_122 = arith.constant 1.280000e+02 : f32
    %451 = vector.broadcast %cst_122 : f32 to vector<16x1xf32>
    %452 = arith.divf %450, %451 : vector<16x1xf32>
    %453 = vector.broadcast %452 : vector<16x1xf32> to vector<16x128xf32>
    %454 = arith.subf %448, %453 : vector<16x128xf32>
    %455 = arith.mulf %454, %454 : vector<16x128xf32>
    %cst_123 = arith.constant dense<0.000000e+00> : vector<16xf32>
    %456 = vector.multi_reduction <add>, %455, %cst_123 [1] : vector<16x128xf32> to vector<16xf32>
    %457 = vector.shape_cast %456 : vector<16xf32> to vector<16x1xf32>
    %cst_124 = arith.constant 1.280000e+02 : f32
    %458 = vector.broadcast %cst_124 : f32 to vector<16x1xf32>
    %459 = arith.divf %457, %458 : vector<16x1xf32>
    %460 = vector.broadcast %452 : vector<16x1xf32> to vector<16x128xf32>
    %461 = arith.subf %448, %460 : vector<16x128xf32>
    %cst_125 = arith.constant 9.99999996E-13 : f32
    %462 = vector.broadcast %cst_125 : f32 to vector<16x1xf32>
    %463 = arith.addf %459, %462 : vector<16x1xf32>
    %464 = math.rsqrt %463 : vector<16x1xf32>
    %465 = vector.broadcast %464 : vector<16x1xf32> to vector<16x128xf32>
    %466 = arith.mulf %461, %465 : vector<16x128xf32>
    %467 = vector.broadcast %348 : vector<1x128xf32> to vector<16x128xf32>
    %468 = arith.mulf %466, %467 : vector<16x128xf32>
    %469 = vector.broadcast %349 : vector<1x128xf32> to vector<16x128xf32>
    %470 = arith.addf %468, %469 : vector<16x128xf32>
    %471 = vector.extract_strided_slice %470 {offsets = [0, 0], sizes = [8, 128], strides = [1, 1]} : vector<16x128xf32> to vector<8x128xf32>
    %cst_126 = arith.constant dense<0.000000e+00> : vector<128xf32>
    %472 = vector.multi_reduction <add>, %471, %cst_126 [0] : vector<8x128xf32> to vector<128xf32>
    %473 = vector.shape_cast %472 : vector<128xf32> to vector<1x128xf32>
    %cst_127 = arith.constant 1.250000e-01 : f32
    %474 = vector.broadcast %cst_127 : f32 to vector<1x128xf32>
    %475 = arith.mulf %473, %474 : vector<1x128xf32>
    %476 = vector.extract_strided_slice %470 {offsets = [8, 0], sizes = [8, 128], strides = [1, 1]} : vector<16x128xf32> to vector<8x128xf32>
    %cst_128 = arith.constant dense<0.000000e+00> : vector<128xf32>
    %477 = vector.multi_reduction <add>, %476, %cst_128 [0] : vector<8x128xf32> to vector<128xf32>
    %478 = vector.shape_cast %477 : vector<128xf32> to vector<1x128xf32>
    %cst_129 = arith.constant 1.250000e-01 : f32
    %479 = vector.broadcast %cst_129 : f32 to vector<1x128xf32>
    %480 = arith.mulf %478, %479 : vector<1x128xf32>
    %481 = tpu.concatenate %475, %480 in 0 : vector<1x128xf32>, vector<1x128xf32> -> vector<2x128xf32>
    %482 = vector.extract_strided_slice %204 {offsets = [0, 0], sizes = [8, 128], strides = [1, 1]} : vector<16x128xf32> to vector<8x128xf32>
    %cst_130 = arith.constant dense<0.000000e+00> : vector<128xf32>
    %483 = vector.multi_reduction <add>, %482, %cst_130 [0] : vector<8x128xf32> to vector<128xf32>
    %484 = vector.shape_cast %483 : vector<128xf32> to vector<1x128xf32>
    %cst_131 = arith.constant 1.250000e-01 : f32
    %485 = vector.broadcast %cst_131 : f32 to vector<1x128xf32>
    %486 = arith.mulf %484, %485 : vector<1x128xf32>
    %487 = vector.extract_strided_slice %204 {offsets = [8, 0], sizes = [8, 128], strides = [1, 1]} : vector<16x128xf32> to vector<8x128xf32>
    %cst_132 = arith.constant dense<0.000000e+00> : vector<128xf32>
    %488 = vector.multi_reduction <add>, %487, %cst_132 [0] : vector<8x128xf32> to vector<128xf32>
    %489 = vector.shape_cast %488 : vector<128xf32> to vector<1x128xf32>
    %cst_133 = arith.constant 1.250000e-01 : f32
    %490 = vector.broadcast %cst_133 : f32 to vector<1x128xf32>
    %491 = arith.mulf %489, %490 : vector<1x128xf32>
    %492 = tpu.concatenate %486, %491 in 0 : vector<1x128xf32>, vector<1x128xf32> -> vector<2x128xf32>
    %493 = tpu.concatenate %481, %492 in 0 : vector<2x128xf32>, vector<2x128xf32> -> vector<4x128xf32>
    %cst_134 = arith.constant 0.000000e+00 : f32
    %494 = vector.broadcast %cst_134 : f32 to vector<4x128xf32>
    %495 = tpu.concatenate %493, %494 in 0 : vector<4x128xf32>, vector<4x128xf32> -> vector<8x128xf32>
    %496 = arith.truncf %495 : vector<8x128xf32> to vector<8x128xbf16>
    %c0_135 = arith.constant 0 : index
    %c0_136 = arith.constant 0 : index
    %497 = vector.load %arg6[%c0_135, %c0_136] : memref<128x128xbf16, #tpu.memory_space<vmem>>, vector<128x128xbf16>
    %cst_137 = arith.constant dense<0.000000e+00> : vector<8x128xf32>
    %498 = tpu.matmul %496, %497, %cst_137 {dimension_numbers = #tpu.dot_dimension_numbers<[1], [0], [0], [1], [0, 0, 1, 1], [], []>} : vector<8x128xbf16>, vector<128x128xbf16>, vector<8x128xf32> -> vector<8x128xf32>
    %c2_138 = arith.constant 2 : index
    %c0_139 = arith.constant 0 : index
    %499 = vector.load %arg2[%c2_138, %c0_139] : memref<168x128xf32, #tpu.memory_space<vmem>>, vector<1x128xf32>
    %500 = vector.broadcast %499 : vector<1x128xf32> to vector<8x128xf32>
    %501 = arith.addf %498, %500 : vector<8x128xf32>
    %c0_140 = arith.constant 0 : index
    %c0_141 = arith.constant 0 : index
    %502 = vector.load %arg7[%c0_140, %c0_141] : memref<8x128xf32, #tpu.memory_space<vmem>>, vector<8x128xf32>
    tpu.vector_store %arg7[%c0_140, %c0_141], %501 {strides = array<i32>} : memref<8x128xf32, #tpu.memory_space<vmem>>, vector<8x128xf32>,
    return
  }
}

</mosaic_0001>

<bundles_post_ra>
// kernel: bert_for_sequence_classification.1
= control target key start
LH: loop header
LB: loop body
LE: loop exit
PB: predicated region body
PF: predicated region fallthrough
CT: control target
= control target key end

     0   :  { %12 = vsyncpa [#allocation3], 0  ;;  %s5238_s0 = inlined_call_operand.vmem [shape: s32[16,1], index: 0, kind: input, shape index: {}]   ;;  %s5239_s1 = inlined_call_operand.vmem [shape: f32[1,16], index: 1, kind: input, shape index: {}]   ;;  %s5240_s2 = inlined_call_operand.hbm [shape: f32[168,128], index: 2, kind: input, shape index: {}]   ;;  %s5241_s3 = inlined_call_operand.hbm [shape: f32[3,8,384], index: 3, kind: input, shape index: {}]   ;;  %s5242_s4 = inlined_call_operand.hbm [shape: bf16[3,128,768], index: 4, kind: input, shape index: {}]   ;;  %s5243_s5 = inlined_call_operand.hbm [shape: bf16[3,256,128], index: 5, kind: input, shape index: {}]   ;;  %s5244_s6 = inlined_call_operand.hbm [shape: bf16[128,128], index: 6, kind: input, shape index: {}]   ;;  %s5245_s7 = inlined_call_operand.vmem [shape: f32[8,128], index: 7, kind: output, shape index: {}]  }
   0x1   :  { %13 = vsyncpa [#allocation5], 0 }
   0x2   :  { %14 = vsyncpa [#allocation8], 0  ;;  %s4702_s24 = smov [#allocation4]   ;;  %s4586_s28 = scalar_lea.hbm %s5241_s3, 1152 }
   0x3   :  { %s36_s25 = sshll.u32 %s4702_s24, 4  ;;  %p4587_p0 = scmp.ne.s32.totalorder %s5241_s3, %s4586_s28  ;;  %s37_s25 = int_to_ptr.vmem [resolvable:$true] %s36_s25 }
   0x4   :  { %p4590_p1 = scmp.lt.u32.totalorder %s4586_s28, %s5241_s3 }
   0x6   :  { %p4592_p2 = pnand %p4590_p1, %p4587_p0 }
   0x8   :  { %4595 = shalt.err (!%p4592_p2)
}
   0x9   :  { %s4596_s10 = scalar_lea.vmem %s37_s25, 1152  ;;  %p4601_p4 = scmp.lt.s32.totalorder %s37_s25, %s37_s25 }
   0xa   :  { %p4597_p3 = scmp.ne.s32.totalorder %s37_s25, %s4596_s10  ;;  %p4602_p5 = scmp.lt.s32.totalorder %s4596_s10, %s4596_s10 }
   0xc   :  { %p4603_p6 = por %p4602_p5, %p4601_p4 }
   0xe   :  { %p4604_p7 = pnand %p4603_p6, %p4597_p3 }
  0x10   :  { %4607 = shalt.err (!%p4604_p7)
}
  0x11   :  { %s4703_s11 = smov 384   ;;  %s4704_s12 = smov 24  }
  0x12   :  { %42 = dma.hbm_to_vmem [thread:$0]  %s5241_s3, 1152, %s37_s25, [#allocation5], %s4703_s11, %s4703_s11, %s4704_s12  }
  0x13   :  { %s4705_s15 = smov [#allocation7]   ;;  %s4608_s19 = scalar_lea.hbm %s5243_s5, 6144 }
  0x14   :  { %s60_s16 = sshll.u32 %s4705_s15, 4  ;;  %p4609_p8 = scmp.ne.s32.totalorder %s5243_s5, %s4608_s19  ;;  %s61_s16 = int_to_ptr.vmem [resolvable:$true] %s60_s16 }
  0x15   :  { %p4612_p9 = scmp.lt.u32.totalorder %s4608_s19, %s5243_s5 }
  0x17   :  { %p4614_p10 = pnand %p4612_p9, %p4609_p8 }
  0x19   :  { %4617 = shalt.err (!%p4614_p10)
}
  0x1a   :  { %s4618_s24 = scalar_lea.vmem %s61_s16, 6144  ;;  %p4623_p12 = scmp.lt.s32.totalorder %s61_s16, %s61_s16 }
  0x1b   :  { %p4619_p11 = scmp.ne.s32.totalorder %s61_s16, %s4618_s24  ;;  %p4624_p13 = scmp.lt.s32.totalorder %s4618_s24, %s4618_s24 }
  0x1d   :  { %p4625_p0 = por %p4624_p13, %p4623_p12 }
  0x1f   :  { %p4626_p1 = pnand %p4625_p0, %p4619_p11 }
  0x21   :  { %4629 = shalt.err (!%p4626_p1)
}
  0x22   :  { %s4706_s3 = smov 64   ;;  %s4707_s25 = smov 4  }
  0x23   :  { %66 = dma.hbm_to_vmem [thread:$0]  %s5243_s5, 6144, %s61_s16, [#allocation8], %s4706_s3, %s4706_s3, %s4707_s25  }
  0x24   :  { %s4708_s28 = smov [#allocation2]   ;;  %s4630_s9 = scalar_lea.hbm %s5240_s2, 2688 }
  0x25   :  { %s24_s29 = sshll.u32 %s4708_s28, 4  ;;  %p4631_p2 = scmp.ne.s32.totalorder %s5240_s2, %s4630_s9  ;;  %s25_s29 = int_to_ptr.vmem [resolvable:$true] %s24_s29 }
  0x26   :  { %p4634_p3 = scmp.lt.u32.totalorder %s4630_s9, %s5240_s2 }
  0x28   :  { %p4636_p4 = pnand %p4634_p3, %p4631_p2 }
  0x2a   :  { %4639 = shalt.err (!%p4636_p4)
}
  0x2b   :  { %s4640_s17 = scalar_lea.vmem %s25_s29, 2688  ;;  %p4645_p6 = scmp.lt.s32.totalorder %s25_s29, %s25_s29 }
  0x2c   :  { %p4641_p5 = scmp.ne.s32.totalorder %s25_s29, %s4640_s17  ;;  %p4646_p7 = scmp.lt.s32.totalorder %s4640_s17, %s4640_s17 }
  0x2e   :  { %p4647_p8 = por %p4646_p7, %p4645_p6 }
  0x30   :  { %p4648_p9 = pnand %p4647_p8, %p4641_p5 }
  0x32   :  { %4651 = shalt.err (!%p4648_p9)
}
  0x33   :  { %s4709_s5 = smov 128   ;;  %s4710_s16 = smov 8  }
  0x34   :  { %30 = dma.hbm_to_vmem [thread:$0]  %s5240_s2, 2688, %s25_s29, [#allocation3], %s4709_s5, %s4709_s5, %s4710_s16  }
  0x35   :  { %s4711_s20 = smov [#allocation6]   ;;  %s4712_s22 = smov [#allocation9]  }
  0x36   :  { %s48_s21 = sshll.u32 %s4711_s20, 4  ;;  %s72_s23 = sshll.u32 %s4712_s22, 4  ;;  %s49_s21 = int_to_ptr.vmem [resolvable:$true] %s48_s21  ;;  %s73_s23 = int_to_ptr.vmem [resolvable:$true] %s72_s23 }
  0x37   :  { %s4652_s27 = scalar_lea.hbm %s5242_s4, 18432 }
  0x38   :  { %p4653_p10 = scmp.ne.s32.totalorder %s5242_s4, %s4652_s27  ;;  %p4656_p11 = scmp.lt.u32.totalorder %s4652_s27, %s5242_s4 }
  0x3a   :  { %p4658_p12 = pnand %p4656_p11, %p4653_p10 }
  0x3c   :  { %4661 = shalt.err (!%p4658_p12)
}
  0x3d   :  { %s4662_s2 = scalar_lea.vmem %s49_s21, 18432  ;;  %p4667_p0 = scmp.lt.s32.totalorder %s49_s21, %s49_s21 }
  0x3e   :  { %p4663_p13 = scmp.ne.s32.totalorder %s49_s21, %s4662_s2  ;;  %p4668_p1 = scmp.lt.s32.totalorder %s4662_s2, %s4662_s2 }
  0x40   :  { %p4669_p2 = por %p4668_p1, %p4667_p0 }
  0x42   :  { %p4670_p3 = pnand %p4669_p2, %p4663_p13 }
  0x44   :  { %4673 = shalt.err (!%p4670_p3)
}
  0x45   :  { %54 = dma.hbm_to_vmem [thread:$0]  %s5242_s4, 18432, %s49_s21, [#allocation5], %s4703_s11, %s4703_s11, %s4704_s12  }
  0x46   :  { %s4674_s15 = scalar_lea.hbm %s5244_s6, 1024 }
  0x47   :  { %p4675_p4 = scmp.ne.s32.totalorder %s5244_s6, %s4674_s15  ;;  %p4678_p5 = scmp.lt.u32.totalorder %s4674_s15, %s5244_s6 }
  0x49   :  { %p4680_p6 = pnand %p4678_p5, %p4675_p4 }
  0x4b   :  { %4683 = shalt.err (!%p4680_p6)
}
  0x4c   :  { %s4684_s19 = scalar_lea.vmem %s73_s23, 1024  ;;  %p4689_p8 = scmp.lt.s32.totalorder %s73_s23, %s73_s23 }
  0x4d   :  { %p4685_p7 = scmp.ne.s32.totalorder %s73_s23, %s4684_s19  ;;  %p4690_p9 = scmp.lt.s32.totalorder %s4684_s19, %s4684_s19 }
  0x4f   :  { %p4691_p10 = por %p4690_p9, %p4689_p8 }
  0x51   :  { %p4692_p11 = pnand %p4691_p10, %p4685_p7 }
  0x53   :  { %4695 = shalt.err (!%p4692_p11)
}
  0x54   :  { %78 = dma.hbm_to_vmem [thread:$0]  %s5244_s6, 1024, %s73_s23, [#allocation8], %s4706_s3, %s4706_s3, %s4707_s25  }
  0x55   :  { %4696 = dma.done.wait [#allocation3], 2688  }
  0x56   :  { %4697 = vsyncadd [#allocation3], 4294964608 }
  0x57   :  { %4698 = dma.done.wait [#allocation5], 19584  }
  0x58   :  { %4699 = vsyncadd [#allocation5], 4294947712 }
  0x59   :  { %4700 = dma.done.wait [#allocation8], 7168  }
  0x5a   :  { %4701 = vsyncadd [#allocation8], 4294960128  ;;  %v4713_v0 = vmov 0   ;;  %v95_v1 = vld [vmem:[%s5238_s0] sm:$0xff]  ;;  %v111_v2 = vld [vmem:[#allocation2 + $0x8] sm:$0xff]  ;;  %v97_v27 = vlaneseq  ;;  %v4714_v30 = vmov 1.0  }
  0x5b   :  { %4198 = vset.pattern.permute.xlu0 %v4713_v0  ;;  %509 = vmatprep.mubr.bf16.mxu1 %v4713_v0  ;;  %v112_v3 = vld [vmem:[#allocation2 + $0x10] sm:$0xff]  ;;  %v113_v4 = vld [vmem:[#allocation2 + $0x18] sm:$0xff]  ;;  %v114_v5 = vld [vmem:[#allocation2 + $0x20] sm:$0xff]  ;;  %v4715_v39 = vmov 0.0   ;;  %vm4716_vm2 = vmmov 0   ;;  %vm564_vm3 = vcmask 523264  }
  0x5c   :  { %100 = vperm.xlu0 %4198, %v95_v1   ;;  %v96_v6 = vld [vmem:[%s5238_s0 + $0x8] sm:$0xff]  ;;  %v4150_v7 = vpack.c.bf16 %v112_v3, %v111_v2  ;;  %v4154_v8 = vpack.c.bf16 %v114_v5, %v113_v4  ;;  %v116_v10 = vld [vmem:[#allocation2 + $0x30] sm:$0xff]  ;;  %v117_v11 = vld [vmem:[#allocation2 + $0x38] sm:$0xff]  ;;  %v4839_v28 = vand.u32 127, %v97_v27  ;;  %vm612_vm11 = vcmask 130048  }
  0x5d   :  { %v115_v9 = vld [vmem:[#allocation2 + $0x28] sm:$0xff]  ;;  %v118_v12 = vld [vmem:[#allocation2 + $0x40] sm:$0xff]  ;;  %v120_v15 = vld [vmem:[#allocation2 + $0x50] sm:$0xff]  ;;  %vm3367_vm12 = vcmask 1040384   ;;  %vm3387_vm13 = vcmask 1041408   ;;  %vm3389_vm14 = vcmask 1043456  }
  0x5e   :  { %4151 = vmatprep.subr.bf16.mxu0 %v4150_v7  ;;  %v4158_v13 = vpack.c.bf16 %v116_v10, %v115_v9  ;;  %v119_v14 = vld [vmem:[#allocation2 + $0x48] sm:$0xff]  ;;  %v4162_v16 = vpack.c.bf16 %v118_v12, %v117_v11  ;;  %v121_v17 = vld [vmem:[#allocation2 + $0x58] sm:$0xff]  ;;  %v122_v18 = vld [vmem:[#allocation2 + $0x60] sm:$0xff]  ;;  %vm266_vm4 = vcmp.ge.s32.totalorder %v4839_v28, 8  ;;  %vm269_vm5 = vcmp.lt.s32.totalorder %v4839_v28, 16 }
  0x5f   :  { %4153 = vmatpush3.bf16.msra.mxu0 %v4150_v7  ;;  %v4166_v19 = vpack.c.bf16 %v120_v15, %v119_v14  ;;  %v123_v20 = vld [vmem:[#allocation2 + $0x68] sm:$0xff]  ;;  %v124_v21 = vld [vmem:[#allocation2 + $0x70] sm:$0xff]  ;;  %v4170_v22 = vpack.c.bf16 %v122_v18, %v121_v17  ;;  %v125_v23 = vld [vmem:[#allocation2 + $0x78] sm:$0xff]  ;;  %vm255_vm6 = vcmp.lt.s32.totalorder %v4839_v28, 8 }
  0x60   :  { %103 = vperm.xlu0 %4198, %v96_v6   ;;  %4155 = vmatprep.subr.bf16.mxu0 %v4154_v8  ;;  %v126_v24 = vld [vmem:[#allocation2 + $0x80] sm:$0xff]  ;;  %v4174_v25 = vpack.c.bf16 %v124_v21, %v123_v20  ;;  %v127_v32 = vld [vmem:[#allocation2 + $0x88] sm:$0xff]  ;;  %v4217_v40 = vld [vmem:[#allocation6 + $0x8] ss:$24 sps:$4 sm:$0xff]  }
  0x61   :  { %v4178_v26 = vpack.c.bf16 %v126_v24, %v125_v23  ;;  %v4214_v37 = vld [vmem:[#allocation6 + $0x4] ss:$24 sps:$4 sm:$0xff]   ;;  %v4216_v38 = vld [vmem:[#allocation6] ss:$24 sps:$4 sm:$0xff]   ;;  %v4219_v41 = vld [vmem:[#allocation6 + $0x34] ss:$24 sps:$4 sm:$0xff]  }
  0x62   :  { %477 = vmatprep.subr.bf16.mxu1 %v4214_v37  ;;  %v4221_v50 = vld [vmem:[#allocation6 + $0x30] ss:$24 sps:$4 sm:$0xff]   ;;  %v4224_v52 = vld [vmem:[#allocation6 + $0x64] ss:$24 sps:$4 sm:$0xff]   ;;  %v4226_v53 = vld [vmem:[#allocation6 + $0x60] ss:$24 sps:$4 sm:$0xff]  }
  0x63   :  { %4157 = vmatpush3.bf16.msra.mxu0 %v4154_v8  ;;  %478 = vmatpush1.bf16.msra.mxu1 %v4216_v38  ;;  %v4222_v51 = vld [vmem:[#allocation6 + $0x38] ss:$24 sps:$4 sm:$0xff]   ;;  %v4227_v54 = vld [vmem:[#allocation6 + $0x68] ss:$24 sps:$4 sm:$0xff]   ;;  %v4229_v55 = vld [vmem:[#allocation6 + $0x94] ss:$24 sps:$4 sm:$0xff]  }
  0x64   :  { %4159 = vmatprep.subr.bf16.mxu0 %v4158_v13  ;;  %479 = vmatprep.subr.bf16.mxu1 %v4219_v41  ;;  %v4231_v56 = vld [vmem:[#allocation6 + $0x90] ss:$24 sps:$4 sm:$0xff]   ;;  %v4234_v58 = vld [vmem:[#allocation6 + $0xc4] ss:$24 sps:$4 sm:$0xff]   ;;  %v4236_v59 = vld [vmem:[#allocation6 + $0xc0] ss:$24 sps:$4 sm:$0xff]  }
  0x65   :  { %v4232_v57 = vld [vmem:[#allocation6 + $0x98] ss:$24 sps:$4 sm:$0xff]   ;;  %v4237_v60 = vld [vmem:[#allocation6 + $0xc8] ss:$24 sps:$4 sm:$0xff]   ;;  %v4239_v61 = vld [vmem:[#allocation6 + $0xf4] ss:$24 sps:$4 sm:$0xff]  }
  0x66   :  { %v4241_v62 = vld [vmem:[#allocation6 + $0xf0] ss:$24 sps:$4 sm:$0xff]   ;;  %v4244_v1 = vld [vmem:[#allocation6 + $0x124] ss:$24 sps:$4 sm:$0xff]   ;;  %v4246_v2 = vld [vmem:[#allocation6 + $0x120] ss:$24 sps:$4 sm:$0xff]  }
  0x67   :  { %4161 = vmatpush3.bf16.msra.mxu0 %v4158_v13  ;;  %480 = vmatpush1.bf16.msra.mxu1 %v4221_v50  ;;  %v4242_v63 = vld [vmem:[#allocation6 + $0xf8] ss:$24 sps:$4 sm:$0xff]   ;;  %v4247_v3 = vld [vmem:[#allocation6 + $0x128] ss:$24 sps:$4 sm:$0xff]   ;;  %v4249_v4 = vld [vmem:[#allocation6 + $0x154] ss:$24 sps:$4 sm:$0xff]  }
  0x68   :  { %4163 = vmatprep.subr.bf16.mxu0 %v4162_v16  ;;  %481 = vmatprep.subr.bf16.mxu1 %v4224_v52  ;;  %v4251_v5 = vld [vmem:[#allocation6 + $0x150] ss:$24 sps:$4 sm:$0xff]   ;;  %v4876_v24 = vshrl.u32 %v97_v27, 7  ;;  %vm271_vm8 = vmand %vm266_vm4, %vm269_vm5 }
  0x69   :  { %v4252_v6 = vld [vmem:[#allocation6 + $0x158] ss:$24 sps:$4 sm:$0xff]   ;;  %vm3729_vm15 = vmpackc.low %vm3389_vm14, %vm3389_vm14 }
  0x6a   :  { %v3513_v15 = vld [vmem:[#allocation2] ss:$0 sm:$0xff] }
  0x6b   :  { %4165 = vmatpush3.bf16.msra.mxu0 %v4162_v16  ;;  %482 = vmatpush1.bf16.msra.mxu1 %v4226_v53  ;;  %v3515_v52 = vld [vmem:[%s5239_s1] ss:$0 sm:$0xff]  ;;  %v4717_v53 = vmov -1e+09  }
  0x6c   :  { %4167 = vmatprep.subr.bf16.mxu0 %v4166_v19  ;;  %483 = vmatprep.subr.bf16.mxu1 %v4229_v55  ;;  %vm280_vm7 = vcmp.gt.f32.partialorder %v3515_v52, 0.5 }
  0x6d   :  { %vm281_vm9 = vmand %vm255_vm6, %vm280_vm7 }
  0x6e   :  { %vm282_vm10 = vmand %vm271_vm8, %vm280_vm7 }
  0x6f   :  { %4169 = vmatpush3.bf16.msra.mxu0 %v4166_v19  ;;  %484 = vmatpush1.bf16.msra.mxu1 %v4231_v56  ;;  %v3514_v19 = vld [vmem:[#allocation2 + $0x1] ss:$0 sm:$0xff]  ;;  %v4908_v56 = vsel %vm282_vm10, 0.0, %v4717_v53 }
  0x70   :  { %4171 = vmatprep.subr.bf16.mxu0 %v4170_v22  ;;  %485 = vmatprep.subr.bf16.mxu1 %v4234_v58 }
  0x73   :  { %4173 = vmatpush3.bf16.msra.mxu0 %v4170_v22  ;;  %486 = vmatpush1.bf16.msra.mxu1 %v4236_v59 }
  0x74   :  { %4175 = vmatprep.subr.bf16.mxu0 %v4174_v25  ;;  %487 = vmatprep.subr.bf16.mxu1 %v4239_v61 }
  0x77   :  { %4177 = vmatpush3.bf16.msra.mxu0 %v4174_v25  ;;  %488 = vmatpush1.bf16.msra.mxu1 %v4241_v62  ;;  %v4879_v25 = vsub.s32 0, %v4876_v24 }
  0x78   :  { %4179 = vmatprep.subr.bf16.mxu0 %v4178_v26  ;;  %489 = vmatprep.subr.bf16.mxu1 %v4244_v1 }
  0x7b   :  { %4181 = vmatpush3.bf16.msra.mxu0 %v4178_v26  ;;  %490 = vmatpush1.bf16.msra.mxu1 %v4246_v2  ;;  %v4881_v26 = vld [vmem:[#allocation4] sm:$0xff] }
  0x7c   :  { %3938 = vmatprep.subr.bf16.mxu0 %v4715_v39  ;;  %491 = vmatprep.subr.bf16.mxu1 %v4249_v4 }
  0x7f   :  { %492 = vmatpush1.bf16.msra.mxu1 %v4251_v5 }
  0x80   :  { %3958 = vmatprep.subr.bf16.mxu1 %v4715_v39 }
  0xdb   :  { %v101_v29 = vpop.permute.xlu0 %100 }
  0xdc   :  { %vm105_vm0 = vcmp.eq.s32.totalorder %v4839_v28, %v101_v29  ;;  %v335_v29 = vld [vmem:[#allocation4 + $0x10] sm:$0xff] }
  0xdd   :  { %3935 = vmatprep.mubr.msk.f32.mxu0 %vm105_vm0, %v4714_v30 }
  0xdf   :  { %v104_v31 = vpop.permute.xlu0 %103 }
  0xe0   :  { %vm106_vm1 = vcmp.eq.s32.totalorder %v4839_v28, %v104_v31  ;;  %v340_v31 = vrot.slane %v4881_v26, %v4879_v25 }
  0xe1   :  { %3936 = vmatmul.mubr.msk.f32.vlgmr.msra.gmra.mrb[0].mxu0 %vm106_vm1, %v4714_v30  ;;  %v4883_v30 = vld [vmem:[#allocation4 + $0x8] sm:$0xff] }
  0xe2   :  { %3939 = vmatpush3.bf16.msra.mxu0 %v4217_v40  ;;  %3954 = vmatprep.mubr.msk.bf16.mxu0 %vm4716_vm2, %v4715_v39 }
  0xe3   :  { %3940 = vmatprep.subr.bf16.mxu0 %v4715_v39 }
  0xe6   :  { %3941 = vmatpush3.bf16.msra.mxu0 %v4222_v51 }
  0xe7   :  { %3942 = vmatprep.subr.bf16.mxu0 %v4715_v39 }
  0xea   :  { %3943 = vmatpush3.bf16.msra.mxu0 %v4227_v54  ;;  %v4906_v54 = vsel %vm281_vm9, 0.0, %v4717_v53 }
  0xeb   :  { %3944 = vmatprep.subr.bf16.mxu0 %v4715_v39 }
  0xee   :  { %3945 = vmatpush3.bf16.msra.mxu0 %v4232_v57 }
  0xef   :  { %3946 = vmatprep.subr.bf16.mxu0 %v4715_v39 }
  0xf2   :  { %3947 = vmatpush3.bf16.msra.mxu0 %v4237_v60 }
  0xf3   :  { %3948 = vmatprep.subr.bf16.mxu0 %v4715_v39 }
  0xf6   :  { %3949 = vmatpush3.bf16.msra.mxu0 %v4242_v63 }
  0xf7   :  { %3950 = vmatprep.subr.bf16.mxu0 %v4715_v39 }
  0xfa   :  { %3951 = vmatpush3.bf16.msra.mxu0 %v4247_v3 }
  0xfb   :  { %3952 = vmatprep.subr.bf16.mxu0 %v4715_v39 }
  0xfe   :  { %3953 = vmatpush3.bf16.msra.mxu0 %v4252_v6 }
  0xff   :  { %3982 = vmatprep.subr.bf16.mxu0 %v4715_v39 }
 0x1b4   :  { %v3937_v33 = vpop.f32.mrb[0].mxu0 }
 0x1b5   :  { %v194_v34 = vpop.f32.mrb[1].mxu0  ;;  %v200_v36 = vadd.f32 %v3937_v33, %v127_v32 }
 0x1b6   :  { %v195_v35 = vadd.f32 %v194_v34, %v127_v32  ;;  %v348_v32 = vrot.slane %v335_v29, %v4879_v25 }
 0x1b8   :  { %205 = vadd.xlane.f32.xlu1 %v195_v35 }
 0x1bc   :  { %207 = vadd.xlane.f32.xlu1 %v200_v36 }
 0x245   :  { %v206_v42 = vpop.xlane.xlu1 %205 }
 0x246   :  { %v210_v43 = vmul.f32 0.0078125, %v206_v42 }
 0x248   :  { %v4845_v44 = vsub.f32 %v195_v35, %v210_v43  ;;  %v344_v35 = vrot.slane %v4883_v30, %v4879_v25 }
 0x249   :  { %v208_v45 = vpop.xlane.xlu1 %207 }
 0x24a   :  { %v211_v46 = vmul.f32 0.0078125, %v208_v45  ;;  %v214_v47 = vmul.f32 %v4845_v44, %v4845_v44 }
 0x24c   :  { %v4849_v48 = vsub.f32 %v200_v36, %v211_v46  ;;  %216 = vadd.xlane.f32.xlu0 %v214_v47 }
 0x24e   :  { %v215_v49 = vmul.f32 %v4849_v48, %v4849_v48 }
 0x250   :  { %218 = vadd.xlane.f32.xlu1 %v215_v49 }
 0x2d9   :  { %v217_v7 = vpop.xlane.xlu0 %216 }
 0x2da   :  { %v220_v8 = vmul.f32 0.0078125, %v217_v7 }
 0x2dc   :  { %v222_v9 = vadd.f32 1e-12, %v220_v8 }
 0x2dd   :  { %v219_v10 = vpop.xlane.xlu1 %218 }
 0x2de   :  { %4486 = vrsqrt.f32 %v222_v9  ;;  %v221_v11 = vmul.f32 0.0078125, %v219_v10 }
 0x2e0   :  { %v223_v12 = vadd.f32 1e-12, %v221_v11 }
 0x2e2   :  { %4488 = vrsqrt.f32 %v223_v12 }
 0x2e8   :  { %v4487_v13 = vpop.eup %4486 }
 0x2e9   :  { %v226_v14 = vmul.f32 %v4487_v13, %v4845_v44 }
 0x2eb   :  { %v232_v18 = vmul.f32 %v3513_v15, %v226_v14 }
 0x2ec   :  { %v4489_v16 = vpop.eup %4488 }
 0x2ed   :  { %v227_v17 = vmul.f32 %v4489_v16, %v4849_v48  ;;  %v4865_v21 = vadd.f32 %v3514_v19, %v232_v18 }
 0x2ef   :  { %v233_v20 = vmul.f32 %v3513_v15, %v227_v17 }
 0x2f1   :  { %v4867_v22 = vadd.f32 %v3514_v19, %v233_v20 }
 0x2f3   :  { %v336_v23 = vpack.c.bf16 %v4867_v22, %v4865_v21 }
 0x2f5   :  { %510 = vmatmul.mubr.bf16.vlgmr.msra.gmra.mrb[0].mxu1 %v336_v23  ;;  %3955 = vmatmul.mubr.bf16.vlgmr.msra.gmra.mrb[4].mxu0 %v336_v23 }
 0x2f6   :  { %3960 = vmatprep.mubr.msk.bf16.mxu1 %vm4716_vm2, %v4715_v39  ;;  %3998 = vmatprep.mubr.msk.bf16.mxu0 %vm4716_vm2, %v4715_v39 }
 0x3c8   :  { %v511_v33 = vpop.f32.mrb[0].mxu1  ;;  %v554_v34 = vpop.f32.mrb[4].mxu0 }
 0x3c9   :  { %v513_v27 = vpop.f32.mrb[1].mxu1  ;;  %v3956_v36 = vpop.f32.mrb[5].mxu0  ;;  %v512_v40 = vadd.f32 %v511_v33, %v340_v31  ;;  %v555_v41 = vadd.f32 %v554_v34, %v348_v32 }
 0x3ca   :  { %v515_v37 = vpop.f32.mrb[2].mxu1  ;;  %v557_v38 = vpop.f32.mrb[6].mxu0  ;;  %v514_v46 = vadd.f32 %v513_v27, %v344_v35 }
 0x3cb   :  { %v516_v42 = vadd.f32 %v515_v37, %v340_v31  ;;  %v558_v43 = vadd.f32 %v557_v38, %v348_v32  ;;  %v517_v44 = vpop.f32.mrb[3].mxu1  ;;  %v3957_v45 = vpop.f32.mrb[7].mxu0 }
 0x3cc   :  { %v518_v47 = vadd.f32 %v517_v44, %v344_v35 }
 0x3cd   :  { %v4890_v48 = vpack.c.bf16 %v558_v43, %v555_v41  ;;  %v561_v49 = vpack.c.bf16 %v516_v42, %v512_v40 }
 0x3ce   :  { %v562_v50 = vpack.c.bf16 %v518_v47, %v514_v46 }
 0x3cf   :  { %681 = vrot.lane.b32.xlu0 %v561_v49, %s4706_s3 }
 0x3d0   :  { %v569_v51 = vsel %vm564_vm3, %v562_v50, 0 }
 0x3d1   :  { %3959 = vmatpush3.bf16.xpose.msra.mxu1 %v569_v51 }
 0x3d2   :  { %3964 = vmatprep.subr.bf16.mxu1 %v4715_v39 }
 0x3d8   :  { %3961 = vmatmul.mubr.msk.bf16.vlgmr.msra.gmra.mrb[4].mxu1 %vm564_vm3, %v561_v49 }
 0x3d9   :  { %3965 = vmatpush3.bf16.msra.mxu1 %v4890_v48  ;;  %3966 = vmatprep.mubr.msk.bf16.mxu1 %vm4716_vm2, %v4715_v39 }
 0x3da   :  { %3970 = vmatprep.subr.bf16.mxu1 %v4715_v39 }
 0x441   :  { %v682_v19 = vpop.permute.xlu0 %681 }
 0x4ab   :  { %v605_v55 = vpop.f32.mrb[4].mxu1 }
 0x4ac   :  { %v606_v57 = vadd.f32 %v605_v55, %v4906_v54  ;;  %v3962_v58 = vpop.f32.mrb[5].mxu1 }
 0x4ad   :  { %v608_v59 = vpop.f32.mrb[6].mxu1 }
 0x4ae   :  { %v609_v60 = vadd.f32 %v608_v59, %v4908_v56  ;;  %v3963_v61 = vpop.f32.mrb[7].mxu1  ;;  %v613_v28 = vsel %vm612_vm11, %v606_v57, -inf }
 0x4af   :  { %614 = vmax.xlane.f32.xlu1 %v613_v28  ;;  %v4254_v61 = vld [vmem:[#allocation6 + $0xc] ss:$24 sps:$4 sm:$0xff]   ;;  %v4255_v28 = vld [vmem:[#allocation6 + $0x3c] ss:$24 sps:$4 sm:$0xff]  }
 0x4b0   :  { %v616_v62 = vsel %vm612_vm11, %v609_v60, -inf  ;;  %3983 = vmatpush3.bf16.msra.mxu0 %v4254_v61 }
 0x4b1   :  { %3984 = vmatprep.subr.bf16.mxu0 %v4715_v39 }
 0x4b3   :  { %617 = vmax.xlane.f32.xlu1 %v616_v62  ;;  %v4257_v62 = vld [vmem:[#allocation6 + $0x9c] ss:$24 sps:$4 sm:$0xff]  }
 0x4b4   :  { %3985 = vmatpush3.bf16.msra.mxu0 %v4255_v28 }
 0x4b5   :  { %3986 = vmatprep.subr.bf16.mxu0 %v4715_v39 }
 0x53c   :  { %v615_v63 = vpop.xlane.xlu1 %614 }
 0x53d   :  { %v619_v1 = vsub.f32 %v606_v57, %v615_v63  ;;  %v4258_v63 = vld [vmem:[#allocation6 + $0xcc] ss:$24 sps:$4 sm:$0xff]  }
 0x53f   :  { %v621_v2 = vmul.f32 1.442695, %v619_v1  ;;  %v4259_v1 = vld [vmem:[#allocation6 + $0xfc] ss:$24 sps:$4 sm:$0xff]  }
 0x540   :  { %v618_v3 = vpop.xlane.xlu1 %617 }
 0x541   :  { %4490 = vpow2.f32 %v621_v2  ;;  %v620_v4 = vsub.f32 %v609_v60, %v618_v3  ;;  %v4260_v2 = vld [vmem:[#allocation6 + $0x12c] ss:$24 sps:$4 sm:$0xff]   ;;  %v4261_v3 = vld [vmem:[#allocation6 + $0x15c] ss:$24 sps:$4 sm:$0xff]  }
 0x543   :  { %v623_v5 = vmul.f32 1.442695, %v620_v4 }
 0x545   :  { %4492 = vpow2.f32 %v623_v5 }
 0x54b   :  { %v4491_v6 = vpop.eup %4490 }
 0x54c   :  { %v625_v7 = vsel %vm612_vm11, %v4491_v6, 0.0 }
 0x54d   :  { %626 = vadd.xlane.f32.xlu1 %v625_v7 }
 0x54f   :  { %v4493_v8 = vpop.eup %4492 }
 0x550   :  { %v628_v9 = vsel %vm612_vm11, %v4493_v8, 0.0 }
 0x551   :  { %629 = vadd.xlane.f32.xlu1 %v628_v9 }
 0x562   :  { %684 = vrot.lane.b32.xlu1 %v562_v50, %s4706_s3 }
 0x5da   :  { %v627_v10 = vpop.xlane.xlu1 %626 }
 0x5db   :  { %4494 = vrcp.f32 %v627_v10 }
 0x5de   :  { %v630_v11 = vpop.xlane.xlu1 %629 }
 0x5df   :  { %4496 = vrcp.f32 %v630_v11 }
 0x5e2   :  { %v685_v16 = vpop.permute.xlu1 %684 }
 0x5e3   :  { %v690_v18 = vsel %vm564_vm3, %v685_v16, 0 }
 0x5e5   :  { %v4495_v12 = vpop.eup %4494 }
 0x5e6   :  { %v633_v14 = vmul.f32 %v4495_v12, %v4491_v6 }
 0x5e9   :  { %v4497_v13 = vpop.eup %4496 }
 0x5ea   :  { %v634_v15 = vmul.f32 %v4497_v13, %v4493_v8 }
 0x5ec   :  { %v635_v17 = vpack.c.bf16 %v634_v15, %v633_v14  ;;  %v4952_v15 = vsub.s32 1, %v4876_v24 }
 0x5ee   :  { %3967 = vmatmul.mubr.msk.bf16.vlgmr.msra.gmra.mrb[8].mxu1 %vm612_vm11, %v635_v17  ;;  %v818_v16 = vrot.slane %v4881_v26, %v4952_v15 }
 0x5ef   :  { %3971 = vmatpush3.bf16.xpose.msra.mxu1 %v690_v18  ;;  %3972 = vmatprep.mubr.msk.bf16.mxu1 %vm4716_vm2, %v4715_v39 }
 0x5f0   :  { %3976 = vmatprep.subr.bf16.mxu1 %v4715_v39 }
 0x5f6   :  { %3973 = vmatmul.mubr.msk.bf16.vlgmr.msra.gmra.mrb[12].mxu1 %vm564_vm3, %v682_v19 }
 0x5f7   :  { %3978 = vmatprep.mubr.msk.bf16.mxu1 %vm4716_vm2, %v4715_v39 }
 0x6c1   :  { %v4925_v20 = vpop.f32.mrb[8].mxu1 }
 0x6c2   :  { %v3968_v23 = vpop.f32.mrb[9].mxu1 }
 0x6c3   :  { %v4927_v29 = vpop.f32.mrb[10].mxu1 }
 0x6c4   :  { %v3969_v31 = vpop.f32.mrb[11].mxu1 }
 0x6c9   :  { %v726_v32 = vpop.f32.mrb[12].mxu1 }
 0x6ca   :  { %v727_v33 = vadd.f32 %v726_v32, %v4906_v54  ;;  %v3974_v34 = vpop.f32.mrb[13].mxu1 }
 0x6cb   :  { %v729_v35 = vpop.f32.mrb[14].mxu1  ;;  %v4264_v34 = vld [vmem:[#allocation6 + $0x14] ss:$24 sps:$4 sm:$0xff]  }
 0x6cc   :  { %v730_v27 = vadd.f32 %v729_v35, %v4908_v56  ;;  %v3975_v36 = vpop.f32.mrb[15].mxu1  ;;  %v733_v37 = vsel %vm612_vm11, %v727_v33, -inf  ;;  %v4267_v35 = vld [vmem:[#allocation6 + $0x44] ss:$24 sps:$4 sm:$0xff]  }
 0x6cd   :  { %734 = vmax.xlane.f32.xlu1 %v733_v37 }
 0x6ce   :  { %v736_v38 = vsel %vm612_vm11, %v730_v27, -inf }
 0x6cf   :  { %737 = vmax.xlane.f32.xlu0 %v736_v38 }
 0x75a   :  { %v735_v40 = vpop.xlane.xlu1 %734 }
 0x75b   :  { %v739_v41 = vsub.f32 %v727_v33, %v735_v40 }
 0x75c   :  { %v738_v42 = vpop.xlane.xlu0 %737 }
 0x75d   :  { %v741_v43 = vmul.f32 1.442695, %v739_v41  ;;  %v740_v44 = vsub.f32 %v730_v27, %v738_v42  ;;  %v4265_v27 = vld [vmem:[#allocation6 + $0x40] ss:$24 sps:$4 sm:$0xff]  }
 0x75f   :  { %4498 = vpow2.f32 %v741_v43  ;;  %v743_v45 = vmul.f32 1.442695, %v740_v44  ;;  %v4268_v44 = vld [vmem:[#allocation6 + $0x70] ss:$24 sps:$4 sm:$0xff]  }
 0x761   :  { %4500 = vpow2.f32 %v743_v45  ;;  %v4273_v45 = vld [vmem:[#allocation6 + $0xa4] ss:$24 sps:$4 sm:$0xff]  }
 0x769   :  { %v4499_v46 = vpop.eup %4498 }
 0x76a   :  { %v745_v47 = vsel %vm612_vm11, %v4499_v46, 0.0 }
 0x76b   :  { %v4501_v49 = vpop.eup %4500  ;;  %746 = vadd.xlane.f32.xlu1 %v745_v47  ;;  %v4276_v47 = vld [vmem:[#allocation6 + $0xd4] ss:$24 sps:$4 sm:$0xff]  }
 0x76c   :  { %v748_v50 = vsel %vm612_vm11, %v4501_v49, 0.0 }
 0x76f   :  { %749 = vadd.xlane.f32.xlu1 %v748_v50  ;;  %v4279_v50 = vld [vmem:[#allocation6 + $0x104] ss:$24 sps:$4 sm:$0xff]  }
 0x780   :  { %757 = vrot.lane.b32.xlu1 %v4890_v48, %s4706_s3  ;;  %v4256_v48 = vld [vmem:[#allocation6 + $0x6c] ss:$24 sps:$4 sm:$0xff]  }
 0x781   :  { %3987 = vmatpush3.bf16.msra.mxu0 %v4256_v48 }
 0x782   :  { %3988 = vmatprep.subr.bf16.mxu0 %v4715_v39 }
 0x785   :  { %3989 = vmatpush3.bf16.msra.mxu0 %v4257_v62  ;;  %v4959_v62 = vsub.s32 2, %v4876_v24 }
 0x786   :  { %3990 = vmatprep.subr.bf16.mxu0 %v4715_v39 }
 0x789   :  { %3991 = vmatpush3.bf16.msra.mxu0 %v4258_v63  ;;  %v919_v63 = vrot.slane %v4881_v26, %v4959_v62 }
 0x78a   :  { %3992 = vmatprep.subr.bf16.mxu0 %v4715_v39 }
 0x78d   :  { %3993 = vmatpush3.bf16.msra.mxu0 %v4259_v1  ;;  %v4964_v1 = vsub.s32 3, %v4876_v24 }
 0x78e   :  { %3994 = vmatprep.subr.bf16.mxu0 %v4715_v39 }
 0x791   :  { %3995 = vmatpush3.bf16.msra.mxu0 %v4260_v2 }
 0x792   :  { %3996 = vmatprep.subr.bf16.mxu0 %v4715_v39 }
 0x795   :  { %3997 = vmatpush3.bf16.msra.mxu0 %v4261_v3 }
 0x7f8   :  { %v747_v51 = vpop.xlane.xlu1 %746 }
 0x7f9   :  { %4502 = vrcp.f32 %v747_v51  ;;  %v4277_v51 = vld [vmem:[#allocation6 + $0x100] ss:$24 sps:$4 sm:$0xff]  }
 0x7fc   :  { %v750_v52 = vpop.xlane.xlu1 %749 }
 0x7fd   :  { %4504 = vrcp.f32 %v750_v52  ;;  %v4282_v52 = vld [vmem:[#allocation6 + $0x134] ss:$24 sps:$4 sm:$0xff]  }
 0x800   :  { %v758_v53 = vpop.permute.xlu1 %757 }
 0x801   :  { %3977 = vmatpush3.bf16.msra.mxu1 %v758_v53  ;;  %v4280_v53 = vld [vmem:[#allocation6 + $0x130] ss:$24 sps:$4 sm:$0xff]  }
 0x802   :  { %1017 = vmatprep.subr.bf16.mxu1 %v4264_v34  ;;  %v4299_v34 = vld [vmem:[#allocation7 + $0x30] sm:$0xff]  }
 0x803   :  { %v4503_v55 = vpop.eup %4502 }
 0x804   :  { %v753_v58 = vmul.f32 %v4503_v55, %v4499_v46  ;;  %v4271_v46 = vld [vmem:[#allocation6 + $0xa0] ss:$24 sps:$4 sm:$0xff]   ;;  %v4285_v55 = vld [vmem:[#allocation6 + $0x164] ss:$24 sps:$4 sm:$0xff]  }
 0x807   :  { %v4505_v57 = vpop.eup %4504 }
 0x808   :  { %v754_v59 = vmul.f32 %v4505_v57, %v4501_v49  ;;  %v4274_v49 = vld [vmem:[#allocation6 + $0xd0] ss:$24 sps:$4 sm:$0xff]   ;;  %v4283_v57 = vld [vmem:[#allocation6 + $0x160] ss:$24 sps:$4 sm:$0xff]  }
 0x80a   :  { %v755_v60 = vpack.c.bf16 %v754_v59, %v753_v58 }
 0x80c   :  { %3979 = vmatmul.mubr.msk.bf16.vlgmr.msra.gmra.mrb[16].mxu1 %vm612_vm11, %v755_v60 }
 0x80d   :  { %1049 = vmatprep.mubr.bf16.mxu1 %v4713_v0 }
 0x8df   :  { %v797_v4 = vpop.f32.mrb[16].mxu1 }
 0x8e0   :  { %v3980_v5 = vpop.f32.mrb[17].mxu1 }
 0x8e1   :  { %v800_v6 = vpop.f32.mrb[18].mxu1 }
 0x8e2   :  { %v4199_v7 = vpack.i.bf16 %v800_v6, %v797_v4  ;;  %v3981_v8 = vpop.f32.mrb[19].mxu1 }
 0x8e4   :  { %4200 = vrot.lane.b32.xlu0 %v4199_v7, %s4706_s3  ;;  %v925_v7 = vrot.slane %v4881_v26, %v4964_v1 }
 0x956   :  { %v4201_v9 = vpop.permute.xlu0 %4200 }
 0x957   :  { %v4203_v10 = vunpack.i.h.bf16 %v4201_v9  ;;  %v4202_v11 = vunpack.i.l.bf16 %v4201_v9 }
 0x959   :  { %v813_v12 = vsel %vm564_vm3, %v4927_v29, %v4203_v10  ;;  %v812_v13 = vsel %vm564_vm3, %v4925_v20, %v4202_v11  ;;  %v4262_v20 = vld [vmem:[#allocation6 + $0x10] ss:$24 sps:$4 sm:$0xff]  }
 0x95a   :  { %v814_v14 = vpack.c.bf16 %v813_v12, %v812_v13  ;;  %1018 = vmatpush1.bf16.msra.mxu1 %v4262_v20  ;;  %v4286_v12 = vld [vmem:[#allocation7 + $0x40] sm:$0xff]   ;;  %v4298_v20 = vld [vmem:[#allocation7 + $0x70] sm:$0xff]  }
 0x95b   :  { %1019 = vmatprep.subr.bf16.mxu1 %v4267_v35  ;;  %v4287_v13 = vld [vmem:[#allocation7] sm:$0xff]   ;;  %3776 = vmatprep.subr.bf16.mxu0 %v4286_v12  ;;  %v4300_v35 = vld [vmem:[#allocation7 + $0x78] sm:$0xff]  }
 0x95c   :  { %3999 = vmatmul.mubr.bf16.vlgmr.msra.gmra.mrb[8].mxu0 %v814_v14  ;;  %v4288_v14 = vld [vmem:[#allocation7 + $0x48] sm:$0xff]  }
 0x95d   :  { %3777 = vmatpush3.bf16.msra.mxu0 %v4287_v13 }
 0x95e   :  { %1020 = vmatpush1.bf16.msra.mxu1 %v4265_v27  ;;  %3778 = vmatprep.subr.bf16.mxu0 %v4288_v14  ;;  %v4301_v27 = vld [vmem:[#allocation7 + $0x38] sm:$0xff]  }
 0xa2f   :  { %v885_v17 = vpop.f32.mrb[8].mxu0 }
 0xa30   :  { %v886_v18 = vadd.f32 %v885_v17, %v818_v16  ;;  %v4000_v19 = vpop.f32.mrb[9].mxu0  ;;  %v4290_v17 = vld [vmem:[#allocation7 + $0x50] sm:$0xff]  }
 0xa31   :  { %v888_v23 = vpop.f32.mrb[10].mxu0  ;;  %v4292_v19 = vld [vmem:[#allocation7 + $0x58] sm:$0xff]  }
 0xa32   :  { %v889_v31 = vadd.f32 %v888_v23, %v818_v16  ;;  %v4001_v32 = vpop.f32.mrb[11].mxu0  ;;  %v892_v33 = vadd.f32 %v886_v18, %v4865_v21  ;;  %v4289_v16 = vld [vmem:[#allocation7 + $0x8] sm:$0xff]   ;;  %v4291_v18 = vld [vmem:[#allocation7 + $0x10] sm:$0xff]   ;;  %v4293_v23 = vld [vmem:[#allocation7 + $0x18] sm:$0xff]  }
 0xa33   :  { %3779 = vmatpush3.bf16.msra.mxu0 %v4289_v16  ;;  %v4295_v32 = vld [vmem:[#allocation7 + $0x20] sm:$0xff]  }
 0xa34   :  { %894 = vadd.xlane.f32.xlu1 %v892_v33  ;;  %v893_v29 = vadd.f32 %v889_v31, %v4867_v22  ;;  %v4270_v22 = vld [vmem:[#allocation6 + $0x74] ss:$24 sps:$4 sm:$0xff]   ;;  %3780 = vmatprep.subr.bf16.mxu0 %v4290_v17  ;;  %v4294_v31 = vld [vmem:[#allocation7 + $0x60] sm:$0xff]  }
 0xa35   :  { %1021 = vmatprep.subr.bf16.mxu1 %v4270_v22 }
 0xa36   :  { %896 = vadd.xlane.f32.xlu0 %v893_v29  ;;  %1022 = vmatpush1.bf16.msra.mxu1 %v4268_v44 }
 0xa37   :  { %1023 = vmatprep.subr.bf16.mxu1 %v4273_v45  ;;  %3781 = vmatpush3.bf16.msra.mxu0 %v4291_v18 }
 0xa38   :  { %3782 = vmatprep.subr.bf16.mxu0 %v4292_v19 }
 0xa3a   :  { %1024 = vmatpush1.bf16.msra.mxu1 %v4271_v46 }
 0xa3b   :  { %1025 = vmatprep.subr.bf16.mxu1 %v4276_v47  ;;  %3783 = vmatpush3.bf16.msra.mxu0 %v4293_v23 }
 0xa3c   :  { %3784 = vmatprep.subr.bf16.mxu0 %v4294_v31 }
 0xa3e   :  { %1026 = vmatpush1.bf16.msra.mxu1 %v4274_v49 }
 0xa3f   :  { %1027 = vmatprep.subr.bf16.mxu1 %v4279_v50  ;;  %3785 = vmatpush3.bf16.msra.mxu0 %v4295_v32 }
 0xa42   :  { %1028 = vmatpush1.bf16.msra.mxu1 %v4277_v51 }
 0xa43   :  { %1029 = vmatprep.subr.bf16.mxu1 %v4282_v52 }
 0xa46   :  { %1030 = vmatpush1.bf16.msra.mxu1 %v4280_v53 }
 0xa47   :  { %1031 = vmatprep.subr.bf16.mxu1 %v4285_v55 }
 0xa4a   :  { %1032 = vmatpush1.bf16.msra.mxu1 %v4283_v57 }
 0xac1   :  { %v895_v36 = vpop.xlane.xlu1 %894 }
 0xac2   :  { %v898_v37 = vmul.f32 0.0078125, %v895_v36  ;;  %v4977_v36 = vsub.s32 4, %v4876_v24 }
 0xac3   :  { %v897_v38 = vpop.xlane.xlu0 %896 }
 0xac4   :  { %v900_v40 = vsub.f32 %v892_v33, %v898_v37  ;;  %v899_v41 = vmul.f32 0.0078125, %v897_v38  ;;  %v4296_v33 = vld [vmem:[#allocation7 + $0x68] sm:$0xff]   ;;  %v932_v37 = vrot.slane %v4881_v26, %v4977_v36  ;;  %v936_v38 = vrot.slane %v4883_v30, %v4977_v36 }
 0xac5   :  { %3786 = vmatprep.subr.bf16.mxu0 %v4296_v33 }
 0xac6   :  { %v901_v42 = vsub.f32 %v893_v29, %v899_v41  ;;  %v902_v43 = vmul.f32 %v900_v40, %v900_v40  ;;  %v4297_v29 = vld [vmem:[#allocation7 + $0x28] sm:$0xff]  }
 0xac7   :  { %3787 = vmatpush3.bf16.msra.mxu0 %v4297_v29 }
 0xac8   :  { %904 = vadd.xlane.f32.xlu1 %v902_v43  ;;  %v903_v21 = vmul.f32 %v901_v42, %v901_v42  ;;  %3788 = vmatprep.subr.bf16.mxu0 %v4298_v20 }
 0xaca   :  { %906 = vadd.xlane.f32.xlu0 %v903_v21 }
 0xacb   :  { %3789 = vmatpush3.bf16.msra.mxu0 %v4299_v34  ;;  %v4986_v34 = vsub.s32 5, %v4876_v24 }
 0xacc   :  { %3790 = vmatprep.subr.bf16.mxu0 %v4300_v35 }
 0xacf   :  { %3791 = vmatpush3.bf16.msra.mxu0 %v4301_v27  ;;  %v1133_v27 = vrot.slane %v4881_v26, %v4986_v34 }
 0xad0   :  { %4002 = vmatprep.subr.bf16.mxu0 %v4715_v39 }
 0xb55   :  { %v905_v58 = vpop.xlane.xlu1 %904 }
 0xb56   :  { %v908_v59 = vmul.f32 0.0078125, %v905_v58 }
 0xb57   :  { %v907_v60 = vpop.xlane.xlu0 %906 }
 0xb58   :  { %v910_v61 = vadd.f32 1e-12, %v908_v59  ;;  %v909_v28 = vmul.f32 0.0078125, %v907_v60 }
 0xb5a   :  { %4506 = vrsqrt.f32 %v910_v61  ;;  %v911_v48 = vadd.f32 1e-12, %v909_v28 }
 0xb5c   :  { %4508 = vrsqrt.f32 %v911_v48 }
 0xb64   :  { %v4507_v2 = vpop.eup %4506 }
 0xb65   :  { %v914_v3 = vmul.f32 %v4507_v2, %v900_v40 }
 0xb66   :  { %v4509_v4 = vpop.eup %4508 }
 0xb67   :  { %v915_v5 = vmul.f32 %v4509_v4, %v901_v42  ;;  %v920_v6 = vmul.f32 %v919_v63, %v914_v3 }
 0xb69   :  { %v921_v8 = vmul.f32 %v919_v63, %v915_v5  ;;  %v4968_v9 = vadd.f32 %v925_v7, %v920_v6 }
 0xb6b   :  { %v4970_v10 = vadd.f32 %v925_v7, %v921_v8 }
 0xb6d   :  { %v928_v11 = vpack.c.bf16 %v4970_v10, %v4968_v9 }
 0xb6f   :  { %1050 = vmatmul.mubr.bf16.vlgmr.msra.gmra.mrb[20].mxu1 %v928_v11 }
 0xb70   :  { %1533 = vmatprep.mubr.bf16.mxu1 %v4713_v0 }
 0xc42   :  { %v1051_v40 = vpop.f32.mrb[20].mxu1 }
 0xc43   :  { %v1052_v41 = vadd.f32 %v1051_v40, %v932_v37  ;;  %v1053_v42 = vpop.f32.mrb[21].mxu1 }
 0xc44   :  { %v1054_v43 = vadd.f32 %v1053_v42, %v936_v38  ;;  %v1055_v21 = vpop.f32.mrb[22].mxu1 }
 0xc45   :  { %v1060_v22 = vmul.f32 %v1052_v41, %v1052_v41  ;;  %v1056_v44 = vadd.f32 %v1055_v21, %v932_v37  ;;  %v1057_v45 = vpop.f32.mrb[23].mxu1 }
 0xc46   :  { %v1061_v46 = vmul.f32 %v1054_v43, %v1054_v43  ;;  %v1058_v47 = vadd.f32 %v1057_v45, %v936_v38  ;;  %v4302_v45 = vld [vmem:[#allocation6 + $0x180] ss:$24 sps:$4 sm:$0xff]  }
 0xc47   :  { %v1064_v49 = vmul.f32 %v1060_v22, %v1052_v41  ;;  %v1062_v50 = vmul.f32 %v1056_v44, %v1056_v44 }
 0xc48   :  { %v1065_v51 = vmul.f32 %v1061_v46, %v1054_v43  ;;  %v1063_v52 = vmul.f32 %v1058_v47, %v1058_v47  ;;  %v4304_v46 = vld [vmem:[#allocation6 + $0x184] ss:$24 sps:$4 sm:$0xff]  }
 0xc49   :  { %v1068_v53 = vmul.f32 0.044715, %v1064_v49  ;;  %v1066_v55 = vmul.f32 %v1062_v50, %v1056_v44  ;;  %v4309_v49 = vld [vmem:[#allocation6 + $0x1b4] ss:$24 sps:$4 sm:$0xff]   ;;  %1501 = vmatprep.subr.bf16.mxu1 %v4304_v46  ;;  %v4310_v50 = vld [vmem:[#allocation6 + $0x1b8] ss:$24 sps:$4 sm:$0xff]  }
 0xc4a   :  { %v1069_v57 = vmul.f32 0.044715, %v1065_v51  ;;  %v1067_v58 = vmul.f32 %v1063_v52, %v1058_v47  ;;  %1502 = vmatpush1.bf16.msra.mxu1 %v4302_v45  ;;  %v4307_v51 = vld [vmem:[#allocation6 + $0x1b0] ss:$24 sps:$4 sm:$0xff]  }
 0xc4b   :  { %v1072_v59 = vadd.f32 %v1068_v53, %v1052_v41  ;;  %v1070_v30 = vmul.f32 0.044715, %v1066_v55  ;;  %1503 = vmatprep.subr.bf16.mxu1 %v4309_v49 }
 0xc4c   :  { %v1073_v60 = vadd.f32 %v1069_v57, %v1054_v43  ;;  %v1071_v61 = vmul.f32 0.044715, %v1067_v58 }
 0xc4d   :  { %v1076_v28 = vmul.f32 0.7978846, %v1072_v59  ;;  %v1074_v48 = vadd.f32 %v1070_v30, %v1056_v44  ;;  %v4314_v30 = vld [vmem:[#allocation6 + $0x1e4] ss:$24 sps:$4 sm:$0xff]  }
 0xc4e   :  { %v1077_v63 = vmul.f32 0.7978846, %v1073_v60  ;;  %v1075_v2 = vadd.f32 %v1071_v61, %v1058_v47  ;;  %1504 = vmatpush1.bf16.msra.mxu1 %v4307_v51  ;;  %v4312_v60 = vld [vmem:[#allocation6 + $0x1e0] ss:$24 sps:$4 sm:$0xff]  }
 0xc4f   :  { %4510 = vtanh.f32 %v1076_v28  ;;  %v1078_v3 = vmul.f32 0.7978846, %v1074_v48  ;;  %v4315_v61 = vld [vmem:[#allocation6 + $0x1e8] ss:$24 sps:$4 sm:$0xff]   ;;  %1505 = vmatprep.subr.bf16.mxu1 %v4314_v30  ;;  %v4319_v28 = vld [vmem:[#allocation6 + $0x214] ss:$24 sps:$4 sm:$0xff]  }
 0xc50   :  { %4512 = vtanh.f32 %v1077_v63  ;;  %v1079_v4 = vmul.f32 0.7978846, %v1075_v2  ;;  %v4317_v48 = vld [vmem:[#allocation6 + $0x210] ss:$24 sps:$4 sm:$0xff]   ;;  %v4324_v2 = vld [vmem:[#allocation6 + $0x244] ss:$24 sps:$4 sm:$0xff]  }
 0xc51   :  { %4514 = vtanh.f32 %v1078_v3  ;;  %v4320_v63 = vld [vmem:[#allocation6 + $0x218] ss:$24 sps:$4 sm:$0xff]  }
 0xc52   :  { %4516 = vtanh.f32 %v1079_v4  ;;  %1506 = vmatpush1.bf16.msra.mxu1 %v4312_v60  ;;  %v4322_v3 = vld [vmem:[#allocation6 + $0x240] ss:$24 sps:$4 sm:$0xff]  }
 0xc53   :  { %1507 = vmatprep.subr.bf16.mxu1 %v4319_v28  ;;  %v4325_v4 = vld [vmem:[#allocation6 + $0x248] ss:$24 sps:$4 sm:$0xff]  }
 0xc56   :  { %1508 = vmatpush1.bf16.msra.mxu1 %v4317_v48 }
 0xc57   :  { %1509 = vmatprep.subr.bf16.mxu1 %v4324_v2 }
 0xc59   :  { %v4511_v5 = vpop.eup %4510 }
 0xc5a   :  { %v4513_v6 = vpop.eup %4512  ;;  %v1084_v7 = vadd.f32 1.0, %v4511_v5  ;;  %1510 = vmatpush1.bf16.msra.mxu1 %v4322_v3  ;;  %v4329_v5 = vld [vmem:[#allocation6 + $0x274] ss:$24 sps:$4 sm:$0xff]  }
 0xc5b   :  { %v4515_v8 = vpop.eup %4514  ;;  %v1085_v11 = vadd.f32 1.0, %v4513_v6  ;;  %v4327_v6 = vld [vmem:[#allocation6 + $0x270] ss:$24 sps:$4 sm:$0xff]   ;;  %1511 = vmatprep.subr.bf16.mxu1 %v4329_v5 }
 0xc5c   :  { %v4517_v12 = vpop.eup %4516  ;;  %v1088_v13 = vmul.f32 0.5, %v1084_v7  ;;  %v1086_v14 = vadd.f32 1.0, %v4515_v8  ;;  %v4330_v7 = vld [vmem:[#allocation6 + $0x278] ss:$24 sps:$4 sm:$0xff]   ;;  %v4334_v8 = vld [vmem:[#allocation6 + $0x2a4] ss:$24 sps:$4 sm:$0xff]  }
 0xc5d   :  { %v1087_v16 = vadd.f32 1.0, %v4517_v12  ;;  %v1089_v17 = vmul.f32 0.5, %v1085_v11  ;;  %v4332_v11 = vld [vmem:[#allocation6 + $0x2a0] ss:$24 sps:$4 sm:$0xff]  }
 0xc5e   :  { %v1090_v18 = vmul.f32 0.5, %v1086_v14  ;;  %v1092_v23 = vmul.f32 %v1088_v13, %v1052_v41  ;;  %1512 = vmatpush1.bf16.msra.mxu1 %v4327_v6  ;;  %v4335_v12 = vld [vmem:[#allocation6 + $0x2a8] ss:$24 sps:$4 sm:$0xff]   ;;  %v4339_v14 = vld [vmem:[#allocation6 + $0x2d4] ss:$24 sps:$4 sm:$0xff]  }
 0xc5f   :  { %v1091_v19 = vmul.f32 0.5, %v1087_v16  ;;  %v1093_v32 = vmul.f32 %v1089_v17, %v1054_v43  ;;  %1513 = vmatprep.subr.bf16.mxu1 %v4334_v8  ;;  %v4337_v13 = vld [vmem:[#allocation6 + $0x2d0] ss:$24 sps:$4 sm:$0xff]  }
 0xc60   :  { %v1094_v31 = vmul.f32 %v1090_v18, %v1056_v44  ;;  %v4340_v16 = vld [vmem:[#allocation6 + $0x2d8] ss:$24 sps:$4 sm:$0xff]  }
 0xc61   :  { %v1095_v33 = vmul.f32 %v1091_v19, %v1058_v47  ;;  %v4305_v47 = vld [vmem:[#allocation6 + $0x188] ss:$24 sps:$4 sm:$0xff]  }
 0xc62   :  { %v1096_v29 = vpack.c.bf16 %v1094_v31, %v1092_v23  ;;  %1514 = vmatpush1.bf16.msra.mxu1 %v4332_v11 }
 0xc63   :  { %v1097_v20 = vpack.c.bf16 %v1095_v33, %v1093_v32  ;;  %1515 = vmatprep.subr.bf16.mxu1 %v4339_v14  ;;  %v5006_v33 = vsub.s32 6, %v4876_v24 }
 0xc65   :  { %1262 = vmatprep.mubr.bf16.mxu0 %v1097_v20  ;;  %v5011_v20 = vsub.s32 7, %v4876_v24  ;;  %v5026_v24 = vld [vmem:[#allocation4 + $0x18] sm:$0xff] }
 0xc66   :  { %1263 = vmatmul.mubr.bf16.vlgmr.msra.gmra.mrb[12].mxu0 %v1096_v29  ;;  %1516 = vmatpush1.bf16.msra.mxu1 %v4337_v13  ;;  %v1298_v29 = vrot.slane %v4881_v26, %v5006_v33  ;;  %v1364_v45 = vrot.slane %v5026_v24, %v4879_v25 }
 0xc67   :  { %4018 = vmatprep.mubr.msk.bf16.mxu0 %vm4716_vm2, %v4715_v39  ;;  %4003 = vmatpush3.bf16.msra.mxu0 %v4305_v47 }
 0xc68   :  { %4004 = vmatprep.subr.bf16.mxu0 %v4715_v39  ;;  %4022 = vmatprep.subr.bf16.mxu1 %v4715_v39 }
 0xc6b   :  { %4005 = vmatpush3.bf16.msra.mxu0 %v4310_v50 }
 0xc6c   :  { %4006 = vmatprep.subr.bf16.mxu0 %v4715_v39 }
 0xc6f   :  { %4007 = vmatpush3.bf16.msra.mxu0 %v4315_v61 }
 0xc70   :  { %4008 = vmatprep.subr.bf16.mxu0 %v4715_v39 }
 0xc73   :  { %4009 = vmatpush3.bf16.msra.mxu0 %v4320_v63 }
 0xc74   :  { %4010 = vmatprep.subr.bf16.mxu0 %v4715_v39 }
 0xc77   :  { %4011 = vmatpush3.bf16.msra.mxu0 %v4325_v4 }
 0xc78   :  { %4012 = vmatprep.subr.bf16.mxu0 %v4715_v39 }
 0xc7b   :  { %4013 = vmatpush3.bf16.msra.mxu0 %v4330_v7 }
 0xc7c   :  { %4014 = vmatprep.subr.bf16.mxu0 %v4715_v39 }
 0xc7f   :  { %4015 = vmatpush3.bf16.msra.mxu0 %v4335_v12 }
 0xc80   :  { %4016 = vmatprep.subr.bf16.mxu0 %v4715_v39 }
 0xc83   :  { %4017 = vmatpush3.bf16.msra.mxu0 %v4340_v16 }
 0xc84   :  { %4046 = vmatprep.subr.bf16.mxu0 %v4715_v39 }
 0xd39   :  { %v3792_v35 = vpop.f32.mrb[12].mxu0 }
 0xd3a   :  { %v3793_v37 = vpop.f32.mrb[13].mxu0 }
 0xd3b   :  { %v3794_v38 = vadd.f32 %v3793_v37, %v3792_v35  ;;  %v3795_v40 = vpop.f32.mrb[14].mxu0 }
 0xd3c   :  { %v3796_v41 = vpop.f32.mrb[15].mxu0 }
 0xd3d   :  { %v1265_v42 = vadd.f32 %v3794_v38, %v1133_v27  ;;  %v3797_v43 = vadd.f32 %v3796_v41, %v3795_v40  ;;  %v1304_v41 = vrot.slane %v4881_v26, %v5011_v20  ;;  %v5028_v26 = vld [vmem:[#allocation4 + $0x20] sm:$0xff] }
 0xd3e   :  { %v1368_v50 = vrot.slane %v5028_v26, %v4879_v25 }
 0xd3f   :  { %v1268_v21 = vadd.f32 %v3797_v43, %v1133_v27  ;;  %v1271_v22 = vadd.f32 %v1265_v42, %v4968_v9 }
 0xd41   :  { %1273 = vadd.xlane.f32.xlu1 %v1271_v22  ;;  %v1272_v44 = vadd.f32 %v1268_v21, %v4970_v10 }
 0xd43   :  { %1275 = vadd.xlane.f32.xlu0 %v1272_v44 }
 0xdce   :  { %v1274_v9 = vpop.xlane.xlu1 %1273 }
 0xdcf   :  { %v1277_v52 = vmul.f32 0.0078125, %v1274_v9 }
 0xdd0   :  { %v1276_v10 = vpop.xlane.xlu0 %1275 }
 0xdd1   :  { %v1279_v53 = vsub.f32 %v1271_v22, %v1277_v52  ;;  %v1278_v55 = vmul.f32 0.0078125, %v1276_v10 }
 0xdd3   :  { %v4994_v57 = vsub.f32 %v1272_v44, %v1278_v55  ;;  %v1281_v58 = vmul.f32 %v1279_v53, %v1279_v53  ;;  %v1359_v44 = vld [vmem:[#allocation4 + $0x28] sm:$0xff] }
 0xdd4   :  { %v1372_v46 = vrot.slane %v1359_v44, %v4879_v25 }
 0xdd5   :  { %1283 = vadd.xlane.f32.xlu1 %v1281_v58  ;;  %v1282_v59 = vmul.f32 %v4994_v57, %v4994_v57 }
 0xdd7   :  { %1285 = vadd.xlane.f32.xlu0 %v1282_v59 }
 0xe62   :  { %v1284_v17 = vpop.xlane.xlu1 %1283 }
 0xe63   :  { %v1287_v18 = vmul.f32 0.0078125, %v1284_v17 }
 0xe64   :  { %v1286_v19 = vpop.xlane.xlu0 %1285 }
 0xe65   :  { %v1289_v23 = vadd.f32 1e-12, %v1287_v18  ;;  %v1288_v31 = vmul.f32 0.0078125, %v1286_v19 }
 0xe67   :  { %4518 = vrsqrt.f32 %v1289_v23  ;;  %v1290_v32 = vadd.f32 1e-12, %v1288_v31 }
 0xe69   :  { %4520 = vrsqrt.f32 %v1290_v32 }
 0xe71   :  { %v4519_v35 = vpop.eup %4518 }
 0xe72   :  { %v1293_v27 = vmul.f32 %v4519_v35, %v1279_v53 }
 0xe73   :  { %v4521_v37 = vpop.eup %4520 }
 0xe74   :  { %v1299_v38 = vmul.f32 %v1298_v29, %v1293_v27  ;;  %v1294_v40 = vmul.f32 %v4521_v37, %v4994_v57 }
 0xe76   :  { %v1300_v42 = vmul.f32 %v1298_v29, %v1294_v40  ;;  %v5016_v43 = vadd.f32 %v1304_v41, %v1299_v38 }
 0xe78   :  { %v5018_v21 = vadd.f32 %v1304_v41, %v1300_v42 }
 0xe7a   :  { %v1360_v22 = vpack.c.bf16 %v5018_v21, %v5016_v43 }
 0xe7c   :  { %1534 = vmatmul.mubr.bf16.vlgmr.msra.gmra.mrb[24].mxu1 %v1360_v22  ;;  %4019 = vmatmul.mubr.bf16.vlgmr.msra.gmra.mrb[16].mxu0 %v1360_v22 }
 0xe7d   :  { %4024 = vmatprep.mubr.msk.bf16.mxu1 %vm4716_vm2, %v4715_v39  ;;  %4062 = vmatprep.mubr.msk.bf16.mxu0 %vm4716_vm2, %v4715_v39 }
 0xf4f   :  { %v1535_v47 = vpop.f32.mrb[24].mxu1  ;;  %v1578_v49 = vpop.f32.mrb[16].mxu0 }
 0xf50   :  { %v1537_v51 = vpop.f32.mrb[25].mxu1  ;;  %v4020_v9 = vpop.f32.mrb[17].mxu0  ;;  %v1536_v53 = vadd.f32 %v1535_v47, %v1364_v45  ;;  %v1579_v55 = vadd.f32 %v1578_v49, %v1372_v46 }
 0xf51   :  { %v1539_v52 = vpop.f32.mrb[26].mxu1  ;;  %v1581_v10 = vpop.f32.mrb[18].mxu0  ;;  %v1538_v60 = vadd.f32 %v1537_v51, %v1368_v50 }
 0xf52   :  { %v1540_v57 = vadd.f32 %v1539_v52, %v1364_v45  ;;  %v1582_v58 = vadd.f32 %v1581_v10, %v1372_v46  ;;  %v1541_v59 = vpop.f32.mrb[27].mxu1  ;;  %v4021_v30 = vpop.f32.mrb[19].mxu0 }
 0xf53   :  { %v1542_v61 = vadd.f32 %v1541_v59, %v1368_v50 }
 0xf54   :  { %v1585_v28 = vpack.c.bf16 %v1540_v57, %v1536_v53  ;;  %v5035_v48 = vpack.c.bf16 %v1582_v58, %v1579_v55 }
 0xf55   :  { %v1586_v63 = vpack.c.bf16 %v1542_v61, %v1538_v60 }
 0xf57   :  { %v1592_v2 = vsel %vm564_vm3, %v1586_v63, 0 }
 0xf58   :  { %4023 = vmatpush3.bf16.xpose.msra.mxu1 %v1592_v2 }
 0xf59   :  { %4028 = vmatprep.subr.bf16.mxu1 %v4715_v39 }
 0xf5f   :  { %4025 = vmatmul.mubr.msk.bf16.vlgmr.msra.gmra.mrb[28].mxu1 %vm564_vm3, %v1585_v28 }
 0xf60   :  { %4029 = vmatpush3.bf16.msra.mxu1 %v5035_v48  ;;  %4030 = vmatprep.mubr.msk.bf16.mxu1 %vm4716_vm2, %v4715_v39 }
 0xf61   :  { %4034 = vmatprep.subr.bf16.mxu1 %v4715_v39 }
0x1032   :  { %v1628_v3 = vpop.f32.mrb[28].mxu1 }
0x1033   :  { %v1629_v4 = vadd.f32 %v1628_v3, %v4906_v54  ;;  %v4026_v5 = vpop.f32.mrb[29].mxu1 }
0x1034   :  { %v1631_v6 = vpop.f32.mrb[30].mxu1 }
0x1035   :  { %v1632_v7 = vadd.f32 %v1631_v6, %v4908_v56  ;;  %v4027_v8 = vpop.f32.mrb[31].mxu1  ;;  %v1635_v11 = vsel %vm612_vm11, %v1629_v4, -inf }
0x1036   :  { %1636 = vmax.xlane.f32.xlu1 %v1635_v11 }
0x1037   :  { %v1638_v12 = vsel %vm612_vm11, %v1632_v7, -inf }
0x1038   :  { %1639 = vmax.xlane.f32.xlu0 %v1638_v12 }
0x10c3   :  { %v1637_v13 = vpop.xlane.xlu1 %1636 }
0x10c4   :  { %v1641_v14 = vsub.f32 %v1629_v4, %v1637_v13 }
0x10c5   :  { %v1640_v16 = vpop.xlane.xlu0 %1639 }
0x10c6   :  { %v1643_v17 = vmul.f32 1.442695, %v1641_v14  ;;  %v1642_v18 = vsub.f32 %v1632_v7, %v1640_v16 }
0x10c8   :  { %4522 = vpow2.f32 %v1643_v17  ;;  %v1645_v19 = vmul.f32 1.442695, %v1642_v18  ;;  %v4342_v17 = vld [vmem:[#allocation6 + $0x18c] ss:$24 sps:$4 sm:$0xff]   ;;  %v4343_v18 = vld [vmem:[#allocation6 + $0x1bc] ss:$24 sps:$4 sm:$0xff]  }
0x10c9   :  { %4047 = vmatpush3.bf16.msra.mxu0 %v4342_v17  ;;  %v4370_v17 = vld [vmem:[#allocation6 + $0x2b4] ss:$24 sps:$4 sm:$0xff]  }
0x10ca   :  { %4524 = vpow2.f32 %v1645_v19  ;;  %4048 = vmatprep.subr.bf16.mxu0 %v4715_v39  ;;  %v4345_v19 = vld [vmem:[#allocation6 + $0x21c] ss:$24 sps:$4 sm:$0xff]  }
0x10cd   :  { %4049 = vmatpush3.bf16.msra.mxu0 %v4343_v18  ;;  %v4368_v18 = vld [vmem:[#allocation6 + $0x2b0] ss:$24 sps:$4 sm:$0xff]  }
0x10ce   :  { %4050 = vmatprep.subr.bf16.mxu0 %v4715_v39 }
0x10d2   :  { %v4523_v23 = vpop.eup %4522 }
0x10d3   :  { %v1647_v31 = vsel %vm612_vm11, %v4523_v23, 0.0 }
0x10d4   :  { %v4525_v32 = vpop.eup %4524  ;;  %1648 = vadd.xlane.f32.xlu1 %v1647_v31  ;;  %v4347_v31 = vld [vmem:[#allocation6 + $0x27c] ss:$24 sps:$4 sm:$0xff]  }
0x10d5   :  { %v1650_v29 = vsel %vm612_vm11, %v4525_v32, 0.0 }
0x10d6   :  { %1651 = vadd.xlane.f32.xlu0 %v1650_v29  ;;  %v4349_v29 = vld [vmem:[#allocation6 + $0x2dc] ss:$24 sps:$4 sm:$0xff]  }
0x10e5   :  { %1706 = vrot.lane.b32.xlu1 %v1586_v63, %s4706_s3 }
0x10ec   :  { %1703 = vrot.lane.b32.xlu0 %v1585_v28, %s4706_s3 }
0x1161   :  { %v1649_v35 = vpop.xlane.xlu1 %1648 }
0x1162   :  { %4526 = vrcp.f32 %v1649_v35 }
0x1163   :  { %v1652_v27 = vpop.xlane.xlu0 %1651 }
0x1164   :  { %4528 = vrcp.f32 %v1652_v27 }
0x1165   :  { %v1707_v42 = vpop.permute.xlu1 %1706 }
0x1166   :  { %v1712_v44 = vsel %vm564_vm3, %v1707_v42, 0 }
0x1167   :  { %v1704_v45 = vpop.permute.xlu0 %1703 }
0x116c   :  { %v4527_v37 = vpop.eup %4526 }
0x116d   :  { %v1655_v40 = vmul.f32 %v4527_v37, %v4523_v23  ;;  %v4346_v23 = vld [vmem:[#allocation6 + $0x24c] ss:$24 sps:$4 sm:$0xff]  }
0x116e   :  { %v4529_v38 = vpop.eup %4528 }
0x116f   :  { %v1656_v41 = vmul.f32 %v4529_v38, %v4525_v32  ;;  %v4348_v32 = vld [vmem:[#allocation6 + $0x2ac] ss:$24 sps:$4 sm:$0xff]  }
0x1171   :  { %v1657_v22 = vpack.c.bf16 %v1656_v41, %v1655_v40 }
0x1173   :  { %4031 = vmatmul.mubr.msk.bf16.vlgmr.msra.gmra.mrb[32].mxu1 %vm612_vm11, %v1657_v22 }
0x1174   :  { %4035 = vmatpush3.bf16.xpose.msra.mxu1 %v1712_v44  ;;  %4036 = vmatprep.mubr.msk.bf16.mxu1 %vm4716_vm2, %v4715_v39 }
0x1175   :  { %4040 = vmatprep.subr.bf16.mxu1 %v4715_v39 }
0x117b   :  { %4037 = vmatmul.mubr.msk.bf16.vlgmr.msra.gmra.mrb[36].mxu1 %vm564_vm3, %v1704_v45 }
0x117c   :  { %4042 = vmatprep.mubr.msk.bf16.mxu1 %vm4716_vm2, %v4715_v39 }
0x1246   :  { %v5060_v46 = vpop.f32.mrb[32].mxu1 }
0x1247   :  { %v4032_v47 = vpop.f32.mrb[33].mxu1 }
0x1248   :  { %v5062_v49 = vpop.f32.mrb[34].mxu1 }
0x1249   :  { %v4033_v50 = vpop.f32.mrb[35].mxu1 }
0x124a   :  { %v1840_v50 = vrot.slane %v5026_v24, %v4952_v15 }
0x124e   :  { %v1748_v51 = vpop.f32.mrb[36].mxu1 }
0x124f   :  { %v1749_v9 = vadd.f32 %v1748_v51, %v4906_v54  ;;  %v4038_v52 = vpop.f32.mrb[37].mxu1 }
0x1250   :  { %v1751_v10 = vpop.f32.mrb[38].mxu1 }
0x1251   :  { %v1752_v53 = vadd.f32 %v1751_v10, %v4908_v56  ;;  %v4039_v55 = vpop.f32.mrb[39].mxu1  ;;  %v1755_v57 = vsel %vm612_vm11, %v1749_v9, -inf }
0x1252   :  { %1756 = vmax.xlane.f32.xlu1 %v1755_v57 }
0x1253   :  { %v1758_v58 = vsel %vm612_vm11, %v1752_v53, -inf }
0x1254   :  { %1759 = vmax.xlane.f32.xlu0 %v1758_v58 }
0x12df   :  { %v1757_v59 = vpop.xlane.xlu1 %1756 }
0x12e0   :  { %v1761_v30 = vsub.f32 %v1749_v9, %v1757_v59  ;;  %v4352_v59 = vld [vmem:[#allocation6 + $0x194] ss:$24 sps:$4 sm:$0xff]  }
0x12e1   :  { %v1760_v60 = vpop.xlane.xlu0 %1759 }
0x12e2   :  { %v1763_v61 = vmul.f32 1.442695, %v1761_v30  ;;  %v1762_v28 = vsub.f32 %v1752_v53, %v1760_v60  ;;  %v4353_v30 = vld [vmem:[#allocation6 + $0x1c0] ss:$24 sps:$4 sm:$0xff]  }
0x12e4   :  { %4530 = vpow2.f32 %v1763_v61  ;;  %v1765_v63 = vmul.f32 1.442695, %v1762_v28 }
0x12e6   :  { %4532 = vpow2.f32 %v1765_v63 }
0x12ee   :  { %v4531_v2 = vpop.eup %4530 }
0x12ef   :  { %v1767_v3 = vsel %vm612_vm11, %v4531_v2, 0.0 }
0x12f0   :  { %v4533_v4 = vpop.eup %4532  ;;  %1768 = vadd.xlane.f32.xlu1 %v1767_v3 }
0x12f1   :  { %v1770_v5 = vsel %vm612_vm11, %v4533_v4, 0.0 }
0x12f2   :  { %1771 = vadd.xlane.f32.xlu0 %v1770_v5 }
0x1301   :  { %1779 = vrot.lane.b32.xlu1 %v5035_v48, %s4706_s3  ;;  %v4344_v48 = vld [vmem:[#allocation6 + $0x1ec] ss:$24 sps:$4 sm:$0xff]  }
0x1302   :  { %4051 = vmatpush3.bf16.msra.mxu0 %v4344_v48  ;;  %v4373_v48 = vld [vmem:[#allocation6 + $0x2e4] ss:$24 sps:$4 sm:$0xff]  }
0x1303   :  { %4052 = vmatprep.subr.bf16.mxu0 %v4715_v39 }
0x1306   :  { %4053 = vmatpush3.bf16.msra.mxu0 %v4345_v19  ;;  %v4371_v19 = vld [vmem:[#allocation6 + $0x2e0] ss:$24 sps:$4 sm:$0xff]  }
0x1307   :  { %4054 = vmatprep.subr.bf16.mxu0 %v4715_v39 }
0x130a   :  { %4055 = vmatpush3.bf16.msra.mxu0 %v4346_v23 }
0x130b   :  { %4056 = vmatprep.subr.bf16.mxu0 %v4715_v39 }
0x130e   :  { %4057 = vmatpush3.bf16.msra.mxu0 %v4347_v31 }
0x130f   :  { %4058 = vmatprep.subr.bf16.mxu0 %v4715_v39 }
0x1312   :  { %4059 = vmatpush3.bf16.msra.mxu0 %v4348_v32 }
0x1313   :  { %4060 = vmatprep.subr.bf16.mxu0 %v4715_v39 }
0x1316   :  { %4061 = vmatpush3.bf16.msra.mxu0 %v4349_v29 }
0x137d   :  { %v1769_v6 = vpop.xlane.xlu1 %1768 }
0x137e   :  { %4534 = vrcp.f32 %v1769_v6  ;;  %v4358_v6 = vld [vmem:[#allocation6 + $0x1f4] ss:$24 sps:$4 sm:$0xff]  }
0x137f   :  { %v1772_v7 = vpop.xlane.xlu0 %1771 }
0x1380   :  { %4536 = vrcp.f32 %v1772_v7  ;;  %v4356_v7 = vld [vmem:[#allocation6 + $0x1f0] ss:$24 sps:$4 sm:$0xff]  }
0x1381   :  { %v1780_v8 = vpop.permute.xlu1 %1779 }
0x1382   :  { %4041 = vmatpush3.bf16.msra.mxu1 %v1780_v8  ;;  %v4361_v8 = vld [vmem:[#allocation6 + $0x224] ss:$24 sps:$4 sm:$0xff]  }
0x1383   :  { %2039 = vmatprep.subr.bf16.mxu1 %v4352_v59  ;;  %v4382_v59 = vld [vmem:[#allocation7 + $0xe0] sm:$0xff]  }
0x1388   :  { %v4535_v11 = vpop.eup %4534 }
0x1389   :  { %v1775_v13 = vmul.f32 %v4535_v11, %v4531_v2  ;;  %v4359_v11 = vld [vmem:[#allocation6 + $0x220] ss:$24 sps:$4 sm:$0xff]  }
0x138a   :  { %v4537_v12 = vpop.eup %4536 }
0x138b   :  { %v1776_v14 = vmul.f32 %v4537_v12, %v4533_v4  ;;  %v4364_v12 = vld [vmem:[#allocation6 + $0x254] ss:$24 sps:$4 sm:$0xff]  }
0x138d   :  { %v1777_v16 = vpack.c.bf16 %v1776_v14, %v1775_v13  ;;  %v4362_v13 = vld [vmem:[#allocation6 + $0x250] ss:$24 sps:$4 sm:$0xff]   ;;  %v4367_v14 = vld [vmem:[#allocation6 + $0x284] ss:$24 sps:$4 sm:$0xff]  }
0x138f   :  { %4043 = vmatmul.mubr.msk.bf16.vlgmr.msra.gmra.mrb[40].mxu1 %vm612_vm11, %v1777_v16  ;;  %v4365_v16 = vld [vmem:[#allocation6 + $0x280] ss:$24 sps:$4 sm:$0xff]  }
0x1390   :  { %2071 = vmatprep.mubr.bf16.mxu1 %v4713_v0 }
0x1462   :  { %v1819_v35 = vpop.f32.mrb[40].mxu1 }
0x1463   :  { %v4044_v27 = vpop.f32.mrb[41].mxu1 }
0x1464   :  { %v1822_v37 = vpop.f32.mrb[42].mxu1 }
0x1465   :  { %v4204_v38 = vpack.i.bf16 %v1822_v37, %v1819_v35  ;;  %v4045_v40 = vpop.f32.mrb[43].mxu1  ;;  %v1941_v37 = vrot.slane %v5026_v24, %v4959_v62 }
0x1467   :  { %4205 = vrot.lane.b32.xlu0 %v4204_v38, %s4706_s3 }
0x14d9   :  { %v4206_v41 = vpop.permute.xlu0 %4205 }
0x14da   :  { %v4208_v42 = vunpack.i.h.bf16 %v4206_v41  ;;  %v4207_v22 = vunpack.i.l.bf16 %v4206_v41 }
0x14dc   :  { %v1835_v44 = vsel %vm564_vm3, %v5062_v49, %v4208_v42  ;;  %v1834_v45 = vsel %vm564_vm3, %v5060_v46, %v4207_v22  ;;  %v4350_v49 = vld [vmem:[#allocation6 + $0x190] ss:$24 sps:$4 sm:$0xff]   ;;  %v4355_v46 = vld [vmem:[#allocation6 + $0x1c4] ss:$24 sps:$4 sm:$0xff]  }
0x14dd   :  { %v1836_v47 = vpack.c.bf16 %v1835_v44, %v1834_v45  ;;  %2040 = vmatpush1.bf16.msra.mxu1 %v4350_v49  ;;  %v1947_v44 = vrot.slane %v5026_v24, %v4964_v1  ;;  %v4381_v49 = vld [vmem:[#allocation7 + $0x98] sm:$0xff]  }
0x14de   :  { %2041 = vmatprep.subr.bf16.mxu1 %v4355_v46  ;;  %v4383_v46 = vld [vmem:[#allocation7 + $0xa0] sm:$0xff]  }
0x14df   :  { %4063 = vmatmul.mubr.bf16.vlgmr.msra.gmra.mrb[20].mxu0 %v1836_v47 }
0x14e1   :  { %2042 = vmatpush1.bf16.msra.mxu1 %v4353_v30  ;;  %v4384_v30 = vld [vmem:[#allocation7 + $0xe8] sm:$0xff]  }
0x14e2   :  { %2043 = vmatprep.subr.bf16.mxu1 %v4358_v6 }
0x14e5   :  { %2044 = vmatpush1.bf16.msra.mxu1 %v4356_v7 }
0x14e6   :  { %2045 = vmatprep.subr.bf16.mxu1 %v4361_v8 }
0x14e9   :  { %2046 = vmatpush1.bf16.msra.mxu1 %v4359_v11 }
0x14ea   :  { %2047 = vmatprep.subr.bf16.mxu1 %v4364_v12 }
0x14ed   :  { %2048 = vmatpush1.bf16.msra.mxu1 %v4362_v13 }
0x14ee   :  { %2049 = vmatprep.subr.bf16.mxu1 %v4367_v14 }
0x14f1   :  { %2050 = vmatpush1.bf16.msra.mxu1 %v4365_v16 }
0x14f2   :  { %2051 = vmatprep.subr.bf16.mxu1 %v4370_v17 }
0x14f5   :  { %2052 = vmatpush1.bf16.msra.mxu1 %v4368_v18 }
0x14f6   :  { %2053 = vmatprep.subr.bf16.mxu1 %v4373_v48 }
0x14f9   :  { %2054 = vmatpush1.bf16.msra.mxu1 %v4371_v19 }
0x15b2   :  { %v1907_v51 = vpop.f32.mrb[20].mxu0 }
0x15b3   :  { %v1908_v9 = vadd.f32 %v1907_v51, %v1840_v50  ;;  %v4064_v52 = vpop.f32.mrb[21].mxu0 }
0x15b4   :  { %v1910_v10 = vpop.f32.mrb[22].mxu0  ;;  %v4375_v52 = vld [vmem:[#allocation7 + $0x80] sm:$0xff]  }
0x15b5   :  { %v1911_v53 = vadd.f32 %v1910_v10, %v1840_v50  ;;  %v4065_v55 = vpop.f32.mrb[23].mxu0  ;;  %v1914_v57 = vadd.f32 %v1908_v9, %v5016_v43  ;;  %v4374_v9 = vld [vmem:[#allocation7 + $0xc0] sm:$0xff]   ;;  %v4376_v10 = vld [vmem:[#allocation7 + $0xc8] sm:$0xff]  }
0x15b6   :  { %3824 = vmatprep.subr.bf16.mxu0 %v4374_v9  ;;  %v4378_v55 = vld [vmem:[#allocation7 + $0xd0] sm:$0xff]  }
0x15b7   :  { %1916 = vadd.xlane.f32.xlu1 %v1914_v57  ;;  %v1915_v58 = vadd.f32 %v1911_v53, %v5018_v21  ;;  %3825 = vmatpush3.bf16.msra.mxu0 %v4375_v52  ;;  %v4377_v53 = vld [vmem:[#allocation7 + $0x88] sm:$0xff]  }
0x15b8   :  { %3826 = vmatprep.subr.bf16.mxu0 %v4376_v10 }
0x15b9   :  { %1918 = vadd.xlane.f32.xlu0 %v1915_v58 }
0x15bb   :  { %3827 = vmatpush3.bf16.msra.mxu0 %v4377_v53 }
0x15bc   :  { %3828 = vmatprep.subr.bf16.mxu0 %v4378_v55 }
0x1644   :  { %v1917_v60 = vpop.xlane.xlu1 %1916 }
0x1645   :  { %v1920_v61 = vmul.f32 0.0078125, %v1917_v60  ;;  %v4385_v60 = vld [vmem:[#allocation7 + $0xa8] sm:$0xff]  }
0x1646   :  { %v1919_v28 = vpop.xlane.xlu0 %1918 }
0x1647   :  { %v1922_v63 = vsub.f32 %v1914_v57, %v1920_v61  ;;  %v1921_v2 = vmul.f32 0.0078125, %v1919_v28  ;;  %v4379_v57 = vld [vmem:[#allocation7 + $0x90] sm:$0xff]  }
0x1648   :  { %3829 = vmatpush3.bf16.msra.mxu0 %v4379_v57  ;;  %v4386_v61 = vld [vmem:[#allocation7 + $0xf0] sm:$0xff]  }
0x1649   :  { %v1923_v3 = vsub.f32 %v1915_v58, %v1921_v2  ;;  %v1924_v4 = vmul.f32 %v1922_v63, %v1922_v63  ;;  %v4380_v58 = vld [vmem:[#allocation7 + $0xd8] sm:$0xff]   ;;  %v4387_v28 = vld [vmem:[#allocation7 + $0xb0] sm:$0xff]  }
0x164a   :  { %3830 = vmatprep.subr.bf16.mxu0 %v4380_v58  ;;  %v4389_v2 = vld [vmem:[#allocation7 + $0xb8] sm:$0xff]  }
0x164b   :  { %1926 = vadd.xlane.f32.xlu1 %v1924_v4  ;;  %v1925_v5 = vmul.f32 %v1923_v3, %v1923_v3  ;;  %v1958_v4 = vrot.slane %v5028_v26, %v4977_v36 }
0x164c   :  { %3831 = vmatpush3.bf16.msra.mxu0 %v4381_v49 }
0x164d   :  { %1928 = vadd.xlane.f32.xlu0 %v1925_v5  ;;  %3832 = vmatprep.subr.bf16.mxu0 %v4382_v59 }
0x1650   :  { %3833 = vmatpush3.bf16.msra.mxu0 %v4383_v46 }
0x1651   :  { %3834 = vmatprep.subr.bf16.mxu0 %v4384_v30 }
0x1654   :  { %3835 = vmatpush3.bf16.msra.mxu0 %v4385_v60 }
0x1655   :  { %3836 = vmatprep.subr.bf16.mxu0 %v4386_v61 }
0x1658   :  { %3837 = vmatpush3.bf16.msra.mxu0 %v4387_v28 }
0x16d8   :  { %v1927_v23 = vpop.xlane.xlu1 %1926 }
0x16d9   :  { %v1930_v31 = vmul.f32 0.0078125, %v1927_v23 }
0x16da   :  { %v1929_v32 = vpop.xlane.xlu0 %1928 }
0x16db   :  { %v1932_v29 = vadd.f32 1e-12, %v1930_v31  ;;  %v1931_v35 = vmul.f32 0.0078125, %v1929_v32 }
0x16dd   :  { %4538 = vrsqrt.f32 %v1932_v29  ;;  %v1933_v27 = vadd.f32 1e-12, %v1931_v35 }
0x16df   :  { %4540 = vrsqrt.f32 %v1933_v27 }
0x16e7   :  { %v4539_v38 = vpop.eup %4538 }
0x16e8   :  { %v1936_v40 = vmul.f32 %v4539_v38, %v1922_v63  ;;  %v4388_v63 = vld [vmem:[#allocation7 + $0xf8] sm:$0xff]  }
0x16e9   :  { %v4541_v41 = vpop.eup %4540  ;;  %3838 = vmatprep.subr.bf16.mxu0 %v4388_v63 }
0x16ea   :  { %v1937_v42 = vmul.f32 %v4541_v41, %v1923_v3  ;;  %v1942_v22 = vmul.f32 %v1941_v37, %v1936_v40  ;;  %3839 = vmatpush3.bf16.msra.mxu0 %v4389_v2  ;;  %v1954_v3 = vrot.slane %v5026_v24, %v4977_v36 }
0x16eb   :  { %4066 = vmatprep.subr.bf16.mxu0 %v4715_v39 }
0x16ec   :  { %v1943_v45 = vmul.f32 %v1941_v37, %v1937_v42  ;;  %v5094_v47 = vadd.f32 %v1947_v44, %v1942_v22 }
0x16ee   :  { %v5096_v50 = vadd.f32 %v1947_v44, %v1943_v45 }
0x16f0   :  { %v1950_v51 = vpack.c.bf16 %v5096_v50, %v5094_v47 }
0x16f2   :  { %2072 = vmatmul.mubr.bf16.vlgmr.msra.gmra.mrb[44].mxu1 %v1950_v51 }
0x16f3   :  { %2556 = vmatprep.mubr.bf16.mxu1 %v4713_v0 }
0x17c5   :  { %v2073_v5 = vpop.f32.mrb[44].mxu1 }
0x17c6   :  { %v2074_v6 = vadd.f32 %v2073_v5, %v1954_v3  ;;  %v2075_v7 = vpop.f32.mrb[45].mxu1  ;;  %v2156_v5 = vrot.slane %v5026_v24, %v4986_v34 }
0x17c7   :  { %v2076_v8 = vadd.f32 %v2075_v7, %v1958_v4  ;;  %v2077_v11 = vpop.f32.mrb[46].mxu1 }
0x17c8   :  { %v2082_v12 = vmul.f32 %v2074_v6, %v2074_v6  ;;  %v2078_v13 = vadd.f32 %v2077_v11, %v1954_v3  ;;  %v2079_v14 = vpop.f32.mrb[47].mxu1 }
0x17c9   :  { %v2083_v16 = vmul.f32 %v2076_v8, %v2076_v8  ;;  %v2080_v17 = vadd.f32 %v2079_v14, %v1958_v4 }
0x17ca   :  { %v2086_v18 = vmul.f32 %v2082_v12, %v2074_v6  ;;  %v2084_v48 = vmul.f32 %v2078_v13, %v2078_v13 }
0x17cb   :  { %v2087_v19 = vmul.f32 %v2083_v16, %v2076_v8  ;;  %v2085_v23 = vmul.f32 %v2080_v17, %v2080_v17 }
0x17cc   :  { %v2090_v31 = vmul.f32 0.044715, %v2086_v18  ;;  %v2088_v32 = vmul.f32 %v2084_v48, %v2078_v13  ;;  %v4390_v18 = vld [vmem:[#allocation6 + $0x300] ss:$24 sps:$4 sm:$0xff]   ;;  %v4392_v48 = vld [vmem:[#allocation6 + $0x304] ss:$24 sps:$4 sm:$0xff]  }
0x17cd   :  { %v2091_v29 = vmul.f32 0.044715, %v2087_v19  ;;  %v2089_v35 = vmul.f32 %v2085_v23, %v2080_v17  ;;  %v4393_v19 = vld [vmem:[#allocation6 + $0x308] ss:$24 sps:$4 sm:$0xff]   ;;  %v4397_v23 = vld [vmem:[#allocation6 + $0x334] ss:$24 sps:$4 sm:$0xff]   ;;  %2524 = vmatprep.subr.bf16.mxu1 %v4392_v48 }
0x17ce   :  { %v2094_v27 = vadd.f32 %v2090_v31, %v2074_v6  ;;  %v2092_v26 = vmul.f32 0.044715, %v2088_v32  ;;  %v4398_v31 = vld [vmem:[#allocation6 + $0x338] ss:$24 sps:$4 sm:$0xff]   ;;  %2525 = vmatpush1.bf16.msra.mxu1 %v4390_v18  ;;  %v5135_v18 = vld [vmem:[#allocation4 + $0x30] sm:$0xff] }
0x17cf   :  { %v2095_v37 = vadd.f32 %v2091_v29, %v2076_v8  ;;  %v2093_v38 = vmul.f32 0.044715, %v2089_v35  ;;  %v4395_v32 = vld [vmem:[#allocation6 + $0x330] ss:$24 sps:$4 sm:$0xff]   ;;  %2526 = vmatprep.subr.bf16.mxu1 %v4397_v23  ;;  %v2382_v48 = vld [vmem:[#allocation4 + $0x40] sm:$0xff] }
0x17d0   :  { %v2098_v40 = vmul.f32 0.7978846, %v2094_v27  ;;  %v2096_v41 = vadd.f32 %v2092_v26, %v2078_v13  ;;  %v2395_v23 = vrot.slane %v2382_v48, %v4879_v25 }
0x17d1   :  { %v2099_v42 = vmul.f32 0.7978846, %v2095_v37  ;;  %v2097_v22 = vadd.f32 %v2093_v38, %v2080_v17 }
0x17d2   :  { %4542 = vtanh.f32 %v2098_v40  ;;  %v2100_v44 = vmul.f32 0.7978846, %v2096_v41  ;;  %2527 = vmatpush1.bf16.msra.mxu1 %v4395_v32  ;;  %v4402_v40 = vld [vmem:[#allocation6 + $0x364] ss:$24 sps:$4 sm:$0xff]   ;;  %v4400_v41 = vld [vmem:[#allocation6 + $0x360] ss:$24 sps:$4 sm:$0xff]  }
0x17d3   :  { %4544 = vtanh.f32 %v2099_v42  ;;  %v2101_v45 = vmul.f32 0.7978846, %v2097_v22  ;;  %v4403_v42 = vld [vmem:[#allocation6 + $0x368] ss:$24 sps:$4 sm:$0xff]   ;;  %2528 = vmatprep.subr.bf16.mxu1 %v4402_v40  ;;  %v4407_v22 = vld [vmem:[#allocation6 + $0x394] ss:$24 sps:$4 sm:$0xff]  }
0x17d4   :  { %4546 = vtanh.f32 %v2100_v44  ;;  %v4405_v44 = vld [vmem:[#allocation6 + $0x390] ss:$24 sps:$4 sm:$0xff]  }
0x17d5   :  { %4548 = vtanh.f32 %v2101_v45  ;;  %v4408_v45 = vld [vmem:[#allocation6 + $0x398] ss:$24 sps:$4 sm:$0xff]  }
0x17d6   :  { %2529 = vmatpush1.bf16.msra.mxu1 %v4400_v41 }
0x17d7   :  { %2530 = vmatprep.subr.bf16.mxu1 %v4407_v22 }
0x17da   :  { %2531 = vmatpush1.bf16.msra.mxu1 %v4405_v44 }
0x17dc   :  { %v4543_v51 = vpop.eup %4542 }
0x17dd   :  { %v4545_v9 = vpop.eup %4544  ;;  %v2106_v52 = vadd.f32 1.0, %v4543_v51  ;;  %v4412_v51 = vld [vmem:[#allocation6 + $0x3c4] ss:$24 sps:$4 sm:$0xff]  }
0x17de   :  { %v4547_v10 = vpop.eup %4546  ;;  %v2107_v53 = vadd.f32 1.0, %v4545_v9  ;;  %v4410_v9 = vld [vmem:[#allocation6 + $0x3c0] ss:$24 sps:$4 sm:$0xff]   ;;  %2532 = vmatprep.subr.bf16.mxu1 %v4412_v51 }
0x17df   :  { %v4549_v55 = vpop.eup %4548  ;;  %v2110_v57 = vmul.f32 0.5, %v2106_v52  ;;  %v2108_v58 = vadd.f32 1.0, %v4547_v10  ;;  %v4413_v52 = vld [vmem:[#allocation6 + $0x3c8] ss:$24 sps:$4 sm:$0xff]   ;;  %2533 = vmatpush1.bf16.msra.mxu1 %v4410_v9  ;;  %v4417_v10 = vld [vmem:[#allocation6 + $0x3f4] ss:$24 sps:$4 sm:$0xff]  }
0x17e0   :  { %v2109_v49 = vadd.f32 1.0, %v4549_v55  ;;  %v2111_v59 = vmul.f32 0.5, %v2107_v53  ;;  %v4415_v53 = vld [vmem:[#allocation6 + $0x3f0] ss:$24 sps:$4 sm:$0xff]   ;;  %2534 = vmatprep.subr.bf16.mxu1 %v4417_v10 }
0x17e1   :  { %v2112_v46 = vmul.f32 0.5, %v2108_v58  ;;  %v2114_v60 = vmul.f32 %v2110_v57, %v2074_v6  ;;  %v4418_v55 = vld [vmem:[#allocation6 + $0x3f8] ss:$24 sps:$4 sm:$0xff]   ;;  %v4422_v57 = vld [vmem:[#allocation6 + $0x424] ss:$24 sps:$4 sm:$0xff]  }
0x17e2   :  { %v2113_v30 = vmul.f32 0.5, %v2109_v49  ;;  %v2115_v28 = vmul.f32 %v2111_v59, %v2076_v8  ;;  %v4420_v58 = vld [vmem:[#allocation6 + $0x420] ss:$24 sps:$4 sm:$0xff]   ;;  %v4427_v59 = vld [vmem:[#allocation6 + $0x454] ss:$24 sps:$4 sm:$0xff]  }
0x17e3   :  { %v2116_v61 = vmul.f32 %v2112_v46, %v2078_v13  ;;  %2535 = vmatpush1.bf16.msra.mxu1 %v4415_v53  ;;  %v4423_v49 = vld [vmem:[#allocation6 + $0x428] ss:$24 sps:$4 sm:$0xff]  }
0x17e4   :  { %v2117_v63 = vmul.f32 %v2113_v30, %v2080_v17  ;;  %2536 = vmatprep.subr.bf16.mxu1 %v4422_v57  ;;  %v4425_v46 = vld [vmem:[#allocation6 + $0x450] ss:$24 sps:$4 sm:$0xff]  }
0x17e5   :  { %v2118_v2 = vpack.c.bf16 %v2116_v61, %v2114_v60  ;;  %v4428_v30 = vld [vmem:[#allocation6 + $0x458] ss:$24 sps:$4 sm:$0xff]  }
0x17e6   :  { %v2119_v3 = vpack.c.bf16 %v2117_v63, %v2115_v28 }
0x17e7   :  { %2537 = vmatpush1.bf16.msra.mxu1 %v4420_v58 }
0x17e8   :  { %2285 = vmatprep.mubr.bf16.mxu0 %v2119_v3  ;;  %2538 = vmatprep.subr.bf16.mxu1 %v4427_v59 }
0x17e9   :  { %2286 = vmatmul.mubr.bf16.vlgmr.msra.gmra.mrb[24].mxu0 %v2118_v2 }
0x17ea   :  { %4082 = vmatprep.mubr.msk.bf16.mxu0 %vm4716_vm2, %v4715_v39  ;;  %4067 = vmatpush3.bf16.msra.mxu0 %v4393_v19  ;;  %v2387_v19 = vrot.slane %v5135_v18, %v4879_v25 }
0x17eb   :  { %4068 = vmatprep.subr.bf16.mxu0 %v4715_v39  ;;  %2539 = vmatpush1.bf16.msra.mxu1 %v4425_v46 }
0x17ec   :  { %4086 = vmatprep.subr.bf16.mxu1 %v4715_v39 }
0x17ee   :  { %4069 = vmatpush3.bf16.msra.mxu0 %v4398_v31 }
0x17ef   :  { %4070 = vmatprep.subr.bf16.mxu0 %v4715_v39 }
0x17f2   :  { %4071 = vmatpush3.bf16.msra.mxu0 %v4403_v42 }
0x17f3   :  { %4072 = vmatprep.subr.bf16.mxu0 %v4715_v39 }
0x17f6   :  { %4073 = vmatpush3.bf16.msra.mxu0 %v4408_v45 }
0x17f7   :  { %4074 = vmatprep.subr.bf16.mxu0 %v4715_v39 }
0x17fa   :  { %4075 = vmatpush3.bf16.msra.mxu0 %v4413_v52 }
0x17fb   :  { %4076 = vmatprep.subr.bf16.mxu0 %v4715_v39 }
0x17fe   :  { %4077 = vmatpush3.bf16.msra.mxu0 %v4418_v55 }
0x17ff   :  { %4078 = vmatprep.subr.bf16.mxu0 %v4715_v39 }
0x1802   :  { %4079 = vmatpush3.bf16.msra.mxu0 %v4423_v49 }
0x1803   :  { %4080 = vmatprep.subr.bf16.mxu0 %v4715_v39 }
0x1806   :  { %4081 = vmatpush3.bf16.msra.mxu0 %v4428_v30 }
0x1807   :  { %4110 = vmatprep.subr.bf16.mxu0 %v4715_v39 }
0x18bc   :  { %v3840_v4 = vpop.f32.mrb[24].mxu0 }
0x18bd   :  { %v3841_v7 = vpop.f32.mrb[25].mxu0 }
0x18be   :  { %v3842_v11 = vadd.f32 %v3841_v7, %v3840_v4  ;;  %v3843_v12 = vpop.f32.mrb[26].mxu0  ;;  %v2321_v4 = vrot.slane %v5026_v24, %v5006_v33 }
0x18bf   :  { %v3844_v14 = vpop.f32.mrb[27].mxu0 }
0x18c0   :  { %v2288_v16 = vadd.f32 %v3842_v11, %v2156_v5  ;;  %v3845_v6 = vadd.f32 %v3844_v14, %v3843_v12 }
0x18c2   :  { %v2291_v13 = vadd.f32 %v3845_v6, %v2156_v5  ;;  %v2294_v8 = vadd.f32 %v2288_v16, %v5094_v47  ;;  %v2327_v16 = vrot.slane %v5026_v24, %v5011_v20  ;;  %v5137_v24 = vld [vmem:[#allocation4 + $0x38] sm:$0xff] }
0x18c4   :  { %2296 = vadd.xlane.f32.xlu1 %v2294_v8  ;;  %v2295_v17 = vadd.f32 %v2291_v13, %v5096_v50 }
0x18c6   :  { %2298 = vadd.xlane.f32.xlu0 %v2295_v17 }
0x1951   :  { %v2297_v47 = vpop.xlane.xlu1 %2296 }
0x1952   :  { %v2300_v29 = vmul.f32 0.0078125, %v2297_v47  ;;  %v2391_v47 = vrot.slane %v5137_v24, %v4879_v25 }
0x1953   :  { %v2299_v50 = vpop.xlane.xlu0 %2298 }
0x1954   :  { %v2302_v35 = vsub.f32 %v2294_v8, %v2300_v29  ;;  %v2301_v27 = vmul.f32 0.0078125, %v2299_v50 }
0x1956   :  { %v2303_v26 = vsub.f32 %v2295_v17, %v2301_v27  ;;  %v2304_v37 = vmul.f32 %v2302_v35, %v2302_v35 }
0x1958   :  { %2306 = vadd.xlane.f32.xlu1 %v2304_v37  ;;  %v2305_v38 = vmul.f32 %v2303_v26, %v2303_v26 }
0x195a   :  { %2308 = vadd.xlane.f32.xlu0 %v2305_v38 }
0x19e5   :  { %v2307_v60 = vpop.xlane.xlu1 %2306 }
0x19e6   :  { %v2310_v61 = vmul.f32 0.0078125, %v2307_v60 }
0x19e7   :  { %v2309_v28 = vpop.xlane.xlu0 %2308 }
0x19e8   :  { %v2312_v63 = vadd.f32 1e-12, %v2310_v61  ;;  %v2311_v2 = vmul.f32 0.0078125, %v2309_v28 }
0x19ea   :  { %4550 = vrsqrt.f32 %v2312_v63  ;;  %v2313_v3 = vadd.f32 1e-12, %v2311_v2 }
0x19ec   :  { %4552 = vrsqrt.f32 %v2313_v3 }
0x19f4   :  { %v4551_v5 = vpop.eup %4550 }
0x19f5   :  { %v2316_v7 = vmul.f32 %v4551_v5, %v2302_v35 }
0x19f6   :  { %v4553_v11 = vpop.eup %4552 }
0x19f7   :  { %v2317_v12 = vmul.f32 %v4553_v11, %v2303_v26  ;;  %v2322_v14 = vmul.f32 %v2321_v4, %v2316_v7 }
0x19f9   :  { %v2323_v6 = vmul.f32 %v2321_v4, %v2317_v12  ;;  %v5125_v13 = vadd.f32 %v2327_v16, %v2322_v14 }
0x19fb   :  { %v5127_v8 = vadd.f32 %v2327_v16, %v2323_v6 }
0x19fd   :  { %v2383_v17 = vpack.c.bf16 %v5127_v8, %v5125_v13 }
0x19ff   :  { %2557 = vmatmul.mubr.bf16.vlgmr.msra.gmra.mrb[48].mxu1 %v2383_v17  ;;  %4083 = vmatmul.mubr.bf16.vlgmr.msra.gmra.mrb[28].mxu0 %v2383_v17 }
0x1a00   :  { %4088 = vmatprep.mubr.msk.bf16.mxu1 %vm4716_vm2, %v4715_v39  ;;  %4126 = vmatprep.mubr.msk.bf16.mxu0 %vm4716_vm2, %v4715_v39 }
0x1ad2   :  { %v2558_v31 = vpop.f32.mrb[48].mxu1  ;;  %v2601_v32 = vpop.f32.mrb[28].mxu0 }
0x1ad3   :  { %v2560_v29 = vpop.f32.mrb[49].mxu1  ;;  %v4084_v50 = vpop.f32.mrb[29].mxu0  ;;  %v2559_v26 = vadd.f32 %v2558_v31, %v2387_v19  ;;  %v2602_v37 = vadd.f32 %v2601_v32, %v2395_v23 }
0x1ad4   :  { %v2562_v35 = vpop.f32.mrb[50].mxu1  ;;  %v2604_v27 = vpop.f32.mrb[30].mxu0  ;;  %v2561_v22 = vadd.f32 %v2560_v29, %v2391_v47 }
0x1ad5   :  { %v2563_v38 = vadd.f32 %v2562_v35, %v2387_v19  ;;  %v2605_v40 = vadd.f32 %v2604_v27, %v2395_v23  ;;  %v2564_v41 = vpop.f32.mrb[51].mxu1  ;;  %v4085_v42 = vpop.f32.mrb[31].mxu0 }
0x1ad6   :  { %v2565_v44 = vadd.f32 %v2564_v41, %v2391_v47 }
0x1ad7   :  { %v2608_v45 = vpack.c.bf16 %v2563_v38, %v2559_v26  ;;  %v5144_v51 = vpack.c.bf16 %v2605_v40, %v2602_v37 }
0x1ad8   :  { %v2609_v9 = vpack.c.bf16 %v2565_v44, %v2561_v22 }
0x1ada   :  { %v2615_v52 = vsel %vm564_vm3, %v2609_v9, 0 }
0x1adb   :  { %4087 = vmatpush3.bf16.xpose.msra.mxu1 %v2615_v52 }
0x1adc   :  { %4092 = vmatprep.subr.bf16.mxu1 %v4715_v39 }
0x1ae2   :  { %4089 = vmatmul.mubr.msk.bf16.vlgmr.msra.gmra.mrb[52].mxu1 %vm564_vm3, %v2608_v45 }
0x1ae3   :  { %4093 = vmatpush3.bf16.msra.mxu1 %v5144_v51  ;;  %4094 = vmatprep.mubr.msk.bf16.mxu1 %vm4716_vm2, %v4715_v39 }
0x1ae4   :  { %4098 = vmatprep.subr.bf16.mxu1 %v4715_v39 }
0x1bb5   :  { %v2651_v25 = vpop.f32.mrb[52].mxu1 }
0x1bb6   :  { %v2652_v10 = vadd.f32 %v2651_v25, %v4906_v54  ;;  %v4090_v53 = vpop.f32.mrb[53].mxu1 }
0x1bb7   :  { %v2654_v55 = vpop.f32.mrb[54].mxu1 }
0x1bb8   :  { %v2655_v57 = vadd.f32 %v2654_v55, %v4908_v56  ;;  %v4091_v58 = vpop.f32.mrb[55].mxu1  ;;  %v2658_v49 = vsel %vm612_vm11, %v2652_v10, -inf }
0x1bb9   :  { %2659 = vmax.xlane.f32.xlu1 %v2658_v49 }
0x1bba   :  { %v2661_v59 = vsel %vm612_vm11, %v2655_v57, -inf }
0x1bbb   :  { %2662 = vmax.xlane.f32.xlu0 %v2661_v59 }
0x1c46   :  { %v2660_v46 = vpop.xlane.xlu1 %2659 }
0x1c47   :  { %v2664_v30 = vsub.f32 %v2652_v10, %v2660_v46 }
0x1c48   :  { %v2663_v60 = vpop.xlane.xlu0 %2662 }
0x1c49   :  { %v2666_v61 = vmul.f32 1.442695, %v2664_v30  ;;  %v2665_v28 = vsub.f32 %v2655_v57, %v2663_v60  ;;  %v4430_v60 = vld [vmem:[#allocation6 + $0x30c] ss:$24 sps:$4 sm:$0xff]  }
0x1c4a   :  { %4111 = vmatpush3.bf16.msra.mxu0 %v4430_v60 }
0x1c4b   :  { %4554 = vpow2.f32 %v2666_v61  ;;  %v2668_v63 = vmul.f32 1.442695, %v2665_v28  ;;  %v4431_v61 = vld [vmem:[#allocation6 + $0x33c] ss:$24 sps:$4 sm:$0xff]   ;;  %4112 = vmatprep.subr.bf16.mxu0 %v4715_v39 }
0x1c4c   :  { %v4433_v28 = vld [vmem:[#allocation6 + $0x39c] ss:$24 sps:$4 sm:$0xff]  }
0x1c4d   :  { %4556 = vpow2.f32 %v2668_v63  ;;  %v4434_v63 = vld [vmem:[#allocation6 + $0x3cc] ss:$24 sps:$4 sm:$0xff]  }
0x1c4e   :  { %4113 = vmatpush3.bf16.msra.mxu0 %v4431_v61 }
0x1c4f   :  { %4114 = vmatprep.subr.bf16.mxu0 %v4715_v39 }
0x1c55   :  { %v4555_v2 = vpop.eup %4554 }
0x1c56   :  { %v2670_v3 = vsel %vm612_vm11, %v4555_v2, 0.0 }
0x1c57   :  { %v4557_v4 = vpop.eup %4556  ;;  %2671 = vadd.xlane.f32.xlu1 %v2670_v3  ;;  %v4437_v3 = vld [vmem:[#allocation6 + $0x45c] ss:$24 sps:$4 sm:$0xff]  }
0x1c58   :  { %v2673_v5 = vsel %vm612_vm11, %v4557_v4, 0.0 }
0x1c59   :  { %2674 = vadd.xlane.f32.xlu0 %v2673_v5 }
0x1c68   :  { %2729 = vrot.lane.b32.xlu1 %v2609_v9, %s4706_s3 }
0x1c6f   :  { %2726 = vrot.lane.b32.xlu0 %v2608_v45, %s4706_s3 }
0x1ce4   :  { %v2672_v7 = vpop.xlane.xlu1 %2671 }
0x1ce5   :  { %4558 = vrcp.f32 %v2672_v7 }
0x1ce6   :  { %v2675_v11 = vpop.xlane.xlu0 %2674 }
0x1ce7   :  { %4560 = vrcp.f32 %v2675_v11 }
0x1ce8   :  { %v2730_v17 = vpop.permute.xlu1 %2729 }
0x1ce9   :  { %v2735_v19 = vsel %vm564_vm3, %v2730_v17, 0 }
0x1cea   :  { %v2727_v23 = vpop.permute.xlu0 %2726 }
0x1cef   :  { %v4559_v12 = vpop.eup %4558 }
0x1cf0   :  { %v2678_v16 = vmul.f32 %v4559_v12, %v4555_v2  ;;  %v4435_v2 = vld [vmem:[#allocation6 + $0x3fc] ss:$24 sps:$4 sm:$0xff]  }
0x1cf1   :  { %v4561_v14 = vpop.eup %4560 }
0x1cf2   :  { %v2679_v6 = vmul.f32 %v4561_v14, %v4557_v4 }
0x1cf4   :  { %v2680_v48 = vpack.c.bf16 %v2679_v6, %v2678_v16 }
0x1cf6   :  { %4095 = vmatmul.mubr.msk.bf16.vlgmr.msra.gmra.mrb[56].mxu1 %vm612_vm11, %v2680_v48 }
0x1cf7   :  { %4099 = vmatpush3.bf16.xpose.msra.mxu1 %v2735_v19  ;;  %4100 = vmatprep.mubr.msk.bf16.mxu1 %vm4716_vm2, %v4715_v39 }
0x1cf8   :  { %4104 = vmatprep.subr.bf16.mxu1 %v4715_v39 }
0x1cfe   :  { %4101 = vmatmul.mubr.msk.bf16.vlgmr.msra.gmra.mrb[60].mxu1 %vm564_vm3, %v2727_v23  ;;  %v2863_v23 = vrot.slane %v5135_v18, %v4952_v15 }
0x1cff   :  { %4106 = vmatprep.mubr.msk.bf16.mxu1 %vm4716_vm2, %v4715_v39 }
0x1dc9   :  { %v5169_v31 = vpop.f32.mrb[56].mxu1 }
0x1dca   :  { %v4096_v32 = vpop.f32.mrb[57].mxu1 }
0x1dcb   :  { %v5171_v47 = vpop.f32.mrb[58].mxu1 }
0x1dcc   :  { %v4097_v29 = vpop.f32.mrb[59].mxu1 }
0x1dd1   :  { %v2771_v50 = vpop.f32.mrb[60].mxu1 }
0x1dd2   :  { %v2772_v35 = vadd.f32 %v2771_v50, %v4906_v54  ;;  %v4102_v27 = vpop.f32.mrb[61].mxu1 }
0x1dd3   :  { %v2774_v26 = vpop.f32.mrb[62].mxu1 }
0x1dd4   :  { %v2775_v37 = vadd.f32 %v2774_v26, %v4908_v56  ;;  %v4103_v38 = vpop.f32.mrb[63].mxu1  ;;  %v2778_v40 = vsel %vm612_vm11, %v2772_v35, -inf }
0x1dd5   :  { %2779 = vmax.xlane.f32.xlu1 %v2778_v40  ;;  %v4440_v40 = vld [vmem:[#allocation6 + $0x314] ss:$24 sps:$4 sm:$0xff]  }
0x1dd6   :  { %v2781_v41 = vsel %vm612_vm11, %v2775_v37, -inf }
0x1dd7   :  { %2782 = vmax.xlane.f32.xlu0 %v2781_v41  ;;  %v4441_v41 = vld [vmem:[#allocation6 + $0x340] ss:$24 sps:$4 sm:$0xff]  }
0x1e62   :  { %v2780_v42 = vpop.xlane.xlu1 %2779 }
0x1e63   :  { %v2784_v22 = vsub.f32 %v2772_v35, %v2780_v42 }
0x1e64   :  { %v2783_v44 = vpop.xlane.xlu0 %2782 }
0x1e65   :  { %v2786_v45 = vmul.f32 1.442695, %v2784_v22  ;;  %v2785_v9 = vsub.f32 %v2775_v37, %v2783_v44 }
0x1e67   :  { %4562 = vpow2.f32 %v2786_v45  ;;  %v2788_v52 = vmul.f32 1.442695, %v2785_v9 }
0x1e69   :  { %4564 = vpow2.f32 %v2788_v52 }
0x1e71   :  { %v4563_v54 = vpop.eup %4562 }
0x1e72   :  { %v2790_v25 = vsel %vm612_vm11, %v4563_v54, 0.0 }
0x1e73   :  { %v4565_v10 = vpop.eup %4564  ;;  %2791 = vadd.xlane.f32.xlu1 %v2790_v25  ;;  %v4449_v25 = vld [vmem:[#allocation6 + $0x3a4] ss:$24 sps:$4 sm:$0xff]  }
0x1e74   :  { %v2793_v56 = vsel %vm612_vm11, %v4565_v10, 0.0 }
0x1e75   :  { %2794 = vadd.xlane.f32.xlu0 %v2793_v56  ;;  %v4452_v56 = vld [vmem:[#allocation6 + $0x3d4] ss:$24 sps:$4 sm:$0xff]  }
0x1e84   :  { %2802 = vrot.lane.b32.xlu1 %v5144_v51, %s4706_s3  ;;  %v4432_v51 = vld [vmem:[#allocation6 + $0x36c] ss:$24 sps:$4 sm:$0xff]  }
0x1e85   :  { %4115 = vmatpush3.bf16.msra.mxu0 %v4432_v51 }
0x1e86   :  { %4116 = vmatprep.subr.bf16.mxu0 %v4715_v39 }
0x1e89   :  { %4117 = vmatpush3.bf16.msra.mxu0 %v4433_v28 }
0x1e8a   :  { %4118 = vmatprep.subr.bf16.mxu0 %v4715_v39 }
0x1e8d   :  { %4119 = vmatpush3.bf16.msra.mxu0 %v4434_v63 }
0x1e8e   :  { %4120 = vmatprep.subr.bf16.mxu0 %v4715_v39 }
0x1e91   :  { %4121 = vmatpush3.bf16.msra.mxu0 %v4435_v2  ;;  %v2964_v2 = vrot.slane %v5135_v18, %v4959_v62  ;;  %v4462_v62 = vld [vmem:[#allocation7 + $0x140] sm:$0xff]  }
0x1e92   :  { %4122 = vmatprep.subr.bf16.mxu0 %v4715_v39 }
0x1f00   :  { %v2792_v53 = vpop.xlane.xlu1 %2791 }
0x1f01   :  { %4566 = vrcp.f32 %v2792_v53  ;;  %v4450_v53 = vld [vmem:[#allocation6 + $0x3d0] ss:$24 sps:$4 sm:$0xff]  }
0x1f02   :  { %v2795_v55 = vpop.xlane.xlu0 %2794 }
0x1f03   :  { %4568 = vrcp.f32 %v2795_v55  ;;  %v4455_v55 = vld [vmem:[#allocation6 + $0x404] ss:$24 sps:$4 sm:$0xff]  }
0x1f04   :  { %v2803_v57 = vpop.permute.xlu1 %2802 }
0x1f05   :  { %4105 = vmatpush3.bf16.msra.mxu1 %v2803_v57  ;;  %v4453_v57 = vld [vmem:[#allocation6 + $0x400] ss:$24 sps:$4 sm:$0xff]  }
0x1f06   :  { %3062 = vmatprep.subr.bf16.mxu1 %v4440_v40  ;;  %v4477_v40 = vld [vmem:[#allocation7 + $0x138] sm:$0xff]  }
0x1f0b   :  { %v4567_v58 = vpop.eup %4566 }
0x1f0c   :  { %v2798_v59 = vmul.f32 %v4567_v58, %v4563_v54  ;;  %v4444_v54 = vld [vmem:[#allocation6 + $0x370] ss:$24 sps:$4 sm:$0xff]   ;;  %v4458_v58 = vld [vmem:[#allocation6 + $0x434] ss:$24 sps:$4 sm:$0xff]  }
0x1f0d   :  { %v4569_v49 = vpop.eup %4568 }
0x1f0e   :  { %v2799_v46 = vmul.f32 %v4569_v49, %v4565_v10  ;;  %v4447_v10 = vld [vmem:[#allocation6 + $0x3a0] ss:$24 sps:$4 sm:$0xff]   ;;  %v4456_v49 = vld [vmem:[#allocation6 + $0x430] ss:$24 sps:$4 sm:$0xff]  }
0x1f10   :  { %v2800_v30 = vpack.c.bf16 %v2799_v46, %v2798_v59  ;;  %v4461_v59 = vld [vmem:[#allocation6 + $0x464] ss:$24 sps:$4 sm:$0xff]   ;;  %v4459_v46 = vld [vmem:[#allocation6 + $0x460] ss:$24 sps:$4 sm:$0xff]  }
0x1f12   :  { %4107 = vmatmul.mubr.msk.bf16.vlgmr.msra.gmra.mrb[64].mxu1 %vm612_vm11, %v2800_v30 }
0x1f13   :  { %3094 = vmatprep.mubr.bf16.mxu1 %v4713_v0  ;;  %v4436_v0 = vld [vmem:[#allocation6 + $0x42c] ss:$24 sps:$4 sm:$0xff]  }
0x1f14   :  { %4123 = vmatpush3.bf16.msra.mxu0 %v4436_v0 }
0x1f15   :  { %4124 = vmatprep.subr.bf16.mxu0 %v4715_v39 }
0x1f18   :  { %4125 = vmatpush3.bf16.msra.mxu0 %v4437_v3 }
0x1f19   :  { %3872 = vmatprep.subr.bf16.mxu0 %v4462_v62 }
0x1fe5   :  { %v2842_v4 = vpop.f32.mrb[64].mxu1 }
0x1fe6   :  { %v4108_v5 = vpop.f32.mrb[65].mxu1 }
0x1fe7   :  { %v2845_v7 = vpop.f32.mrb[66].mxu1 }
0x1fe8   :  { %v4209_v11 = vpack.i.bf16 %v2845_v7, %v2842_v4  ;;  %v4109_v12 = vpop.f32.mrb[67].mxu1 }
0x1fea   :  { %4210 = vrot.lane.b32.xlu0 %v4209_v11, %s4706_s3  ;;  %v2970_v11 = vrot.slane %v5135_v18, %v4964_v1  ;;  %v4466_v1 = vld [vmem:[#allocation7 + $0x150] sm:$0xff]  }
0x205c   :  { %v4211_v14 = vpop.permute.xlu0 %4210 }
0x205d   :  { %v4213_v16 = vunpack.i.h.bf16 %v4211_v14  ;;  %v4212_v6 = vunpack.i.l.bf16 %v4211_v14 }
0x205f   :  { %v2858_v17 = vsel %vm564_vm3, %v5171_v47, %v4213_v16  ;;  %v2857_v48 = vsel %vm564_vm3, %v5169_v31, %v4212_v6  ;;  %v4438_v47 = vld [vmem:[#allocation6 + $0x310] ss:$24 sps:$4 sm:$0xff]   ;;  %v4443_v31 = vld [vmem:[#allocation6 + $0x344] ss:$24 sps:$4 sm:$0xff]  }
0x2060   :  { %v2859_v19 = vpack.c.bf16 %v2858_v17, %v2857_v48  ;;  %3063 = vmatpush1.bf16.msra.mxu1 %v4438_v47  ;;  %v4463_v17 = vld [vmem:[#allocation7 + $0x100] sm:$0xff]   ;;  %v4464_v48 = vld [vmem:[#allocation7 + $0x148] sm:$0xff]   ;;  %v4476_v47 = vld [vmem:[#allocation7 + $0x178] sm:$0xff]  }
0x2061   :  { %3064 = vmatprep.subr.bf16.mxu1 %v4443_v31  ;;  %v2977_v31 = vrot.slane %v5135_v18, %v4977_v36 }
0x2062   :  { %4127 = vmatmul.mubr.bf16.vlgmr.msra.gmra.mrb[32].mxu0 %v2859_v19  ;;  %v4465_v19 = vld [vmem:[#allocation7 + $0x108] sm:$0xff]  }
0x2063   :  { %3873 = vmatpush3.bf16.msra.mxu0 %v4463_v17 }
0x2064   :  { %3065 = vmatpush1.bf16.msra.mxu1 %v4441_v41  ;;  %3874 = vmatprep.subr.bf16.mxu0 %v4464_v48  ;;  %v2981_v41 = vrot.slane %v5137_v24, %v4977_v36 }
0x2067   :  { %3875 = vmatpush3.bf16.msra.mxu0 %v4465_v19 }
0x2068   :  { %3876 = vmatprep.subr.bf16.mxu0 %v4466_v1 }
0x2135   :  { %v2930_v32 = vpop.f32.mrb[32].mxu0 }
0x2136   :  { %v2931_v29 = vadd.f32 %v2930_v32, %v2863_v23  ;;  %v4128_v50 = vpop.f32.mrb[33].mxu0  ;;  %v4468_v32 = vld [vmem:[#allocation7 + $0x158] sm:$0xff]  }
0x2137   :  { %v2933_v35 = vpop.f32.mrb[34].mxu0  ;;  %v4470_v50 = vld [vmem:[#allocation7 + $0x160] sm:$0xff]  }
0x2138   :  { %v2934_v27 = vadd.f32 %v2933_v35, %v2863_v23  ;;  %v4129_v26 = vpop.f32.mrb[35].mxu0  ;;  %v2937_v37 = vadd.f32 %v2931_v29, %v5125_v13  ;;  %v4467_v23 = vld [vmem:[#allocation7 + $0x110] sm:$0xff]   ;;  %v4469_v29 = vld [vmem:[#allocation7 + $0x118] sm:$0xff]   ;;  %v4471_v35 = vld [vmem:[#allocation7 + $0x120] sm:$0xff]  }
0x2139   :  { %3877 = vmatpush3.bf16.msra.mxu0 %v4467_v23  ;;  %v4473_v26 = vld [vmem:[#allocation7 + $0x128] sm:$0xff]  }
0x213a   :  { %2939 = vadd.xlane.f32.xlu1 %v2937_v37  ;;  %v2938_v38 = vadd.f32 %v2934_v27, %v5127_v8  ;;  %v4446_v8 = vld [vmem:[#allocation6 + $0x374] ss:$24 sps:$4 sm:$0xff]   ;;  %3878 = vmatprep.subr.bf16.mxu0 %v4468_v32 }
0x213b   :  { %3066 = vmatprep.subr.bf16.mxu1 %v4446_v8  ;;  %v4472_v27 = vld [vmem:[#allocation7 + $0x168] sm:$0xff]  }
0x213c   :  { %2941 = vadd.xlane.f32.xlu0 %v2938_v38  ;;  %3067 = vmatpush1.bf16.msra.mxu1 %v4444_v54 }
0x213d   :  { %3068 = vmatprep.subr.bf16.mxu1 %v4449_v25  ;;  %3879 = vmatpush3.bf16.msra.mxu0 %v4469_v29 }
0x213e   :  { %3880 = vmatprep.subr.bf16.mxu0 %v4470_v50 }
0x2140   :  { %3069 = vmatpush1.bf16.msra.mxu1 %v4447_v10 }
0x2141   :  { %3070 = vmatprep.subr.bf16.mxu1 %v4452_v56  ;;  %3881 = vmatpush3.bf16.msra.mxu0 %v4471_v35 }
0x2142   :  { %3882 = vmatprep.subr.bf16.mxu0 %v4472_v27  ;;  %v3179_v27 = vrot.slane %v5135_v18, %v4986_v34 }
0x2144   :  { %3071 = vmatpush1.bf16.msra.mxu1 %v4450_v53 }
0x2145   :  { %3072 = vmatprep.subr.bf16.mxu1 %v4455_v55  ;;  %3883 = vmatpush3.bf16.msra.mxu0 %v4473_v26 }
0x2148   :  { %3073 = vmatpush1.bf16.msra.mxu1 %v4453_v57 }
0x2149   :  { %3074 = vmatprep.subr.bf16.mxu1 %v4458_v58 }
0x214c   :  { %3075 = vmatpush1.bf16.msra.mxu1 %v4456_v49 }
0x214d   :  { %3076 = vmatprep.subr.bf16.mxu1 %v4461_v59 }
0x2150   :  { %3077 = vmatpush1.bf16.msra.mxu1 %v4459_v46 }
0x2151   :  { %4130 = vmatprep.subr.bf16.mxu1 %v4715_v39 }
0x21c7   :  { %v2940_v15 = vpop.xlane.xlu1 %2939 }
0x21c8   :  { %v2943_v42 = vmul.f32 0.0078125, %v2940_v15 }
0x21c9   :  { %v2942_v22 = vpop.xlane.xlu0 %2941 }
0x21ca   :  { %v2945_v44 = vsub.f32 %v2937_v37, %v2943_v42  ;;  %v2944_v45 = vmul.f32 0.0078125, %v2942_v22  ;;  %v4474_v37 = vld [vmem:[#allocation7 + $0x170] sm:$0xff]  }
0x21cb   :  { %3884 = vmatprep.subr.bf16.mxu0 %v4474_v37 }
0x21cc   :  { %v2946_v9 = vsub.f32 %v2938_v38, %v2944_v45  ;;  %v2947_v52 = vmul.f32 %v2945_v44, %v2945_v44  ;;  %v4475_v38 = vld [vmem:[#allocation7 + $0x130] sm:$0xff]  }
0x21cd   :  { %3885 = vmatpush3.bf16.msra.mxu0 %v4475_v38 }
0x21ce   :  { %2949 = vadd.xlane.f32.xlu1 %v2947_v52  ;;  %v2948_v13 = vmul.f32 %v2946_v9, %v2946_v9  ;;  %3886 = vmatprep.subr.bf16.mxu0 %v4476_v47 }
0x21d0   :  { %2951 = vadd.xlane.f32.xlu0 %v2948_v13 }
0x21d1   :  { %3887 = vmatpush3.bf16.msra.mxu0 %v4477_v40 }
0x225b   :  { %v2950_v30 = vpop.xlane.xlu1 %2949 }
0x225c   :  { %v2953_v60 = vmul.f32 0.0078125, %v2950_v30 }
0x225d   :  { %v2952_v61 = vpop.xlane.xlu0 %2951 }
0x225e   :  { %v2955_v51 = vadd.f32 1e-12, %v2953_v60  ;;  %v2954_v28 = vmul.f32 0.0078125, %v2952_v61 }
0x2260   :  { %4570 = vrsqrt.f32 %v2955_v51  ;;  %v2956_v63 = vadd.f32 1e-12, %v2954_v28 }
0x2262   :  { %4572 = vrsqrt.f32 %v2956_v63 }
0x226a   :  { %v4571_v0 = vpop.eup %4570 }
0x226b   :  { %v2959_v3 = vmul.f32 %v4571_v0, %v2945_v44 }
0x226c   :  { %v4573_v4 = vpop.eup %4572 }
0x226d   :  { %v2960_v5 = vmul.f32 %v4573_v4, %v2946_v9  ;;  %v2965_v7 = vmul.f32 %v2964_v2, %v2959_v3 }
0x226f   :  { %v2966_v12 = vmul.f32 %v2964_v2, %v2960_v5  ;;  %v5204_v14 = vadd.f32 %v2970_v11, %v2965_v7 }
0x2271   :  { %v5206_v16 = vadd.f32 %v2970_v11, %v2966_v12 }
0x2273   :  { %v2973_v6 = vpack.c.bf16 %v5206_v16, %v5204_v14 }
0x2275   :  { %3095 = vmatmul.mubr.bf16.vlgmr.msra.gmra.mrb[68].mxu1 %v2973_v6 }
0x2276   :  { %4146 = vmatprep.mubr.msk.bf16.mxu1 %vm4716_vm2, %v4715_v39 }
0x2348   :  { %v3096_v15 = vpop.f32.mrb[68].mxu1 }
0x2349   :  { %v3097_v42 = vadd.f32 %v3096_v15, %v2977_v31  ;;  %v3098_v22 = vpop.f32.mrb[69].mxu1 }
0x234a   :  { %v3099_v44 = vadd.f32 %v3098_v22, %v2981_v41  ;;  %v3100_v45 = vpop.f32.mrb[70].mxu1 }
0x234b   :  { %v3105_v9 = vmul.f32 %v3097_v42, %v3097_v42  ;;  %v3101_v52 = vadd.f32 %v3100_v45, %v2977_v31  ;;  %v3102_v13 = vpop.f32.mrb[71].mxu1 }
0x234c   :  { %v3106_v8 = vmul.f32 %v3099_v44, %v3099_v44  ;;  %v3103_v54 = vadd.f32 %v3102_v13, %v2981_v41 }
0x234d   :  { %v3109_v25 = vmul.f32 %v3105_v9, %v3097_v42  ;;  %v3107_v10 = vmul.f32 %v3101_v52, %v3101_v52 }
0x234e   :  { %v3110_v56 = vmul.f32 %v3106_v8, %v3099_v44  ;;  %v3108_v53 = vmul.f32 %v3103_v54, %v3103_v54 }
0x234f   :  { %v3113_v55 = vmul.f32 0.044715, %v3109_v25  ;;  %v3111_v57 = vmul.f32 %v3107_v10, %v3101_v52  ;;  %v4479_v25 = vld [vmem:[#allocation9 + $0x8] sm:$0xff]   ;;  %v4482_v10 = vld [vmem:[#allocation9 + $0x20] sm:$0xff]  }
0x2350   :  { %v3114_v58 = vmul.f32 0.044715, %v3110_v56  ;;  %v3112_v49 = vmul.f32 %v3108_v53, %v3103_v54  ;;  %v4483_v56 = vld [vmem:[#allocation9 + $0x28] sm:$0xff]   ;;  %v4484_v53 = vld [vmem:[#allocation9 + $0x30] sm:$0xff]  }
0x2351   :  { %v3117_v59 = vadd.f32 %v3113_v55, %v3097_v42  ;;  %v3115_v36 = vmul.f32 0.044715, %v3111_v57  ;;  %v4485_v55 = vld [vmem:[#allocation9 + $0x38] sm:$0xff]  }
0x2352   :  { %v3118_v24 = vadd.f32 %v3114_v58, %v3099_v44  ;;  %v3116_v46 = vmul.f32 0.044715, %v3112_v49 }
0x2353   :  { %v3121_v30 = vmul.f32 0.7978846, %v3117_v59  ;;  %v3119_v60 = vadd.f32 %v3115_v36, %v3101_v52 }
0x2354   :  { %v3122_v61 = vmul.f32 0.7978846, %v3118_v24  ;;  %v3120_v51 = vadd.f32 %v3116_v46, %v3103_v54  ;;  %v3376_v46 = vrot.slane %v5018_v21, 4 }
0x2355   :  { %4574 = vtanh.f32 %v3121_v30  ;;  %v3123_v28 = vmul.f32 0.7978846, %v3119_v60  ;;  %v3369_v30 = vrot.slane %v5016_v43, 4 }
0x2356   :  { %4576 = vtanh.f32 %v3122_v61  ;;  %v3124_v63 = vmul.f32 0.7978846, %v3120_v51  ;;  %v3377_v60 = vadd.f32 %v3376_v46, %v5018_v21 }
0x2357   :  { %4578 = vtanh.f32 %v3123_v28  ;;  %v3370_v61 = vadd.f32 %v3369_v30, %v5016_v43 }
0x2358   :  { %4580 = vtanh.f32 %v3124_v63  ;;  %v3378_v51 = vrot.slane %v3377_v60, 2 }
0x2359   :  { %v3371_v63 = vrot.slane %v3370_v61, 2 }
0x235f   :  { %v4575_v2 = vpop.eup %4574 }
0x2360   :  { %v4577_v0 = vpop.eup %4576  ;;  %v3129_v3 = vadd.f32 1.0, %v4575_v2  ;;  %v3350_v2 = vrot.slane %v5135_v18, %v5011_v20 }
0x2361   :  { %v4579_v4 = vpop.eup %4578  ;;  %v3130_v5 = vadd.f32 1.0, %v4577_v0 }
0x2362   :  { %v4581_v7 = vpop.eup %4580  ;;  %v3133_v11 = vmul.f32 0.5, %v3129_v3  ;;  %v3131_v12 = vadd.f32 1.0, %v4579_v4 }
0x2363   :  { %v3132_v6 = vadd.f32 1.0, %v4581_v7  ;;  %v3134_v62 = vmul.f32 0.5, %v3130_v5  ;;  %v3379_v7 = vadd.f32 %v3378_v51, %v3377_v60 }
0x2364   :  { %v3135_v17 = vmul.f32 0.5, %v3131_v12  ;;  %v3137_v19 = vmul.f32 %v3133_v11, %v3097_v42 }
0x2365   :  { %v3136_v48 = vmul.f32 0.5, %v3132_v6  ;;  %v3138_v23 = vmul.f32 %v3134_v62, %v3099_v44  ;;  %v3372_v6 = vadd.f32 %v3371_v63, %v3370_v61  ;;  %v3380_v43 = vrot.slane %v3379_v7, 1 }
0x2366   :  { %v3139_v1 = vmul.f32 %v3135_v17, %v3101_v52 }
0x2367   :  { %v3140_v32 = vmul.f32 %v3136_v48, %v3103_v54  ;;  %v4478_v54 = vld [vmem:[#allocation9] sm:$0xff]  }
0x2368   :  { %v3141_v29 = vpack.c.bf16 %v3139_v1, %v3137_v19  ;;  %4131 = vmatpush3.bf16.msra.mxu1 %v4478_v54  ;;  %v3373_v19 = vrot.slane %v3372_v6, 1 }
0x2369   :  { %v3142_v50 = vpack.c.bf16 %v3140_v32, %v3138_v23  ;;  %4132 = vmatprep.subr.bf16.mxu1 %v4715_v39  ;;  %v3381_v23 = vadd.f32 %v3380_v43, %v3379_v7 }
0x236a   :  { %v3374_v20 = vadd.f32 %v3373_v19, %v3372_v6 }
0x236b   :  { %3308 = vmatprep.mubr.bf16.mxu0 %v3142_v50 }
0x236c   :  { %3309 = vmatmul.mubr.bf16.vlgmr.msra.gmra.mrb[36].mxu0 %v3141_v29  ;;  %4133 = vmatpush3.bf16.msra.mxu1 %v4479_v25 }
0x236d   :  { %4134 = vmatprep.subr.bf16.mxu1 %v4715_v39 }
0x243f   :  { %v3888_v35 = vpop.f32.mrb[36].mxu0 }
0x2440   :  { %v3889_v26 = vpop.f32.mrb[37].mxu0 }
0x2441   :  { %v3890_v37 = vadd.f32 %v3889_v26, %v3888_v35  ;;  %v3891_v38 = vpop.f32.mrb[38].mxu0  ;;  %v3382_v35 = vmul.f32 0.125, %v3381_v23 }
0x2442   :  { %v3892_v47 = vpop.f32.mrb[39].mxu0 }
0x2443   :  { %v3311_v40 = vadd.f32 %v3890_v37, %v3179_v27  ;;  %v3893_v31 = vadd.f32 %v3892_v47, %v3891_v38  ;;  %v3375_v37 = vmul.f32 0.125, %v3374_v20 }
0x2445   :  { %v3314_v41 = vadd.f32 %v3893_v31, %v3179_v27  ;;  %v3317_v15 = vadd.f32 %v3311_v40, %v5204_v14  ;;  %v4480_v14 = vld [vmem:[#allocation9 + $0x10] sm:$0xff]   ;;  %v3383_v47 = vsel %vm3367_vm12, %v3375_v37, %v3382_v35 }
0x2446   :  { %4135 = vmatpush3.bf16.msra.mxu1 %v4480_v14 }
0x2447   :  { %3319 = vadd.xlane.f32.xlu1 %v3317_v15  ;;  %v3318_v42 = vadd.f32 %v3314_v41, %v5206_v16  ;;  %4136 = vmatprep.subr.bf16.mxu1 %v4715_v39  ;;  %v4481_v16 = vld [vmem:[#allocation9 + $0x18] sm:$0xff]   ;;  %v3385_v41 = vrot.slane %v3383_v47, 6 }
0x2449   :  { %3321 = vadd.xlane.f32.xlu0 %v3318_v42 }
0x244a   :  { %4137 = vmatpush3.bf16.msra.mxu1 %v4481_v16 }
0x244b   :  { %4138 = vmatprep.subr.bf16.mxu1 %v4715_v39 }
0x244e   :  { %4139 = vmatpush3.bf16.msra.mxu1 %v4482_v10 }
0x244f   :  { %4140 = vmatprep.subr.bf16.mxu1 %v4715_v39 }
0x2452   :  { %4141 = vmatpush3.bf16.msra.mxu1 %v4483_v56 }
0x2453   :  { %4142 = vmatprep.subr.bf16.mxu1 %v4715_v39 }
0x2456   :  { %4143 = vmatpush3.bf16.msra.mxu1 %v4484_v53 }
0x2457   :  { %4144 = vmatprep.subr.bf16.mxu1 %v4715_v39  ;;  %v3344_v39 = vrot.slane %v5135_v18, %v5006_v33 }
0x245a   :  { %4145 = vmatpush3.bf16.msra.mxu1 %v4485_v55 }
0x24d4   :  { %v3320_v22 = vpop.xlane.xlu1 %3319 }
0x24d5   :  { %v3323_v44 = vmul.f32 0.0078125, %v3320_v22 }
0x24d6   :  { %v3322_v45 = vpop.xlane.xlu0 %3321 }
0x24d7   :  { %v3325_v9 = vsub.f32 %v3317_v15, %v3323_v44  ;;  %v3324_v52 = vmul.f32 0.0078125, %v3322_v45  ;;  %v3720_v44 = vld [vmem:[#allocation2 + $0x2] ss:$0 sm:$0xff] }
0x24d9   :  { %v3326_v13 = vsub.f32 %v3318_v42, %v3324_v52  ;;  %v3327_v34 = vmul.f32 %v3325_v9, %v3325_v9 }
0x24db   :  { %3329 = vadd.xlane.f32.xlu1 %v3327_v34  ;;  %v3328_v8 = vmul.f32 %v3326_v13, %v3326_v13 }
0x24dd   :  { %3331 = vadd.xlane.f32.xlu0 %v3328_v8 }
0x2568   :  { %v3330_v57 = vpop.xlane.xlu1 %3329 }
0x2569   :  { %v3333_v58 = vmul.f32 0.0078125, %v3330_v57 }
0x256a   :  { %v3332_v49 = vpop.xlane.xlu0 %3331 }
0x256b   :  { %v3335_v59 = vadd.f32 1e-12, %v3333_v58  ;;  %v3334_v36 = vmul.f32 0.0078125, %v3332_v49 }
0x256d   :  { %4582 = vrsqrt.f32 %v3335_v59  ;;  %v3336_v24 = vadd.f32 1e-12, %v3334_v36 }
0x256f   :  { %4584 = vrsqrt.f32 %v3336_v24 }
0x2577   :  { %v4583_v28 = vpop.eup %4582 }
0x2578   :  { %v3339_v0 = vmul.f32 %v4583_v28, %v3325_v9 }
0x2579   :  { %v4585_v3 = vpop.eup %4584 }
0x257a   :  { %v3345_v4 = vmul.f32 %v3344_v39, %v3339_v0  ;;  %v3340_v5 = vmul.f32 %v4585_v3, %v3326_v13 }
0x257c   :  { %v3351_v11 = vadd.f32 %v3350_v2, %v3345_v4  ;;  %v3346_v12 = vmul.f32 %v3344_v39, %v3340_v5 }
0x257e   :  { %v3353_v21 = vrot.slane %v3351_v11, 4  ;;  %v3352_v62 = vadd.f32 %v3350_v2, %v3346_v12 }
0x2580   :  { %v3354_v17 = vadd.f32 %v3353_v21, %v3351_v11  ;;  %v3360_v48 = vrot.slane %v3352_v62, 4 }
0x2582   :  { %v3355_v33 = vrot.slane %v3354_v17, 2  ;;  %v3361_v1 = vadd.f32 %v3360_v48, %v3352_v62 }
0x2584   :  { %v3356_v32 = vadd.f32 %v3355_v33, %v3354_v17  ;;  %v3362_v29 = vrot.slane %v3361_v1, 2 }
0x2586   :  { %v3363_v18 = vadd.f32 %v3362_v29, %v3361_v1  ;;  %v3357_v50 = vrot.slane %v3356_v32, 1 }
0x2588   :  { %v3358_v27 = vadd.f32 %v3357_v50, %v3356_v32  ;;  %v3364_v26 = vrot.slane %v3363_v18, 1 }
0x258a   :  { %v3365_v38 = vadd.f32 %v3364_v26, %v3363_v18  ;;  %v3359_v40 = vmul.f32 0.125, %v3358_v27 }
0x258c   :  { %v3366_v31 = vmul.f32 0.125, %v3365_v38 }
0x258e   :  { %v3368_v15 = vsel %vm3367_vm12, %v3359_v40, %v3366_v31 }
0x258f   :  { %v3388_v42 = vsel %vm3387_vm13, %v3368_v15, %v3385_v41 }
0x2590   :  { %v3730_v22 = vpack.c.bf16 %v3388_v42, %v3388_v42 }
0x2592   :  { %4147 = vmatmul.mubr.msk.bf16.vlgmr.msra.gmra.mrb[72].mxu1 %vm3729_vm15, %v3730_v22 }
0x2665   :  { %v3495_v45 = vpop.f32.mrb[72].mxu1 }
0x2666   :  { %v3496_v9 = vadd.f32 %v3720_v44, %v3495_v45  ;;  %v4148_v52 = vpop.f32.mrb[73].mxu1 }
0x2667   :  { %v3498_v13 = vpop.f32.mrb[74].mxu1 }
0x2668   :  { %3501 = vst [vmem:[%s5245_s7] sm:$0xff] %v3496_v9  ;;  %v4149_v34 = vpop.f32.mrb[75].mxu1 }
0x2669   :  { %3506 = vsyncpa [#allocation3], 1 }
0x266a   :  { %3507 = vsyncpa [#allocation5], 1 }
0x266b   :  { %3508 = vsyncpa [#allocation8], 1 }

</bundles_post_ra>
